<compile_context>
chip_gen: v7x
topology: tpu7x:2x2x1
jax: 0.10.0
libtpu: 0.0.40
codegen_flags: <defaults>
</compile_context>

<pallas_src>
import math
from functools import partial

import jax
import jax.numpy as jnp
from jax.experimental import pallas as pl
from jax.experimental.pallas import tpu as pltpu

OMEGA_0 = 30.0


def _siren_kernel(use_tanh, num_sine_layers, *refs):
    # refs = (x_ref, w0, b0, w1, b1, ..., w_last, b_last, o_ref)
    # x_ref is (Cin, tile_p): channel-major, pixels on the 128-wide lane axis.
    x_ref = refs[0]
    o_ref = refs[-1]
    wb = refs[1:-1]

    h = x_ref[...].astype(jnp.float32)  # (Cin, tile_p)

    # Sine layers.  omega_0 is already folded into W/b, so: h = sin(W @ h + b)
    for i in range(num_sine_layers):
        w = wb[2 * i][...]        # (Cout_i, Cin_i)
        b = wb[2 * i + 1][...]    # (Cout_i, 1) -> broadcasts along lanes
        h = jnp.sin(jnp.dot(w, h, preferred_element_type=jnp.float32) + b)

    # Last linear (+ optional tanh).
    w_last = wb[2 * num_sine_layers][...]      # (Cout, C)
    b_last = wb[2 * num_sine_layers + 1][...]  # (Cout, 1)
    out = jnp.dot(w_last, h, preferred_element_type=jnp.float32) + b_last
    if use_tanh:
        out = jnp.tanh(out)
    o_ref[...] = out.astype(o_ref.dtype)


def _choose_tile_p(tile_p, N, P):
    """Pick a lane-dense pixel tile: multiple of 128, big enough to amortize
    per-step overhead, small enough that the grid has >=~4 steps (when the
    problem allows) so v7x's two TensorCores both get work."""
    p128 = pl.cdiv(P, 128) * 128
    tile_p = max(128, (int(tile_p) // 128) * 128)
    # Cap so the total grid has >= 4 steps, but never drop below 1024 pixels
    # just to split (that would re-expose per-step overhead).
    desired_pixel_tiles = max(1, -(-4 // N))          # ceil(4 / N)
    split_tile = pl.cdiv(pl.cdiv(P, desired_pixel_tiles), 128) * 128
    tile_p = min(tile_p, max(1024, split_tile))
    # Never exceed the 128-rounded problem size.
    tile_p = max(128, min(tile_p, p128))
    return tile_p


def siren_forward(x_nchw, weights, biases, *, use_tanh=False, tile_p=8192):
    """x_nchw: (N, Cin, H, W).  weights[i]: (Cout_i, Cin_i) (Conv2d layout,
    1x1 kernel dims squeezed), biases[i]: (Cout_i,)."""
    N, Cin, H, W = x_nchw.shape
    num_layers = len(weights)
    num_sine = num_layers - 1
    Cout = weights[-1].shape[0]

    # NCHW -> (N, Cin, P): trailing-dim merge only, no transpose / HBM copy.
    P = H * W
    x_ncp = x_nchw.reshape(N, Cin, P).astype(jnp.float32)

    tile_p = _choose_tile_p(tile_p, N, P)
    num_pixel_tiles = pl.cdiv(P, tile_p)   # ragged last block handled by Pallas

    # Fold omega_0 into the sine-layer weights/biases (host-side constant fold).
    wk, bk = [], []
    for i in range(num_layers):
        if i < num_sine:
            wk.append((OMEGA_0 * weights[i]).astype(jnp.float32))
            bk.append((OMEGA_0 * biases[i]).reshape(-1, 1).astype(jnp.float32))
        else:
            wk.append(weights[i].astype(jnp.float32))
            bk.append(biases[i].reshape(-1, 1).astype(jnp.float32))

    grid = (N, num_pixel_tiles)

    # Batch dim squeezed out of the kernel view -> kernel sees (Cin, tile_p).
    in_specs = [pl.BlockSpec((None, Cin, tile_p), lambda n, p: (n, 0, p))]
    flat_params = []
    for w, b in zip(wk, bk):
        in_specs.append(pl.BlockSpec(w.shape, lambda n, p: (0, 0)))
        in_specs.append(pl.BlockSpec(b.shape, lambda n, p: (0, 0)))
        flat_params.extend([w, b])

    out_spec = pl.BlockSpec((None, Cout, tile_p), lambda n, p: (n, 0, p))

    kernel = partial(_siren_kernel, use_tanh, num_sine)

    out_ncp = pl.pallas_call(
        kernel,
        out_shape=jax.ShapeDtypeStruct((N, Cout, P), jnp.float32),
        grid_spec=pltpu.PrefetchScalarGridSpec(
            num_scalar_prefetch=0,
            grid=grid,
            in_specs=in_specs,
            out_specs=out_spec,
        ),
        compiler_params=pltpu.CompilerParams(
            # Both axes independent -> shards across TensorCores (v7x megacore).
            dimension_semantics=("parallel", "parallel"),
        ),
    )(x_ncp, *flat_params)

    # (N, Cout, P) -> (N, Cout, H, W): free reshape, no transpose.
    return out_ncp.reshape(N, Cout, H, W)


def init_siren_params(key, in_channels, intermediate_channels, out_channels,
                      num_sine_layers):
    """Deterministic init mirroring the PyTorch module.  Weights kept in
    Conv2d's natural (Cout, Cin) orientation (1x1 kernel dims squeezed)."""
    weights, biases = [], []
    keys = jax.random.split(key, 2 * (num_sine_layers + 1))
    ki = 0

    # first sine layer: uniform(-1/in_channels, 1/in_channels)
    lim = 1.0 / in_channels
    w = jax.random.uniform(keys[ki], (intermediate_channels, in_channels),
                           minval=-lim, maxval=lim, dtype=jnp.float32); ki += 1
    b_lim = 1.0 / math.sqrt(in_channels)  # PyTorch Conv2d default bias init
    b = jax.random.uniform(keys[ki], (intermediate_channels,),
                           minval=-b_lim, maxval=b_lim, dtype=jnp.float32); ki += 1
    weights.append(w); biases.append(b)

    # remaining sine layers: uniform(-sqrt(6/fan_in)/omega_0, +...)
    for _ in range(num_sine_layers - 1):
        lim = math.sqrt(6.0 / intermediate_channels) / OMEGA_0
        w = jax.random.uniform(keys[ki],
                               (intermediate_channels, intermediate_channels),
                               minval=-lim, maxval=lim, dtype=jnp.float32); ki += 1
        b_lim = 1.0 / math.sqrt(intermediate_channels)
        b = jax.random.uniform(keys[ki], (intermediate_channels,),
                               minval=-b_lim, maxval=b_lim, dtype=jnp.float32); ki += 1
        weights.append(w); biases.append(b)

    # last linear: He (kaiming) init, deterministic
    std = math.sqrt(2.0 / intermediate_channels)
    w = std * jax.random.normal(keys[ki], (out_channels, intermediate_channels),
                                dtype=jnp.float32); ki += 1
    b = jnp.zeros((out_channels,), dtype=jnp.float32); ki += 1
    weights.append(w); biases.append(b)
    return weights, biases


def siren_reference(x_nchw, weights, biases, use_tanh=False):
    """Pure-JAX reference of the PyTorch forward (1x1 convs as channel matmuls)."""
    N, Cin, H, W = x_nchw.shape
    h = x_nchw.reshape(N, Cin, H * W).astype(jnp.float32)  # (N, C, P)
    num_sine = len(weights) - 1
    for i in range(num_sine):
        z = jnp.einsum('oc,ncp->nop', weights[i], h) + biases[i][None, :, None]
        h = jnp.sin(OMEGA_0 * z)
    out = jnp.einsum('oc,ncp->nop', weights[-1], h) + biases[-1][None, :, None]
    if use_tanh:
        out = jnp.tanh(out)
    Cout = weights[-1].shape[0]
    return out.reshape(N, Cout, H, W)


if __name__ == "__main__":
    # Small SirenArgs: in=4, intermediate=32, out=3, num_sine_layers=3.
    key = jax.random.PRNGKey(0)
    k_x, k_x2, k_p = jax.random.split(key, 3)

    N, Cin, H, W = 2, 4, 16, 16
    intermediate_channels = 32
    out_channels = 3
    num_sine_layers = 3

    weights, biases = init_siren_params(
        k_p, Cin, intermediate_channels, out_channels, num_sine_layers)

    # Main check: no tanh, pixel count divisible by 128.
    x = jax.random.normal(k_x, (N, Cin, H, W), dtype=jnp.float32)
    out = siren_forward(x, weights, biases, use_tanh=False)
    out = jax.block_until_ready(out)
    ref = siren_reference(x, weights, biases, use_tanh=False)
    assert out.shape == (N, out_channels, H, W), out.shape
    assert jnp.allclose(out, ref, atol=5e-4, rtol=5e-4), "mismatch vs reference"

    # Secondary check: ragged pixel count (exercises the masked-final-block
    # path, no host-side padding) + tanh head.
    x2 = jax.random.normal(k_x2, (N, Cin, 15, 15), dtype=jnp.float32)
    out2 = siren_forward(x2, weights, biases, use_tanh=True)
    out2 = jax.block_until_ready(out2)
    ref2 = siren_reference(x2, weights, biases, use_tanh=True)
    assert out2.shape == (N, out_channels, 15, 15), out2.shape
    assert jnp.allclose(out2, ref2, atol=5e-4, rtol=5e-4), "mismatch vs reference (tanh)"

    print("KERNEL_OK")
</pallas_src>

<mosaic_0001>
module attributes {stable_mosaic.version = 11 : i64} {
  func.func @_siren_kernel(%arg0: i32, %arg1: i32, %arg2: memref<1x4x256xf32, #tpu.memory_space<vmem>>, %arg3: memref<32x4xf32, #tpu.memory_space<vmem>>, %arg4: memref<32x1xf32, #tpu.memory_space<vmem>>, %arg5: memref<32x32xf32, #tpu.memory_space<vmem>>, %arg6: memref<32x1xf32, #tpu.memory_space<vmem>>, %arg7: memref<32x32xf32, #tpu.memory_space<vmem>>, %arg8: memref<32x1xf32, #tpu.memory_space<vmem>>, %arg9: memref<3x32xf32, #tpu.memory_space<vmem>>, %arg10: memref<3x1xf32, #tpu.memory_space<vmem>>, %arg11: memref<1x3x256xf32, #tpu.memory_space<vmem>>) attributes {dimension_semantics = [#tpu.dimension_semantics<parallel>, #tpu.dimension_semantics<parallel>], iteration_bounds = array<i64: 2, 1>, scalar_prefetch = 0 : i64, scratch_operands = 0 : i64, tpu.core_type = #tpu.core_type<tc>, window_params = [{transform_indices = @transform_0, window_bounds = array<i64: 1, 4, 256>}, {pipeline_mode = #tpu.pipeline_mode<synchronous>, transform_indices = @transform_1, window_bounds = array<i64: 32, 4>}, {pipeline_mode = #tpu.pipeline_mode<synchronous>, transform_indices = @transform_2, window_bounds = array<i64: 32, 1>}, {pipeline_mode = #tpu.pipeline_mode<synchronous>, transform_indices = @transform_3, window_bounds = array<i64: 32, 32>}, {pipeline_mode = #tpu.pipeline_mode<synchronous>, transform_indices = @transform_4, window_bounds = array<i64: 32, 1>}, {pipeline_mode = #tpu.pipeline_mode<synchronous>, transform_indices = @transform_5, window_bounds = array<i64: 32, 32>}, {pipeline_mode = #tpu.pipeline_mode<synchronous>, transform_indices = @transform_6, window_bounds = array<i64: 32, 1>}, {pipeline_mode = #tpu.pipeline_mode<synchronous>, transform_indices = @transform_7, window_bounds = array<i64: 3, 32>}, {pipeline_mode = #tpu.pipeline_mode<synchronous>, transform_indices = @transform_8, window_bounds = array<i64: 3, 1>}, {transform_indices = @transform_9, window_bounds = array<i64: 1, 3, 256>}]} {
    %c0 = arith.constant 0 : index
    %c0_0 = arith.constant 0 : index
    %c0_1 = arith.constant 0 : index
    %0 = vector.load %arg2[%c0, %c0_0, %c0_1] : memref<1x4x256xf32, #tpu.memory_space<vmem>>, vector<1x4x256xf32>
    %1 = vector.shape_cast %0 : vector<1x4x256xf32> to vector<4x256xf32>
    %c0_2 = arith.constant 0 : index
    %c0_3 = arith.constant 0 : index
    %2 = vector.load %arg3[%c0_2, %c0_3] : memref<32x4xf32, #tpu.memory_space<vmem>>, vector<32x4xf32>
    %c0_4 = arith.constant 0 : index
    %c0_5 = arith.constant 0 : index
    %3 = vector.load %arg4[%c0_4, %c0_5] : memref<32x1xf32, #tpu.memory_space<vmem>>, vector<32x1xf32>
    %cst = arith.constant dense<0.000000e+00> : vector<32x256xf32>
    %4 = tpu.matmul %2, %1, %cst {dimension_numbers = #tpu.dot_dimension_numbers<[1], [0], [0], [1], [0, 0, 1, 1], [], []>} : vector<32x4xf32>, vector<4x256xf32>, vector<32x256xf32> -> vector<32x256xf32>
    %5 = vector.broadcast %3 : vector<32x1xf32> to vector<32x256xf32>
    %6 = arith.addf %4, %5 : vector<32x256xf32>
    %7 = math.sin %6 : vector<32x256xf32>
    %c0_6 = arith.constant 0 : index
    %c0_7 = arith.constant 0 : index
    %8 = vector.load %arg5[%c0_6, %c0_7] : memref<32x32xf32, #tpu.memory_space<vmem>>, vector<32x32xf32>
    %c0_8 = arith.constant 0 : index
    %c0_9 = arith.constant 0 : index
    %9 = vector.load %arg6[%c0_8, %c0_9] : memref<32x1xf32, #tpu.memory_space<vmem>>, vector<32x1xf32>
    %cst_10 = arith.constant dense<0.000000e+00> : vector<32x256xf32>
    %10 = tpu.matmul %8, %7, %cst_10 {dimension_numbers = #tpu.dot_dimension_numbers<[1], [0], [0], [1], [0, 0, 1, 1], [], []>} : vector<32x32xf32>, vector<32x256xf32>, vector<32x256xf32> -> vector<32x256xf32>
    %11 = vector.broadcast %9 : vector<32x1xf32> to vector<32x256xf32>
    %12 = arith.addf %10, %11 : vector<32x256xf32>
    %13 = math.sin %12 : vector<32x256xf32>
    %c0_11 = arith.constant 0 : index
    %c0_12 = arith.constant 0 : index
    %14 = vector.load %arg7[%c0_11, %c0_12] : memref<32x32xf32, #tpu.memory_space<vmem>>, vector<32x32xf32>
    %c0_13 = arith.constant 0 : index
    %c0_14 = arith.constant 0 : index
    %15 = vector.load %arg8[%c0_13, %c0_14] : memref<32x1xf32, #tpu.memory_space<vmem>>, vector<32x1xf32>
    %cst_15 = arith.constant dense<0.000000e+00> : vector<32x256xf32>
    %16 = tpu.matmul %14, %13, %cst_15 {dimension_numbers = #tpu.dot_dimension_numbers<[1], [0], [0], [1], [0, 0, 1, 1], [], []>} : vector<32x32xf32>, vector<32x256xf32>, vector<32x256xf32> -> vector<32x256xf32>
    %17 = vector.broadcast %15 : vector<32x1xf32> to vector<32x256xf32>
    %18 = arith.addf %16, %17 : vector<32x256xf32>
    %19 = math.sin %18 : vector<32x256xf32>
    %c0_16 = arith.constant 0 : index
    %c0_17 = arith.constant 0 : index
    %20 = vector.load %arg9[%c0_16, %c0_17] : memref<3x32xf32, #tpu.memory_space<vmem>>, vector<3x32xf32>
    %c0_18 = arith.constant 0 : index
    %c0_19 = arith.constant 0 : index
    %21 = vector.load %arg10[%c0_18, %c0_19] : memref<3x1xf32, #tpu.memory_space<vmem>>, vector<3x1xf32>
    %cst_20 = arith.constant dense<0.000000e+00> : vector<3x256xf32>
    %22 = tpu.matmul %20, %19, %cst_20 {dimension_numbers = #tpu.dot_dimension_numbers<[1], [0], [0], [1], [0, 0, 1, 1], [], []>} : vector<3x32xf32>, vector<32x256xf32>, vector<3x256xf32> -> vector<3x256xf32>
    %23 = vector.broadcast %21 : vector<3x1xf32> to vector<3x256xf32>
    %24 = arith.addf %22, %23 : vector<3x256xf32>
    %c0_21 = arith.constant 0 : index
    %c0_22 = arith.constant 0 : index
    %c0_23 = arith.constant 0 : index
    %25 = vector.load %arg11[%c0_21, %c0_22, %c0_23] : memref<1x3x256xf32, #tpu.memory_space<vmem>>, vector<1x3x256xf32>
    %26 = vector.shape_cast %25 : vector<1x3x256xf32> to vector<3x256xf32>
    %27 = vector.shape_cast %24 : vector<3x256xf32> to vector<1x3x256xf32>
    tpu.vector_store %arg11[%c0_21, %c0_22, %c0_23], %27 {strides = array<i32>} : memref<1x3x256xf32, #tpu.memory_space<vmem>>, vector<1x3x256xf32>,
    return
  }
  func.func @transform_0(%arg0: i32, %arg1: i32) -> (i32, i32, i32) {
    %c0_i32 = arith.constant 0 : i32
    %c0_i32_0 = arith.constant 0 : i32
    return %arg0, %c0_i32, %arg1 : i32, i32, i32
  }
  func.func @transform_1(%arg0: i32, %arg1: i32) -> (i32, i32) {
    %c0_i32 = arith.constant 0 : i32
    %c0_i32_0 = arith.constant 0 : i32
    %c0_i32_1 = arith.constant 0 : i32
    return %c0_i32, %c0_i32_0 : i32, i32
  }
  func.func @transform_2(%arg0: i32, %arg1: i32) -> (i32, i32) {
    %c0_i32 = arith.constant 0 : i32
    %c0_i32_0 = arith.constant 0 : i32
    %c0_i32_1 = arith.constant 0 : i32
    return %c0_i32, %c0_i32_0 : i32, i32
  }
  func.func @transform_3(%arg0: i32, %arg1: i32) -> (i32, i32) {
    %c0_i32 = arith.constant 0 : i32
    %c0_i32_0 = arith.constant 0 : i32
    %c0_i32_1 = arith.constant 0 : i32
    return %c0_i32, %c0_i32_0 : i32, i32
  }
  func.func @transform_4(%arg0: i32, %arg1: i32) -> (i32, i32) {
    %c0_i32 = arith.constant 0 : i32
    %c0_i32_0 = arith.constant 0 : i32
    %c0_i32_1 = arith.constant 0 : i32
    return %c0_i32, %c0_i32_0 : i32, i32
  }
  func.func @transform_5(%arg0: i32, %arg1: i32) -> (i32, i32) {
    %c0_i32 = arith.constant 0 : i32
    %c0_i32_0 = arith.constant 0 : i32
    %c0_i32_1 = arith.constant 0 : i32
    return %c0_i32, %c0_i32_0 : i32, i32
  }
  func.func @transform_6(%arg0: i32, %arg1: i32) -> (i32, i32) {
    %c0_i32 = arith.constant 0 : i32
    %c0_i32_0 = arith.constant 0 : i32
    %c0_i32_1 = arith.constant 0 : i32
    return %c0_i32, %c0_i32_0 : i32, i32
  }
  func.func @transform_7(%arg0: i32, %arg1: i32) -> (i32, i32) {
    %c0_i32 = arith.constant 0 : i32
    %c0_i32_0 = arith.constant 0 : i32
    %c0_i32_1 = arith.constant 0 : i32
    return %c0_i32, %c0_i32_0 : i32, i32
  }
  func.func @transform_8(%arg0: i32, %arg1: i32) -> (i32, i32) {
    %c0_i32 = arith.constant 0 : i32
    %c0_i32_0 = arith.constant 0 : i32
    %c0_i32_1 = arith.constant 0 : i32
    return %c0_i32, %c0_i32_0 : i32, i32
  }
  func.func @transform_9(%arg0: i32, %arg1: i32) -> (i32, i32, i32) {
    %c0_i32 = arith.constant 0 : i32
    %c0_i32_0 = arith.constant 0 : i32
    return %arg0, %c0_i32, %arg1 : i32, i32, i32
  }
}

</mosaic_0001>

<bundles_post_ra>
// kernel: tpu_custom_call.1
= control target key start
LH: loop header
LB: loop body
LE: loop exit
PB: predicated region body
PF: predicated region fallthrough
CT: control target
= control target key end

     0   :  { %s3897_s30 = smov 0   ;;  %s3899_s10 = smov 0   ;;  %s5995_s0 = inlined_call_operand.vmem [shape: f32[2,4,256], index: 0, kind: input, shape index: {}]   ;;  %s5996_s1 = inlined_call_operand.vmem [shape: f32[32,4], index: 1, kind: input, shape index: {}]   ;;  %s5997_s2 = inlined_call_operand.vmem [shape: f32[32,1], index: 2, kind: input, shape index: {}]   ;;  %s5998_s3 = inlined_call_operand.vmem [shape: f32[32,32], index: 3, kind: input, shape index: {}]   ;;  %s5999_s4 = inlined_call_operand.vmem [shape: f32[32,1], index: 4, kind: input, shape index: {}]   ;;  %s6000_s5 = inlined_call_operand.vmem [shape: f32[32,32], index: 5, kind: input, shape index: {}]   ;;  %s6001_s6 = inlined_call_operand.vmem [shape: f32[32,1], index: 6, kind: input, shape index: {}]   ;;  %s6002_s7 = inlined_call_operand.vmem [shape: f32[3,32], index: 7, kind: input, shape index: {}]   ;;  %s6003_s8 = inlined_call_operand.vmem [shape: f32[3,1], index: 8, kind: input, shape index: {}]   ;;  %s6004_s9 = inlined_call_operand.vmem [shape: f32[2,3,256], index: 9, kind: output, shape index: {}]  }
   0x1   :  { %s3901_s11 = smov 0  }
   0x2 LB: > { %s31_s12 = sadd.s32 1, %s3833_s10  ;;  %p3442_p0 = scmp.ge.s32.totalorder %s3837_s11, 1  ;;  %s3837_s11 = sphi %s3901_s11, %s19_s11   ;;  %s3833_s10 = sphi %s3899_s10, %s6123_s10   ;;  %s3829_s30 = sphi %s3897_s30, %s6122_s30  }
   0x3   : > { %p33_p1 = scmp.ge.s32.totalorder %s31_s12, 2  ;;  %p308_p2 = scmp.lt.s32.totalorder %s3837_s11, 3 }
   0x5   : > { %s6125_s12 = smov (%p33_p1, %s31_s12), 0  ;;  %p309_p3 = pnand %p3442_p0, %p308_p2 }
   0x6   : > { %p353_p4 = scmp.lt.s32.totalorder (!%p309_p3), %s3829_s30, 1  ;;  %v6005_v0 = vmov (!%p309_p3), 0.0   ;;  %v377_v1 = vld [vmem:[%s5997_s2] sm:$0xff] (!%p309_p3)  ;;  %v3840_v2 = vmov (!%p309_p3), 0   ;;  %v379_v3 = vld [vmem:[%s5997_s2 + $0x10] sm:$0xff] (!%p309_p3)  ;;  %v378_v4 = vld [vmem:[%s5997_s2 + $0x8] sm:$0xff] (!%p309_p3) }
   0x7   : > { %312 = sbr.rel (%p309_p3) target bundleno = 1543 (0x607), region = 56  ;;  %485 = vmatprep.mubr.f32.mxu0 (!%p309_p3), %v6005_v0  ;;  %497 = vmatprep.mubr.f32.mxu1 (!%p309_p3), %v6005_v0  ;;  %v380_v5 = vld [vmem:[%s5997_s2 + $0x18] sm:$0xff] (!%p309_p3)  ;;  %vm416_vm0 = vcmask (!%p309_p3), 1043456   ;;  %v373_v8 = vld [vmem:[%s5996_s1] sm:$0xff] (!%p309_p3)  ;;  %vm403_vm1 = vcmask (!%p309_p3), 31744   ;;  %v375_v9 = vld [vmem:[%s5996_s1 + $0x10] sm:$0xff] (!%p309_p3) }
   0x8   : > { %3716 = vset.pattern.permute.xlu0 (!%p309_p3), %v3840_v2  ;;  %3717 = vset.pattern.permute.xlu1 (!%p309_p3), %v3840_v2  ;;  %v1346_v10 = vld [vmem:[%s5999_s4] sm:$0xff] (!%p309_p3)  ;;  %v1347_v11 = vld [vmem:[%s5999_s4 + $0x8] sm:$0xff] (!%p309_p3)  ;;  %v376_v13 = vld [vmem:[%s5996_s1 + $0x18] sm:$0xff] (!%p309_p3)  ;;  %v6027_v59 = vmov (!%p309_p3), 683565275  }
   0x9   : > { %383 = vperm.xlu0 (!%p309_p3), %3716, %v377_v1   ;;  %393 = vperm.xlu1 (!%p309_p3), %3717, %v379_v3   ;;  %v374_v12 = vld [vmem:[%s5996_s1 + $0x8] sm:$0xff] (!%p309_p3)  ;;  %v1348_v14 = vld [vmem:[%s5999_s4 + $0x10] sm:$0xff] (!%p309_p3)  ;;  %v1349_v15 = vld [vmem:[%s5999_s4 + $0x18] sm:$0xff] (!%p309_p3)  ;;  %v6025_v63 = vmov (!%p309_p3), 2475754826  }
   0xa   : > { %v2308_v16 = vld [vmem:[%s6001_s6] sm:$0xff] (!%p309_p3)  ;;  %v2309_v17 = vld [vmem:[%s6001_s6 + $0x8] sm:$0xff] (!%p309_p3)  ;;  %v2310_v18 = vld [vmem:[%s6001_s6 + $0x10] sm:$0xff] (!%p309_p3)  ;;  %v6019_v2 = vmov (!%p309_p3), 2131351028  }
   0xb   : > { %v2311_v19 = vld [vmem:[%s6001_s6 + $0x18] sm:$0xff] (!%p309_p3)  ;;  %v3266_v20 = vld [vmem:[%s6003_s8] sm:$0x7] (!%p309_p3) }
   0xd   : > { %388 = vperm.xlu0 (!%p309_p3), %3716, %v378_v4   ;;  %398 = vperm.xlu1 (!%p309_p3), %3717, %v380_v5   ;;  %v6017_v4 = vmov (!%p309_p3), 2102212464  }
   0xe   : > { %s6127_s30 = smov (!%p353_p4, %s3829_s30), 1 }
   0xf   : > { %s3560_s17 = sshll.u32 %s6127_s30, 3 }
  0x10   : > { %s360_s24 = scalar_lea.vmem %s5995_s0, %s3560_s17  ;;  %s370_s23 = scalar_lea.vmem %s6004_s9, %s3560_s17 }
  0x11   : > { %v372_v6 = vld [vmem:[%s360_s24] sm:$0xff]  ;;  %1352 = vperm.xlu0 %3716, %v1346_v10   ;;  %1357 = vperm.xlu1 %3717, %v1347_v11  }
  0x12   : > { %v402_v7 = vcombine.high %v372_v6, %v372_v6 }
  0x14   : > { %3447 = vmatprep.subr.msk.mxu0 %vm416_vm0, %v402_v7  ;;  %3586 = vmatprep.subr.msk.mxu1 %vm416_vm0, %v402_v7 }
  0x15   : > { %3448 = vmatpush1.msk.msra.mxu0 %vm416_vm0, %v372_v6  ;;  %3587 = vmatpush1.msk.msra.mxu1 %vm416_vm0, %v372_v6  ;;  %v6015_v6 = vmov 920167782  }
  0x16   : > { %3449 = vmatmul.mubr.msk.f32.vlgmr.msra.gmra.mrb[0].mxu0 %vm403_vm1, %v373_v8  ;;  %3451 = vmatmul.mubr.msk.f32.vlgmr.msra.gmra.mrb[0].mxu1 %vm403_vm1, %v375_v9 }
  0x17   : > { %491 = vmatprep.mubr.f32.mxu0 %v6005_v0  ;;  %503 = vmatprep.mubr.f32.mxu1 %v6005_v0 }
  0x18   : > { %1362 = vperm.xlu0 %3716, %v1348_v14   ;;  %1367 = vperm.xlu1 %3717, %v1349_v15  }
  0x1a   : > { %3450 = vmatmul.mubr.msk.f32.gmra.mrb[2].mxu0 %vm403_vm1, %v374_v12  ;;  %3452 = vmatmul.mubr.msk.f32.gmra.mrb[2].mxu1 %vm403_vm1, %v376_v13  ;;  %v6012_v13 = vmov 1326507024  }
  0x1b   : > { %1447 = vmatprep.mubr.f32.mxu1 %v6005_v0  ;;  %2408 = vmatprep.mubr.f32.mxu0 %v6005_v0 }
  0x1c   : > { %2314 = vperm.xlu0 %3716, %v2308_v16   ;;  %2319 = vperm.xlu1 %3717, %v2309_v17  }
  0x20   : > { %2324 = vperm.xlu0 %3716, %v2310_v18   ;;  %2329 = vperm.xlu1 %3717, %v2311_v19  }
  0x24   : > { %3269 = vperm.xlu0 %3716, %v3266_v20  }
  0x88   : > { %v384_v21 = vpop.permute.xlu0 %383  ;;  %v394_v22 = vpop.permute.xlu1 %393 }
  0xe9   : > { %v487_v23 = vpop.f32.mrb[0].mxu0  ;;  %v499_v24 = vpop.f32.mrb[0].mxu1 }
  0xea   : > { %v3984_v25 = vadd.f32 %v487_v23, %v384_v21  ;;  %v3986_v26 = vadd.f32 %v499_v24, %v394_v22  ;;  %v489_v27 = vpop.f32.mrb[1].mxu0  ;;  %v501_v28 = vpop.f32.mrb[1].mxu1 }
  0xeb   : > { %v3988_v29 = vadd.f32 %v489_v27, %v384_v21  ;;  %v4014_v57 = vadd.f32 %v501_v28, %v394_v22 }
  0xec   : > { %v510_v30 = vand.u32 2147483647, %v3984_v25  ;;  %v513_v31 = vand.u32 2139095040, %v3984_v25  ;;  %v929_v32 = vand.u32 2139095040, %v3986_v26  ;;  %v6009_v37 = vand.u32 2147483647, %v3986_v26 }
  0xed   : > { %v3993_v33 = vpop.f32.mrb[2].mxu0  ;;  %v617_v35 = vand.u32 2139095040, %v3988_v29  ;;  %v3999_v41 = vpop.f32.mrb[2].mxu1 }
  0xee   : > { %v514_v34 = vshrl.u32 %v513_v31, 23  ;;  %v517_v36 = vand.u32 8388607, %v510_v30  ;;  %v930_v38 = vshrl.u32 %v929_v32, 23  ;;  %v4001_v45 = vpop.f32.mrb[3].mxu0  ;;  %v4003_v46 = vpop.f32.mrb[3].mxu1 }
  0xef   : > { %v618_v40 = vshrl.u32 %v617_v35, 23  ;;  %v4007_v48 = vand.u32 8388607, %v6009_v37 }
  0xf0   : > { %v3453_v39 = vadd.s32 4294967169, %v514_v34  ;;  %v3469_v42 = vadd.s32 4294967169, %v930_v38  ;;  %v518_v47 = vor.u32 8388608, %v517_v36 }
  0xf1   : > { %v3457_v44 = vadd.s32 4294967169, %v618_v40  ;;  %v934_v56 = vor.u32 8388608, %v4007_v48 }
  0xf2   : > { %v520_v43 = vadd.s32 1, %v3453_v39  ;;  %v936_v49 = vadd.s32 1, %v3469_v42  ;;  %v4011_v55 = vshll.u32 %v518_v47, 8 }
  0xf3   : > { %v4009_v54 = vadd.s32 1, %v3457_v44 }
  0xf4   : > { %vm521_vm2 = vcmp.gt.s32.totalorder %v520_v43, 0  ;;  %vm937_vm3 = vcmp.gt.s32.totalorder %v936_v49, 0 }
  0xf5   : > { %v522_v50 = vsel %vm521_vm2, %v520_v43, 0  ;;  %v938_v53 = vsel %vm937_vm3, %v936_v49, 0  ;;  %vm625_vm5 = vcmp.gt.s32.totalorder %v4009_v54, 0 }
  0xf6   : > { %v523_v51 = vshrl.u32 %v522_v50, 5  ;;  %v524_v52 = vand.u32 31, %v522_v50  ;;  %v4017_v61 = vshrl.u32 %v938_v53, 5  ;;  %v940_v62 = vand.u32 31, %v938_v53 }
  0xf8   : > { %v525_v58 = vsub.s32 32, %v524_v52  ;;  %v527_v60 = vshll.u32 %v6027_v59, %v524_v52  ;;  %v530_v1 = vshll.u32 %v6025_v63, %v524_v52  ;;  %v533_v3 = vshll.u32 %v6019_v2, %v524_v52 }
  0xf9   : > { %v536_v5 = vshll.u32 %v6017_v4, %v524_v52  ;;  %v539_v7 = vshll.u32 %v6015_v6, %v524_v52  ;;  %vm542_vm4 = vcmp.lt.s32.totalorder %v523_v51, 1  ;;  %vm544_vm6 = vcmp.lt.s32.totalorder %v523_v51, 3 }
  0xfa   : > { %v528_v8 = vshrl.u32 %v6025_v63, %v525_v58  ;;  %v531_v9 = vshrl.u32 %v6019_v2, %v525_v58  ;;  %v534_v10 = vshrl.u32 %v6017_v4, %v525_v58  ;;  %v526_v11 = vshrl.u32 %v6027_v59, %v525_v58 }
  0xfb   : > { %v537_v12 = vshrl.u32 %v6015_v6, %v525_v58  ;;  %v540_v14 = vshrl.u32 %v6012_v13, %v525_v58  ;;  %v941_v18 = vsub.s32 32, %v940_v62  ;;  %vm545_vm7 = vcmp.lt.s32.totalorder %v523_v51, 4 }
  0xfc   : > { %v529_v15 = vor.u32 %v528_v8, %v527_v60  ;;  %v532_v16 = vor.u32 %v531_v9, %v530_v1  ;;  %v535_v17 = vor.u32 %v534_v10, %v533_v3  ;;  %v943_v21 = vshll.u32 %v6027_v59, %v940_v62 }
  0xfd   : > { %v538_v19 = vor.u32 %v537_v12, %v536_v5  ;;  %v541_v20 = vor.u32 %v540_v14, %v539_v7  ;;  %v946_v34 = vshll.u32 %v6025_v63, %v940_v62  ;;  %vm543_vm8 = vcmp.lt.s32.totalorder %v523_v51, 2 }
  0xfe   : > { %v546_v22 = vsel %vm542_vm4, %v526_v11, %v529_v15  ;;  %v547_v23 = vsel %vm545_vm7, %v535_v17, 2102212464  ;;  %v550_v24 = vsel %vm542_vm4, %v529_v15, %v532_v16  ;;  %v554_v27 = vsel %vm542_vm4, %v532_v16, %v535_v17 }
  0xff   : > { %v548_v28 = vsel %vm544_vm6, %v532_v16, %v547_v23  ;;  %v551_v31 = vsel %vm545_vm7, %v538_v19, 920167782  ;;  %v555_v32 = vsel %vm545_vm7, %v541_v20, 1326507024  ;;  %v944_v38 = vshrl.u32 %v6025_v63, %v941_v18 }
 0x100   : > { %v552_v35 = vsel %vm544_vm6, %v535_v17, %v551_v31  ;;  %v556_v36 = vsel %vm544_vm6, %v538_v19, %v555_v32  ;;  %v549_v39 = vsel %vm543_vm8, %v546_v22, %v548_v28  ;;  %v947_v43 = vshrl.u32 %v6019_v2, %v941_v18 }
 0x101   : > { %v553_v40 = vsel %vm543_vm8, %v550_v24, %v552_v35  ;;  %v557_v42 = vsel %vm543_vm8, %v554_v27, %v556_v36  ;;  %v945_v52 = vor.u32 %v944_v38, %v943_v21  ;;  %v949_v51 = vshll.u32 %v6019_v2, %v940_v62 }
 0x102   : > { %v4041_v44 = vmul.u32.u64.low %v4011_v55, %v557_v42  ;;  %v4042_v47 = vmul.u32.u64.high %v4011_v55, %v557_v42, %v4041_v44  ;;  %v4045_v49 = vmul.u32.u64.low %v4011_v55, %v553_v40  ;;  %v4046_v50 = vmul.u32.u64.high %v4011_v55, %v553_v40, %v4045_v49 }
 0x103   : > { %v948_v53 = vor.u32 %v947_v43, %v946_v34  ;;  %v950_v58 = vshrl.u32 %v6017_v4, %v941_v18  ;;  %v952_v60 = vshll.u32 %v6017_v4, %v940_v62  ;;  %v953_v1 = vshrl.u32 %v6015_v6, %v941_v18 }
 0x104   : > { %v955_v3 = vshll.u32 %v6015_v6, %v940_v62  ;;  %v956_v5 = vshrl.u32 %v6012_v13, %v941_v18  ;;  %v942_v7 = vshrl.u32 %v6027_v59, %v941_v18  ;;  %v4058_v9 = vshll.u32 %v934_v56, 8 }
 0x105   : > { %v951_v8 = vor.u32 %v950_v58, %v949_v51  ;;  %v626_v10 = vsel %vm625_vm5, %v4009_v54, 0  ;;  %vm567_vm9 = vc.u32 %v4042_v47, %v4045_v49  ;;  %v568_v11 = vadd.s32 1, %v4046_v50 }
 0x106   : > { %v954_v12 = vor.u32 %v953_v1, %v952_v60  ;;  %vm958_vm10 = vcmp.lt.s32.totalorder %v4017_v61, 1  ;;  %v565_v62 = vmul.u32 %v4011_v55, %v549_v39  ;;  %v957_v14 = vor.u32 %v956_v5, %v955_v3 }
 0x107   : > { %vm961_vm11 = vcmp.lt.s32.totalorder %v4017_v61, 4  ;;  %v966_v48 = vsel %vm958_vm10, %v945_v52, %v948_v53  ;;  %v569_v56 = vsel %vm567_vm9, %v568_v11, %v4046_v50  ;;  %vm960_vm12 = vcmp.lt.s32.totalorder %v4017_v61, 3 }
 0x108   : > { %v967_v54 = vsel %vm961_vm11, %v954_v12, 920167782  ;;  %v970_v15 = vsel %vm958_vm10, %v948_v53, %v951_v8  ;;  %v570_v16 = vadd.s32 %v569_v56, %v565_v62  ;;  %vm959_vm13 = vcmp.lt.s32.totalorder %v4017_v61, 2 }
 0x109   : > { %v968_v55 = vsel %vm960_vm12, %v951_v8, %v967_v54  ;;  %v971_v17 = vsel %vm961_vm11, %v957_v14, 1326507024  ;;  %v963_v18 = vsel %vm961_vm11, %v951_v8, 2102212464  ;;  %v6014_v21 = vand.u32 2147483647, %v3988_v29 }
 0x10a   : > { %v969_v19 = vsel %vm959_vm13, %v966_v48, %v968_v55  ;;  %v972_v20 = vsel %vm960_vm12, %v954_v12, %v971_v17  ;;  %v571_v22 = vadd.s32 536870912, %v570_v16  ;;  %v628_v32 = vand.u32 31, %v626_v10 }
 0x10b   : > { %v973_v23 = vsel %vm959_vm13, %v970_v15, %v972_v20  ;;  %v4086_v24 = vmul.u32.u64.low %v4058_v9, %v969_v19  ;;  %v4087_v27 = vmul.u32.u64.high %v4058_v9, %v969_v19, %v4086_v24  ;;  %v1033_v34 = vand.u32 2139095040, %v4014_v57 }
 0x10c   : > { %v4091_v28 = vmul.u32.u64.low %v4058_v9, %v973_v23  ;;  %v4092_v31 = vmul.u32.u64.high %v4058_v9, %v973_v23, %v4091_v28  ;;  %v962_v35 = vsel %vm958_vm10, %v942_v7, %v945_v52  ;;  %v964_v36 = vsel %vm960_vm12, %v948_v53, %v963_v18 }
 0x10d   : > { %v629_v38 = vsub.s32 32, %v628_v32  ;;  %v4099_v39 = vshrl.u32 %v571_v22, 30  ;;  %v965_v40 = vsel %vm959_vm13, %v962_v35, %v964_v36  ;;  %v621_v42 = vand.u32 8388607, %v6014_v21 }
 0x10e   : > { %v1034_v43 = vshrl.u32 %v1033_v34, 23  ;;  %v984_v44 = vadd.s32 1, %v4087_v27  ;;  %v627_v50 = vshrl.u32 %v626_v10, 5  ;;  %vm983_vm14 = vc.u32 %v4092_v31, %v4086_v24 }
 0x10f   : > { %v632_v51 = vshrl.u32 %v6025_v63, %v629_v38  ;;  %v635_v52 = vshrl.u32 %v6019_v2, %v629_v38  ;;  %v634_v53 = vshll.u32 %v6025_v63, %v628_v32  ;;  %v637_v58 = vshll.u32 %v6019_v2, %v628_v32 }
 0x110   : > { %v638_v61 = vshrl.u32 %v6017_v4, %v629_v38  ;;  %v573_v60 = vshll.u32 %v4099_v39, 30  ;;  %v631_v1 = vshll.u32 %v6027_v59, %v628_v32  ;;  %v640_v3 = vshll.u32 %v6017_v4, %v628_v32 }
 0x111   : > { %v641_v5 = vshrl.u32 %v6015_v6, %v629_v38  ;;  %v636_v7 = vor.u32 %v635_v52, %v634_v53  ;;  %v643_v10 = vshll.u32 %v6015_v6, %v628_v32  ;;  %v644_v11 = vshrl.u32 %v6012_v13, %v629_v38 }
 0x112   : > { %v639_v8 = vor.u32 %v638_v61, %v637_v58  ;;  %v985_v12 = vsel %vm983_vm14, %v984_v44, %v4087_v27  ;;  %v633_v62 = vor.u32 %v632_v51, %v631_v1  ;;  %v981_v48 = vmul.u32 %v4058_v9, %v965_v40 }
 0x113   : > { %v642_v14 = vor.u32 %v641_v5, %v640_v3  ;;  %v645_v56 = vor.u32 %v644_v11, %v643_v10  ;;  %vm649_vm15 = vcmp.lt.s32.totalorder %v627_v50, 4  ;;  %v622_v54 = vor.u32 8388608, %v621_v42 }
 0x114   : > { %vm646_vm0 = vcmp.lt.s32.totalorder %v627_v50, 1  ;;  %v3473_v55 = vadd.s32 4294967169, %v1034_v43  ;;  %v4121_v17 = vsub.s32 %v570_v16, %v573_v60  ;;  %v986_v18 = vadd.s32 %v985_v12, %v981_v48 }
 0x115   : > { %v655_v15 = vsel %vm649_vm15, %v642_v14, 920167782  ;;  %vm648_vm1 = vcmp.lt.s32.totalorder %v627_v50, 3  ;;  %v658_v19 = vsel %vm646_vm0, %v636_v7, %v639_v8  ;;  %v654_v20 = vsel %vm646_vm0, %v633_v62, %v636_v7 }
 0x116   : > { %v656_v22 = vsel %vm648_vm1, %v639_v8, %v655_v15  ;;  %v659_v23 = vsel %vm649_vm15, %v645_v56, 1326507024  ;;  %vm647_vm2 = vcmp.lt.s32.totalorder %v627_v50, 2  ;;  %v630_v27 = vshrl.u32 %v6027_v59, %v629_v38 }
 0x117   : > { %v660_v9 = vsel %vm648_vm1, %v642_v14, %v659_v23  ;;  %v651_v28 = vsel %vm649_vm15, %v639_v8, 2102212464  ;;  %v1040_v34 = vadd.s32 1, %v3473_v55  ;;  %v576_v16 = vsub.s32 0, %v4121_v17 }
 0x118   : > { %v661_v32 = vsel %vm647_vm2, %v658_v19, %v660_v9  ;;  %v987_v35 = vadd.s32 536870912, %v986_v18  ;;  %v657_v36 = vsel %vm647_vm2, %v654_v20, %v656_v22  ;;  %v662_v40 = vshll.u32 %v622_v54, 8 }
 0x119   : > { %v650_v42 = vsel %vm646_vm0, %v630_v27, %v633_v62  ;;  %vm1041_vm3 = vcmp.gt.s32.totalorder %v1040_v34, 0  ;;  %v652_v43 = vsel %vm648_vm1, %v636_v7, %v651_v28  ;;  %v3454_v58 = vmin.u32 %v576_v16, %v4121_v17 }
 0x11a   : > { %v4133_v44 = vmul.u32.u64.low %v662_v40, %v661_v32  ;;  %v4134_v51 = vmul.u32.u64.high %v662_v40, %v661_v32, %v4133_v44  ;;  %v1042_v52 = vsel %vm1041_vm3, %v1040_v34, 0  ;;  %v4141_v61 = vshrl.u32 %v987_v35, 30 }
 0x11b   : > { %v4136_v38 = vmul.u32.u64.low %v662_v40, %v657_v36  ;;  %v4137_v53 = vmul.u32.u64.high %v662_v40, %v657_v36, %v4136_v38  ;;  %v1044_v60 = vand.u32 31, %v1042_v52  ;;  %v653_v1 = vsel %vm647_vm2, %v650_v42, %v652_v43  ;;  %v4166_v42 = vpop.permute.xlu0 %388 }
 0x11c   : > { %v6007_v3 = vand.u32 2147483647, %v4014_v57  ;;  %v578_v8 = vclz %v3454_v58  ;;  %v989_v10 = vshll.u32 %v4141_v61, 30  ;;  %v669_v11 = vmul.u32 %v662_v40, %v653_v1 }
 0x11d   : > { %vm671_vm4 = vc.u32 %v4134_v51, %v4136_v38  ;;  %v1045_v5 = vsub.s32 32, %v1044_v60  ;;  %v672_v7 = vadd.s32 1, %v4137_v53  ;;  %v1047_v50 = vshll.u32 %v6027_v59, %v1044_v60 }
 0x11e   : > { %v1037_v62 = vand.u32 8388607, %v6007_v3  ;;  %v1050_v56 = vshll.u32 %v6025_v63, %v1044_v60  ;;  %v1053_v15 = vshll.u32 %v6019_v2, %v1044_v60  ;;  %v3455_v55 = vadd.s32 4294967294, %v578_v8 }
 0x11f   : > { %v673_v12 = vsel %vm671_vm4, %v672_v7, %v4137_v53  ;;  %v1048_v48 = vshrl.u32 %v6025_v63, %v1045_v5  ;;  %v1051_v54 = vshrl.u32 %v6019_v2, %v1045_v5  ;;  %v4157_v19 = vsub.s32 %v986_v18, %v989_v10 }
 0x120   : > { %v674_v14 = vadd.s32 %v673_v12, %v669_v11  ;;  %v1054_v22 = vshrl.u32 %v6017_v4, %v1045_v5  ;;  %v1038_v23 = vor.u32 8388608, %v1037_v62  ;;  %v1056_v9 = vshll.u32 %v6017_v4, %v1044_v60 }
 0x121   : > { %v1057_v27 = vshrl.u32 %v6015_v6, %v1045_v5  ;;  %v1059_v28 = vshll.u32 %v6015_v6, %v1044_v60  ;;  %v1043_v34 = vshrl.u32 %v1042_v52, 5  ;;  %v1049_v16 = vor.u32 %v1048_v48, %v1047_v50 }
 0x122   : > { %v675_v20 = vadd.s32 536870912, %v674_v14  ;;  %v1052_v35 = vor.u32 %v1051_v54, %v1050_v56  ;;  %v1055_v36 = vor.u32 %v1054_v22, %v1053_v15  ;;  %v1060_v18 = vshrl.u32 %v6012_v13, %v1045_v5 }
 0x123   : > { %v1058_v40 = vor.u32 %v1057_v27, %v1056_v9  ;;  %v992_v43 = vsub.s32 0, %v4157_v19  ;;  %vm3456_vm5 = vcmp.lt.s32.totalorder %v3455_v55, 0  ;;  %v1078_v58 = vshll.u32 %v1038_v23, 8 }
 0x124   : > { %v4163_v32 = vshrl.u32 %v675_v20, 30  ;;  %v1061_v53 = vor.u32 %v1060_v18, %v1059_v28  ;;  %v4172_v60 = vadd.f32 %v3993_v33, %v4166_v42  ;;  %v1046_v1 = vshrl.u32 %v6027_v59, %v1045_v5 }
 0x125   : > { %vm1062_vm6 = vcmp.lt.s32.totalorder %v1043_v34, 1  ;;  %vm1065_vm7 = vcmp.lt.s32.totalorder %v1043_v34, 4  ;;  %vm1064_vm8 = vcmp.lt.s32.totalorder %v1043_v34, 3  ;;  %v3470_v11 = vmin.u32 %v992_v43, %v4157_v19 }
 0x126   : > { %v677_v44 = vshll.u32 %v4163_v32, 30  ;;  %v1067_v7 = vsel %vm1065_vm7, %v1055_v36, 2102212464  ;;  %v1070_v8 = vsel %vm1062_vm6, %v1049_v16, %v1052_v35  ;;  %v1071_v10 = vsel %vm1065_vm7, %v1058_v40, 920167782 }
 0x127   : > { %vm1063_vm9 = vcmp.lt.s32.totalorder %v1043_v34, 2  ;;  %v1072_v62 = vsel %vm1064_vm8, %v1055_v36, %v1071_v10  ;;  %v1074_v48 = vsel %vm1062_vm6, %v1052_v35, %v1055_v36  ;;  %v1075_v33 = vsel %vm1065_vm7, %v1061_v53, 1326507024 }
 0x128   : > { %v4174_v52 = vsub.s32 %v674_v14, %v677_v44  ;;  %v1073_v50 = vsel %vm1063_vm9, %v1070_v8, %v1072_v62  ;;  %v721_v14 = vand.u32 2139095040, %v4172_v60  ;;  %v581_v56 = vsel %vm3456_vm5, 0, %v3455_v55 }
 0x129   : > { %v1066_v5 = vsel %vm1062_vm6, %v1046_v1, %v1049_v16  ;;  %v1068_v54 = vsel %vm1064_vm8, %v1052_v35, %v1067_v7  ;;  %v1076_v15 = vsel %vm1064_vm8, %v1058_v40, %v1075_v33  ;;  %v994_v27 = vclz %v3470_v11  ;;  %v4193_v11 = vpop.permute.xlu1 %398 }
 0x12a   : > { %v680_v12 = vsub.s32 0, %v4174_v52  ;;  %v1077_v22 = vsel %vm1063_vm9, %v1074_v48, %v1076_v15  ;;  %v4182_v23 = vmul.u32.u64.low %v1078_v58, %v1073_v50  ;;  %v4183_v9 = vmul.u32.u64.high %v1078_v58, %v1073_v50, %v4182_v23 }
 0x12b   : > { %v4186_v28 = vmul.u32.u64.low %v1078_v58, %v1077_v22  ;;  %v4187_v34 = vmul.u32.u64.high %v1078_v58, %v1077_v22, %v4186_v28  ;;  %v1069_v36 = vsel %vm1063_vm9, %v1066_v5, %v1068_v54  ;;  %v722_v18 = vshrl.u32 %v721_v14, 23 }
 0x12c   : > { %v3458_v20 = vmin.u32 %v680_v12, %v4174_v52  ;;  %v586_v43 = vsub.s32 4294967266, %v581_v56  ;;  %v1088_v55 = vadd.s32 1, %v4183_v9  ;;  %v3471_v35 = vadd.s32 4294967294, %v994_v27 }
 0x12d   : > { %v3461_v16 = vadd.s32 4294967169, %v722_v18  ;;  %v1085_v40 = vmul.u32 %v1078_v58, %v1069_v36  ;;  %vm1087_vm10 = vc.u32 %v4187_v34, %v4182_v23  ;;  %v582_v7 = vsub.s32 32, %v581_v56 }
 0x12e   : > { %v682_v44 = vclz %v3458_v20  ;;  %v1089_v53 = vsel %vm1087_vm10, %v1088_v55, %v4183_v9  ;;  %v587_v8 = vadd.s32 127, %v586_v43  ;;  %v566_v12 = vadd.s32 %v4045_v49, %v4042_v47 }
 0x12f   : > { %v728_v1 = vadd.s32 1, %v3461_v16  ;;  %v1090_v10 = vadd.s32 %v1089_v53, %v1085_v40  ;;  %v6008_v50 = vand.u32 2147483647, %v4172_v60  ;;  %vm3472_vm12 = vcmp.lt.s32.totalorder %v3471_v35, 0 }
 0x130   : > { %v3459_v62 = vadd.s32 4294967294, %v682_v44  ;;  %v4200_v33 = vadd.f32 %v3999_v41, %v4193_v11  ;;  %v583_v5 = vshll.u32 %v4121_v17, %v581_v56  ;;  %v584_v54 = vshrl.u32 %v566_v12, %v582_v7 }
 0x131   : > { %vm729_vm11 = vcmp.gt.s32.totalorder %v728_v1, 0  ;;  %v1091_v58 = vadd.s32 536870912, %v1090_v10  ;;  %v588_v15 = vshll.u32 %v587_v8, 23  ;;  %v4205_v22 = vsel %vm3472_vm12, 0, %v3471_v35 }
 0x132   : > { %v730_v48 = vsel %vm729_vm11, %v728_v1, 0  ;;  %vm3460_vm13 = vcmp.lt.s32.totalorder %v3459_v62, 0  ;;  %v725_v47 = vand.u32 8388607, %v6008_v50  ;;  %v1137_v28 = vand.u32 2139095040, %v4200_v33 }
 0x133   : > { %v732_v14 = vand.u32 31, %v730_v48  ;;  %v4203_v20 = vshrl.u32 %v1091_v58, 30  ;;  %v731_v43 = vshrl.u32 %v730_v48, 5  ;;  %v585_v7 = vor.u32 %v584_v54, %v583_v5 }
 0x134   : > { %v589_v8 = vor.u32 4788187, %v588_v15  ;;  %v596_v12 = vsub.s32 4, %v4099_v39  ;;  %vm512_vm14 = vcmp.lt.s32.totalorder %v3984_v25, 0  ;;  %v1002_v48 = vsub.s32 4294967266, %v4205_v22 }
 0x135   : > { %v733_v49 = vsub.s32 32, %v732_v14  ;;  %v735_v9 = vshll.u32 %v6027_v59, %v732_v14  ;;  %v738_v27 = vshll.u32 %v6025_v63, %v732_v14  ;;  %v741_v41 = vshll.u32 %v6019_v2, %v732_v14 }
 0x136   : > { %v1093_v17 = vshll.u32 %v4203_v20, 30  ;;  %v744_v44 = vshll.u32 %v6017_v4, %v732_v14  ;;  %v747_v16 = vshll.u32 %v6015_v6, %v732_v14  ;;  %v726_v3 = vor.u32 8388608, %v725_v47 }
 0x137   : > { %v736_v56 = vshrl.u32 %v6025_v63, %v733_v49  ;;  %v739_v36 = vshrl.u32 %v6019_v2, %v733_v49  ;;  %v742_v18 = vshrl.u32 %v6017_v4, %v733_v49  ;;  %v745_v55 = vshrl.u32 %v6015_v6, %v733_v49 }
 0x138   : > { %v748_v1 = vshrl.u32 %v6012_v13, %v733_v49  ;;  %v4224_v0 = vsub.s32 %v1090_v10, %v1093_v17  ;;  %v4227_v14 = vsel %vm3460_vm13, 0, %v3459_v62  ;;  %vm750_vm15 = vcmp.lt.s32.totalorder %v731_v43, 1 }
 0x139   : > { %v737_v35 = vor.u32 %v736_v56, %v735_v9  ;;  %v740_v40 = vor.u32 %v739_v36, %v738_v27  ;;  %v743_v53 = vor.u32 %v742_v18, %v741_v41  ;;  %v746_v58 = vor.u32 %v745_v55, %v744_v44 }
 0x13a   : > { %v749_v50 = vor.u32 %v748_v1, %v747_v16  ;;  %vm753_vm0 = vcmp.lt.s32.totalorder %v731_v43, 4  ;;  %v1138_v9 = vshrl.u32 %v1137_v28, 23  ;;  %vm752_vm1 = vcmp.lt.s32.totalorder %v731_v43, 3 }
 0x13b   : > { %v755_v5 = vsel %vm753_vm0, %v743_v53, 2102212464  ;;  %v758_v54 = vsel %vm750_vm15, %v737_v35, %v740_v40  ;;  %v759_v15 = vsel %vm753_vm0, %v746_v58, 920167782  ;;  %v734_v27 = vshrl.u32 %v6027_v59, %v733_v49 }
 0x13c   : > { %vm751_vm2 = vcmp.lt.s32.totalorder %v731_v43, 2  ;;  %v760_v41 = vsel %vm752_vm1, %v743_v53, %v759_v15  ;;  %v762_v56 = vsel %vm750_vm15, %v740_v40, %v743_v53  ;;  %v1096_v10 = vsub.s32 0, %v4224_v0 }
 0x13d   : > { %v761_v47 = vsel %vm751_vm2, %v758_v54, %v760_v41  ;;  %v763_v17 = vsel %vm753_vm0, %v749_v50, 1326507024  ;;  %v766_v36 = vshll.u32 %v726_v3, 8  ;;  %v754_v62 = vsel %vm750_vm15, %v734_v27, %v737_v35 }
 0x13e   : > { %v756_v18 = vsel %vm752_vm1, %v740_v40, %v755_v5  ;;  %v764_v44 = vsel %vm752_vm1, %v746_v58, %v763_v17  ;;  %v3477_v55 = vadd.s32 4294967169, %v1138_v9  ;;  %v998_v28 = vsub.s32 32, %v4205_v22 }
 0x13f   : > { %v765_v16 = vsel %vm751_vm2, %v762_v56, %v764_v44  ;;  %v4234_v1 = vmul.u32.u64.low %v766_v36, %v761_v47  ;;  %v4235_v37 = vmul.u32.u64.high %v766_v36, %v761_v47, %v4234_v1  ;;  %v982_v49 = vadd.s32 %v4086_v24, %v4092_v31 }
 0x140   : > { %v1003_v53 = vadd.s32 127, %v1002_v48  ;;  %v4240_v15 = vmul.u32.u64.low %v766_v36, %v765_v16  ;;  %v4241_v54 = vmul.u32.u64.high %v766_v36, %v765_v16, %v4240_v15  ;;  %v690_v3 = vsub.s32 4294967266, %v4227_v14 }
 0x141   : > { %v3474_v50 = vmin.u32 %v1096_v10, %v4224_v0  ;;  %v757_v35 = vsel %vm751_vm2, %v754_v62, %v756_v18  ;;  %v1144_v40 = vadd.s32 1, %v3477_v55  ;;  %v592_v58 = vcvt.s32.f32 %v585_v7 }
 0x142   : > { %v4249_v9 = vsel %vm512_vm14, %v596_v12, %v4099_v39  ;;  %v4253_v24 = vadd.f32 %v4001_v45, %v4166_v42  ;;  %v590_v31 = vand.u32 2147483647, %v589_v8  ;;  %v1000_v48 = vshrl.u32 %v982_v49, %v998_v28 }
 0x143   : > { %v776_v5 = vadd.s32 1, %v4235_v37  ;;  %vm1145_vm3 = vcmp.gt.s32.totalorder %v1144_v40, 0  ;;  %v1004_v27 = vshll.u32 %v1003_v53, 23  ;;  %v773_v41 = vmul.u32 %v766_v36, %v757_v35 }
 0x144   : > { %vm775_vm4 = vc.u32 %v4241_v54, %v4234_v1  ;;  %v6010_v43 = vand.u32 2147483647, %v4200_v33  ;;  %v691_v7 = vadd.s32 127, %v690_v3  ;;  %v1098_v56 = vclz %v3474_v50 }
 0x145   : > { %v777_v39 = vsel %vm775_vm4, %v776_v5, %v4235_v37  ;;  %v1146_v12 = vsel %vm1145_vm3, %v1144_v40, 0  ;;  %vm4262_vm5 = vcmp.le.f32.partialorder %v510_v30, 0.7853982  ;;  %v999_v42 = vshll.u32 %v4157_v19, %v4205_v22 }
 0x146   : > { %v778_v8 = vadd.s32 %v777_v39, %v773_v41  ;;  %v825_v10 = vand.u32 2139095040, %v4253_v24  ;;  %v4269_v47 = vmul.f32 %v592_v58, %v590_v31  ;;  %v670_v37 = vadd.s32 %v4136_v38, %v4134_v51 }
 0x147   : > { %v1148_v36 = vand.u32 31, %v1146_v12  ;;  %v4276_v30 = vor.u32 %v1000_v48, %v999_v42  ;;  %v4278_v62 = vor.u32 4788187, %v1004_v27  ;;  %v686_v18 = vsub.s32 32, %v4227_v14 }
 0x148   : > { %v779_v19 = vadd.s32 536870912, %v778_v8  ;;  %v692_v22 = vshll.u32 %v691_v7, 23  ;;  %v3475_v44 = vadd.s32 4294967294, %v1098_v56  ;;  %v1141_v55 = vand.u32 8388607, %v6010_v43 }
 0x149   : > { %v1149_v28 = vsub.s32 32, %v1148_v36  ;;  %v1151_v49 = vshll.u32 %v6027_v59, %v1148_v36  ;;  %v1154_v51 = vshll.u32 %v6025_v63, %v1148_v36  ;;  %v826_v38 = vshrl.u32 %v825_v10, 23 }
 0x14a   : > { %v4283_v16 = vshrl.u32 %v779_v19, 30  ;;  %v1157_v3 = vshll.u32 %v6019_v2, %v1148_v36  ;;  %v1147_v40 = vshrl.u32 %v1146_v12, 5  ;;  %v1160_v58 = vshll.u32 %v6017_v4, %v1148_v36 }
 0x14b   : > { %v1152_v53 = vshrl.u32 %v6025_v63, %v1149_v28  ;;  %v1155_v15 = vshrl.u32 %v6019_v2, %v1149_v28  ;;  %v1158_v50 = vshrl.u32 %v6017_v4, %v1149_v28  ;;  %v1161_v31 = vshrl.u32 %v6015_v6, %v1149_v28 }
 0x14c   : > { %v781_v35 = vshll.u32 %v4283_v16, 30  ;;  %v1164_v41 = vshrl.u32 %v6012_v13, %v1149_v28  ;;  %v1142_v56 = vor.u32 8388608, %v1141_v55  ;;  %v1163_v42 = vshll.u32 %v6015_v6, %v1148_v36 }
 0x14d   : > { %v1153_v48 = vor.u32 %v1152_v53, %v1151_v49  ;;  %v1156_v5 = vor.u32 %v1155_v15, %v1154_v51  ;;  %v1159_v27 = vor.u32 %v1158_v50, %v1157_v3  ;;  %v1162_v39 = vor.u32 %v1161_v31, %v1160_v58 }
 0x14e   : > { %v4295_v7 = vsub.s32 %v778_v8, %v781_v35  ;;  %v687_v10 = vshll.u32 %v4174_v52, %v4227_v14  ;;  %v688_v19 = vshrl.u32 %v670_v37, %v686_v18  ;;  %v693_v12 = vor.u32 4788187, %v692_v22 }
 0x14f   : > { %vm3476_vm6 = vcmp.lt.s32.totalorder %v3475_v44, 0  ;;  %v1165_v17 = vor.u32 %v1164_v41, %v1163_v42  ;;  %vm1166_vm7 = vcmp.lt.s32.totalorder %v1147_v40, 1  ;;  %vm1169_vm8 = vcmp.lt.s32.totalorder %v1147_v40, 4 }
 0x150   : > { %v784_v43 = vsub.s32 0, %v4295_v7  ;;  %v1150_v49 = vshrl.u32 %v6027_v59, %v1149_v28  ;;  %v1171_v8 = vsel %vm1169_vm8, %v1159_v27, 2102212464  ;;  %v1174_v51 = vsel %vm1166_vm7, %v1153_v48, %v1156_v5 }
 0x151   : > { %v3465_v55 = vadd.s32 4294967169, %v826_v38  ;;  %vm1168_vm9 = vcmp.lt.s32.totalorder %v1147_v40, 3  ;;  %v1175_v36 = vsel %vm1169_vm8, %v1162_v39, 920167782  ;;  %v1182_v52 = vshll.u32 %v1142_v56, 8 }
 0x152   : > { %v3462_v53 = vmin.u32 %v784_v43, %v4295_v7  ;;  %vm1167_vm10 = vcmp.lt.s32.totalorder %v1147_v40, 2  ;;  %v1170_v14 = vsel %vm1166_vm7, %v1150_v49, %v1153_v48  ;;  %v1176_v37 = vsel %vm1168_vm9, %v1159_v27, %v1175_v36 }
 0x153   : > { %v1178_v18 = vsel %vm1166_vm7, %v1156_v5, %v1159_v27  ;;  %v1172_v15 = vsel %vm1168_vm9, %v1156_v5, %v1171_v8  ;;  %v1177_v3 = vsel %vm1167_vm10, %v1174_v51, %v1176_v37  ;;  %v1179_v28 = vsel %vm1169_vm8, %v1165_v17, 1326507024 }
 0x154   : > { %v786_v22 = vclz %v3462_v53  ;;  %v1180_v50 = vsel %vm1168_vm9, %v1162_v39, %v1179_v28  ;;  %v4307_v35 = vmul.u32.u64.low %v1182_v52, %v1177_v3  ;;  %v4308_v58 = vmul.u32.u64.high %v1182_v52, %v1177_v3, %v4307_v35 }
 0x155   : > { %v832_v43 = vadd.s32 1, %v3465_v55  ;;  %v689_v38 = vor.u32 %v688_v19, %v687_v10  ;;  %v4312_v31 = vsel %vm3476_vm6, 0, %v3475_v44  ;;  %v1181_v48 = vsel %vm1167_vm10, %v1178_v18, %v1180_v50 }
 0x156   : > { %v6011_v27 = vand.u32 2147483647, %v4253_v24  ;;  %v4317_v41 = vmul.u32.u64.low %v1182_v52, %v1181_v48  ;;  %v4318_v56 = vmul.u32.u64.high %v1182_v52, %v1181_v48, %v4317_v41  ;;  %v694_v17 = vand.u32 2147483647, %v693_v12 }
 0x157   : > { %vm833_vm11 = vcmp.gt.s32.totalorder %v832_v43, 0  ;;  %v3463_v39 = vadd.s32 4294967294, %v786_v22  ;;  %v1173_v42 = vsel %vm1167_vm10, %v1170_v14, %v1172_v15  ;;  %v1008_v10 = vcvt.s32.f32 %v4276_v30 }
 0x158   : > { %v834_v49 = vsel %vm833_vm11, %v832_v43, 0  ;;  %v1106_v44 = vsub.s32 4294967266, %v4312_v31  ;;  %v1192_v19 = vadd.s32 1, %v4308_v58  ;;  %v1006_v51 = vand.u32 2147483647, %v4278_v62 }
 0x159   : > { %v836_v8 = vand.u32 31, %v834_v49  ;;  %v696_v55 = vcvt.s32.f32 %v689_v38  ;;  %v829_v53 = vand.u32 8388607, %v6011_v27  ;;  %v4329_v12 = vadd.f32 %v4003_v46, %v4193_v11 }
 0x15a   : > { %v4333_v40 = vadd.s32 %v4182_v23, %v4187_v34  ;;  %v1189_v36 = vmul.u32 %v1182_v52, %v1173_v42  ;;  %vm1191_vm12 = vc.u32 %v4318_v56, %v4307_v35  ;;  %v1102_v18 = vsub.s32 32, %v4312_v31 }
 0x15b   : > { %v837_v14 = vsub.s32 32, %v836_v8  ;;  %v4337_v37 = vmul.f32 %v696_v55, %v694_v17  ;;  %vm3464_vm13 = vcmp.lt.s32.totalorder %v3463_v39, 0  ;;  %v1193_v22 = vsel %vm1191_vm12, %v1192_v19, %v4308_v58 }
 0x15c   : > { %v4341_v15 = vadd.s32 127, %v1106_v44  ;;  %v1194_v46 = vadd.s32 %v1193_v22, %v1189_v36  ;;  %v830_v34 = vor.u32 8388608, %v829_v53  ;;  %v839_v52 = vshll.u32 %v6027_v59, %v836_v8 }
 0x15d   : > { %v840_v11 = vshrl.u32 %v6025_v63, %v837_v14  ;;  %v843_v23 = vshrl.u32 %v6019_v2, %v837_v14  ;;  %v842_v3 = vshll.u32 %v6025_v63, %v836_v8  ;;  %v846_v28 = vshrl.u32 %v6017_v4, %v837_v14 }
 0x15e   : > { %v789_v50 = vsel %vm3464_vm13, 0, %v3463_v39  ;;  %v1195_v43 = vadd.s32 536870912, %v1194_v46  ;;  %v835_v38 = vshrl.u32 %v834_v49, 5  ;;  %v845_v48 = vshll.u32 %v6019_v2, %v836_v8 }
 0x15f   : > { %v841_v58 = vor.u32 %v840_v11, %v839_v52  ;;  %v844_v41 = vor.u32 %v843_v23, %v842_v3  ;;  %v848_v17 = vshll.u32 %v6017_v4, %v836_v8  ;;  %v849_v42 = vshrl.u32 %v6015_v6, %v837_v14 }
 0x160   : > { %v774_v44 = vadd.s32 %v4234_v1, %v4241_v54  ;;  %v4353_v19 = vshrl.u32 %v1195_v43, 30  ;;  %v852_v55 = vshrl.u32 %v6012_v13, %v837_v14  ;;  %v1241_v53 = vand.u32 2139095040, %v4329_v12 }
 0x161   : > { %v794_v39 = vsub.s32 4294967266, %v789_v50  ;;  %v847_v36 = vor.u32 %v846_v28, %v845_v48  ;;  %v850_v49 = vor.u32 %v849_v42, %v848_v17  ;;  %v851_v22 = vshll.u32 %v6015_v6, %v836_v8 }
 0x162   : > { %v1108_v11 = vshll.u32 %v4341_v15, 23  ;;  %v1197_v23 = vshll.u32 %v4353_v19, 30  ;;  %vm854_vm15 = vcmp.lt.s32.totalorder %v835_v38, 1  ;;  %v870_v52 = vshll.u32 %v830_v34, 8 }
 0x163   : > { %v790_v3 = vsub.s32 32, %v789_v50  ;;  %v853_v27 = vor.u32 %v852_v55, %v851_v22  ;;  %vm857_vm0 = vcmp.lt.s32.totalorder %v835_v38, 4  ;;  %v862_v1 = vsel %vm854_vm15, %v841_v58, %v844_v41 }
 0x164   : > { %v4361_v54 = vsub.s32 %v1194_v46, %v1197_v23  ;;  %vm856_vm1 = vcmp.lt.s32.totalorder %v835_v38, 3  ;;  %v863_v43 = vsel %vm857_vm0, %v850_v49, 920167782  ;;  %v1242_v5 = vshrl.u32 %v1241_v53, 23 }
 0x165   : > { %v795_v28 = vadd.s32 127, %v794_v39  ;;  %vm855_vm2 = vcmp.lt.s32.totalorder %v835_v38, 2  ;;  %v859_v48 = vsel %vm857_vm0, %v847_v36, 2102212464  ;;  %v864_v8 = vsel %vm856_vm1, %v847_v36, %v863_v43 }
 0x166   : > { %v1200_v15 = vsub.s32 0, %v4361_v54  ;;  %v838_v17 = vshrl.u32 %v6027_v59, %v837_v14  ;;  %v865_v34 = vsel %vm855_vm2, %v862_v1, %v864_v8  ;;  %v866_v42 = vsel %vm854_vm15, %v844_v41, %v847_v36 }
 0x167   : > { %vm616_vm3 = vcmp.lt.s32.totalorder %v3988_v29, 0  ;;  %v867_v46 = vsel %vm857_vm0, %v853_v27, 1326507024  ;;  %v4369_v55 = vmul.u32.u64.low %v870_v52, %v865_v34  ;;  %v4370_v22 = vmul.u32.u64.high %v870_v52, %v865_v34, %v4369_v55 }
 0x168   : > { %v1238_v53 = vand.u32 2147483647, %v4329_v12  ;;  %v3478_v39 = vmin.u32 %v1200_v15, %v4361_v54  ;;  %v858_v23 = vsel %vm854_vm15, %v838_v17, %v841_v58  ;;  %v860_v43 = vsel %vm856_vm1, %v844_v41, %v859_v48 }
 0x169   : > { %v868_v14 = vsel %vm856_vm1, %v850_v49, %v867_v46  ;;  %v792_v1 = vshrl.u32 %v774_v44, %v790_v3  ;;  %v796_v8 = vshll.u32 %v795_v28, 23  ;;  %v3481_v13 = vadd.s32 4294967169, %v1242_v5 }
 0x16a   : > { %v869_v36 = vsel %vm855_vm2, %v866_v42, %v868_v14  ;;  %v698_v27 = vxor.u32 2147483648, %v4337_v37  ;;  %v1202_v34 = vclz %v3478_v39  ;;  %v791_v4 = vshll.u32 %v4295_v7, %v789_v50 }
 0x16b   : > { %v4380_v21 = vmul.u32.u64.low %v870_v52, %v869_v36  ;;  %v4381_v6 = vmul.u32.u64.high %v870_v52, %v869_v36, %v4380_v21  ;;  %v861_v15 = vsel %vm855_vm2, %v858_v23, %v860_v43  ;;  %v880_v58 = vadd.s32 1, %v4370_v22 }
 0x16c   : > { %v1248_v41 = vadd.s32 1, %v3481_v13  ;;  %v1103_v44 = vshll.u32 %v4224_v0, %v4312_v31  ;;  %v1104_v5 = vshrl.u32 %v4333_v40, %v1102_v18  ;;  %v4391_v49 = vor.u32 4788187, %v1108_v11 }
 0x16d   : > { %v3479_v3 = vadd.s32 4294967294, %v1202_v34  ;;  %v793_v28 = vor.u32 %v792_v1, %v791_v4  ;;  %v797_v48 = vor.u32 4788187, %v796_v8  ;;  %v1245_v21 = vand.u32 8388607, %v1238_v53 }
 0x16e   : > { %vm1249_vm4 = vcmp.gt.s32.totalorder %v1248_v41, 0  ;;  %v877_v7 = vmul.u32 %v870_v52, %v861_v15  ;;  %vm879_vm7 = vc.u32 %v4381_v6, %v4369_v55  ;;  %v4401_v0 = vmul.f32 %v1008_v10, %v1006_v51 }
 0x16f   : > { %vm3480_vm6 = vcmp.lt.s32.totalorder %v3479_v3, 0  ;;  %v1250_v13 = vsel %vm1249_vm4, %v1248_v41, 0  ;;  %v881_v4 = vsel %vm879_vm7, %v880_v58, %v4370_v22  ;;  %v699_v18 = vsel %vm616_vm3, %v698_v27, %v4337_v37 }
 0x170   : > { %v4403_v31 = vsel %vm3480_vm6, 0, %v3479_v3  ;;  %v1252_v40 = vand.u32 31, %v1250_v13  ;;  %v4409_v50 = vor.u32 %v1104_v5, %v1103_v44  ;;  %v1110_v38 = vand.u32 2147483647, %v4391_v49 }
 0x171   : > { %v882_v11 = vadd.s32 %v881_v4, %v877_v7  ;;  %v798_v52 = vand.u32 2147483647, %v797_v48  ;;  %v800_v62 = vcvt.s32.f32 %v793_v28  ;;  %v1246_v17 = vor.u32 8388608, %v1245_v21 }
 0x172   : > { %v1253_v30 = vsub.s32 32, %v1252_v40  ;;  %v1210_v10 = vsub.s32 4294967266, %v4403_v31  ;;  %v1255_v42 = vshll.u32 %v6027_v59, %v1252_v40  ;;  %v1258_v46 = vshll.u32 %v6025_v63, %v1252_v40 }
 0x173   : > { %v883_v51 = vadd.s32 536870912, %v882_v11  ;;  %v1261_v39 = vshll.u32 %v6019_v2, %v1252_v40  ;;  %v6037_v23 = vmov 2102212464   ;;  %v1251_v1 = vshrl.u32 %v1250_v13, 5 }
 0x174   : > { %v1256_v22 = vshrl.u32 %v6025_v63, %v1253_v30  ;;  %v1259_v37 = vshrl.u32 %v6019_v2, %v1253_v30  ;;  %v1262_v43 = vshrl.u32 %v6037_v23, %v1253_v30  ;;  %v1264_v8 = vshll.u32 %v6037_v23, %v1252_v40 }
 0x175   : > { %v4419_v14 = vshrl.u32 %v883_v51, 30  ;;  %v6038_v36 = vmov 920167782   ;;  %v6039_v34 = vand.u32 2147483647, %v3988_v29  ;;  %v1190_v58 = vadd.s32 %v4307_v35, %v4318_v56 }
 0x176   : > { %v1265_v27 = vshrl.u32 %v6038_v36, %v1253_v30  ;;  %v1257_v41 = vor.u32 %v1256_v22, %v1255_v42  ;;  %v1260_v44 = vor.u32 %v1259_v37, %v1258_v46  ;;  %v1263_v5 = vor.u32 %v1262_v43, %v1261_v39 }
 0x177   : > { %vm4425_vm8 = vcmp.le.f32.partialorder %v6039_v34, 0.7853982  ;;  %v801_v3 = vmul.f32 %v800_v62, %v798_v52  ;;  %v885_v28 = vshll.u32 %v4419_v14, 30  ;;  %v1286_v21 = vshll.u32 %v1246_v17, 8 }
 0x178   : > { %v1266_v48 = vor.u32 %v1265_v27, %v1264_v8  ;;  %v1206_v7 = vsub.s32 32, %v4403_v31  ;;  %v1211_v13 = vadd.s32 127, %v1210_v10  ;;  %v1267_v4 = vshll.u32 %v6038_v36, %v1252_v40 }
 0x179   : > { %v6042_v51 = vmov 1326507024   ;;  %v4435_v2 = vsub.s32 %v882_v11, %v885_v28  ;;  %vm1270_vm9 = vcmp.lt.s32.totalorder %v1251_v1, 1  ;;  %vm1272_vm10 = vcmp.lt.s32.totalorder %v1251_v1, 3 }
 0x17a   : > { %v1268_v34 = vshrl.u32 %v6042_v51, %v1253_v30  ;;  %vm1273_vm11 = vcmp.lt.s32.totalorder %v1251_v1, 4  ;;  %v1278_v52 = vsel %vm1270_vm9, %v1257_v41, %v1260_v44  ;;  %vm720_vm12 = vcmp.lt.s32.totalorder %v4172_v60, 0 }
 0x17b   : > { %v1275_v56 = vsel %vm1273_vm11, %v1263_v5, 2102212464  ;;  %v1279_v62 = vsel %vm1273_vm11, %v1266_v48, 920167782  ;;  %v888_v17 = vsub.s32 0, %v4435_v2  ;;  %v1254_v10 = vshrl.u32 %v6027_v59, %v1253_v30 }
 0x17c   : > { %v1269_v35 = vor.u32 %v1268_v34, %v1267_v4  ;;  %vm1271_vm13 = vcmp.lt.s32.totalorder %v1251_v1, 2  ;;  %v1280_v40 = vsel %vm1272_vm10, %v1263_v5, %v1279_v62  ;;  %v1212_v42 = vshll.u32 %v1211_v13, 23 }
 0x17d   : > { %v1281_v11 = vsel %vm1271_vm13, %v1278_v52, %v1280_v40  ;;  %v1282_v46 = vsel %vm1270_vm9, %v1260_v44, %v1263_v5  ;;  %v3466_v37 = vmin.u32 %v888_v17, %v4435_v2  ;;  %v1274_v39 = vsel %vm1270_vm9, %v1254_v10, %v1257_v41 }
 0x17e   : > { %v1283_v22 = vsel %vm1273_vm11, %v1269_v35, 1326507024  ;;  %v1276_v43 = vsel %vm1272_vm10, %v1260_v44, %v1275_v56  ;;  %v1208_v27 = vshrl.u32 %v1190_v58, %v1206_v7  ;;  %vm928_vm15 = vcmp.lt.s32.totalorder %v3986_v26, 0 }
 0x17f   : > { %v1284_v8 = vsel %vm1272_vm10, %v1266_v48, %v1283_v22  ;;  %v4449_v28 = vmul.u32.u64.low %v1286_v21, %v1281_v11  ;;  %v4450_v4 = vmul.u32.u64.high %v1286_v21, %v1281_v11, %v4449_v28  ;;  %v702_v5 = vsel %vm4425_vm8, %v3988_v29, %v699_v18 }
 0x180   : > { %v1285_v30 = vsel %vm1271_vm13, %v1282_v46, %v1284_v8  ;;  %v890_v13 = vclz %v3466_v37  ;;  %v1112_v44 = vcvt.s32.f32 %v4409_v50  ;;  %v802_v48 = vxor.u32 2147483648, %v801_v3 }
 0x181   : > { %v4457_v34 = vmul.u32.u64.low %v1286_v21, %v1285_v30  ;;  %v4458_v41 = vmul.u32.u64.high %v1286_v21, %v1285_v30, %v4457_v34  ;;  %v1207_v58 = vshll.u32 %v4361_v54, %v4403_v31  ;;  %v1277_v7 = vsel %vm1271_vm13, %v1274_v39, %v1276_v43 }
 0x182   : > { %v6043_v35 = vxor.u32 2147483648, %v4269_v47  ;;  %v1010_v18 = vxor.u32 2147483648, %v4401_v0  ;;  %v1213_v52 = vor.u32 4788187, %v1212_v42  ;;  %v3467_v62 = vadd.s32 4294967294, %v890_v13 }
 0x183   : > { %3719 = vcosq.f32 %v702_v5  ;;  %v1113_v50 = vmul.f32 %v1112_v44, %v1110_v38  ;;  %v1209_v17 = vor.u32 %v1208_v27, %v1207_v58  ;;  %v1296_v10 = vadd.s32 1, %v4450_v4 }
 0x184   : > { %v595_v56 = vsel %vm512_vm14, %v6043_v35, %v4269_v47  ;;  %v6044_v54 = vand.u32 2147483647, %v3986_v26  ;;  %vm1032_vm1 = vcmp.lt.s32.totalorder %v4014_v57, 0  ;;  %vm3468_vm14 = vcmp.lt.s32.totalorder %v3467_v62, 0 }
 0x185   : > { %v1293_v47 = vmul.u32 %v1286_v21, %v1277_v7  ;;  %vm1295_vm2 = vc.u32 %v4458_v41, %v4449_v28  ;;  %v700_v1 = vsub.s32 4, %v4163_v32  ;;  %v803_v49 = vsel %vm720_vm12, %v802_v48, %v801_v3 }
 0x186   : > { %vm4475_vm0 = vcmp.le.f32.partialorder %v6044_v54, 0.7853982  ;;  %v878_v38 = vadd.s32 %v4369_v55, %v4381_v6  ;;  %v893_v40 = vsel %vm3468_vm14, 0, %v3467_v62  ;;  %v1297_v42 = vsel %vm1295_vm2, %v1296_v10, %v4450_v4 }
 0x187   : > { %v1214_v11 = vand.u32 2147483647, %v1213_v52  ;;  %v894_v46 = vsub.s32 32, %v893_v40  ;;  %v898_v22 = vsub.s32 4294967266, %v893_v40  ;;  %v1298_v37 = vadd.s32 %v1297_v42, %v1293_v47 }
 0x188   : > { %v598_v21 = vsel %vm4262_vm5, %v3984_v25, %v595_v56  ;;  %3721 = vsinq.f32 %v702_v5  ;;  %v6047_v39 = vand.u32 2147483647, %v4172_v60  ;;  %v1216_v3 = vcvt.s32.f32 %v1209_v17 }
 0x189   : > { %v895_v6 = vshll.u32 %v4435_v2, %v893_v40  ;;  %v896_v55 = vshrl.u32 %v878_v38, %v894_v46  ;;  %v899_v8 = vadd.s32 127, %v898_v22  ;;  %v1299_v27 = vadd.s32 536870912, %v1298_v37 }
 0x18a   : > { %vm4493_vm4 = vcmp.le.f32.partialorder %v6047_v39, 0.7853982  ;;  %v1011_v30 = vsel %vm928_vm15, %v1010_v18, %v4401_v0  ;;  %v1114_v4 = vxor.u32 2147483648, %v1113_v50  ;;  %v701_v13 = vsel %vm616_vm3, %v700_v1, %v4163_v32 }
 0x18b   : > { %v806_v5 = vsel %vm4493_vm4, %v4172_v60, %v803_v49  ;;  %v1217_v34 = vmul.f32 %v1216_v3, %v1214_v11  ;;  %v897_v44 = vor.u32 %v896_v55, %v895_v6  ;;  %v900_v48 = vshll.u32 %v899_v8, 23 }
 0x18c   : > { %v4507_v2 = vshrl.u32 %v1299_v27, 30  ;;  %3723 = vsinq.f32 %v598_v21  ;;  %v6050_v58 = vsel %vm4262_vm5, 0, %v4249_v9  ;;  %v6051_v7 = vand.u32 2147483647, %v4014_v57 }
 0x18d   : > { %v4513_v0 = vadd.s32 3, %v6050_v58  ;;  %v804_v32 = vsub.s32 4, %v4283_v16  ;;  %3725 = vcosq.f32 %v806_v5  ;;  %v901_v56 = vor.u32 4788187, %v900_v48  ;;  %v3720_v45 = vpop.eup %3719 }
 0x18e   : > { %vm4517_vm6 = vcmp.le.f32.partialorder %v6051_v7, 0.7853982  ;;  %v1301_v18 = vshll.u32 %v4507_v2, 30  ;;  %v703_v52 = vsel %vm4425_vm8, 0, %v701_v13  ;;  %v1012_v9 = vsub.s32 4, %v4141_v61 }
 0x18f   : > { %v1014_v62 = vsel %vm4475_vm0, %v3986_v26, %v1011_v30  ;;  %v1115_v17 = vsel %vm1032_vm1, %v1114_v4, %v1113_v50  ;;  %3727 = vsinq.f32 %v806_v5  ;;  %v1218_v10 = vxor.u32 2147483648, %v1217_v34 }
 0x190   : > { %v902_v54 = vand.u32 2147483647, %v901_v56  ;;  %v904_v47 = vcvt.s32.f32 %v897_v44  ;;  %v4531_v1 = vsub.s32 %v1298_v37, %v1301_v18  ;;  %3729 = vcosq.f32 %v598_v21 }
 0x191   : > { %v805_v15 = vsel %vm720_vm12, %v804_v32, %v4283_v16  ;;  %v707_v49 = vadd.s32 3, %v703_v52  ;;  %v908_v38 = vsub.s32 4, %v4419_v14  ;;  %3731 = vcosq.f32 %v1014_v62 }
 0x192   : > { %v1118_v40 = vsel %vm4517_vm6, %v4014_v57, %v1115_v17  ;;  %v905_v50 = vmul.f32 %v904_v47, %v902_v54  ;;  %v1304_v42 = vsub.s32 0, %v4531_v1  ;;  %v3722_v11 = vpop.eup %3721  ;;  %3733 = vsinq.f32 %v1014_v62 }
 0x193   : > { %v6054_v46 = vand.u32 2147483647, %v4200_v33  ;;  %vm1136_vm3 = vcmp.lt.s32.totalorder %v4200_v33, 0  ;;  %vm824_vm7 = vcmp.lt.s32.totalorder %v4253_v24, 0  ;;  %v807_v16 = vsel %vm4493_vm4, 0, %v805_v15 }
 0x194   : > { %v1219_v37 = vsel %vm1136_vm3, %v1218_v10, %v1217_v34  ;;  %v906_v21 = vxor.u32 2147483648, %v905_v50  ;;  %v3482_v39 = vmin.u32 %v1304_v42, %v4531_v1  ;;  %3735 = vcosq.f32 %v1118_v40 }
 0x195   : > { %vm4543_vm5 = vcmp.le.f32.partialorder %v6054_v46, 0.7853982  ;;  %v1220_v3 = vsub.s32 4, %v4353_v19  ;;  %v708_v6 = vand.u32 3, %v707_v49  ;;  %v909_v55 = vsel %vm824_vm7, %v908_v38, %v4419_v14 }
 0x196   : > { %3737 = vsinq.f32 %v1118_v40  ;;  %v6057_v8 = vand.u32 2147483647, %v4253_v24  ;;  %v907_v43 = vsel %vm824_vm7, %v906_v21, %v905_v50  ;;  %v1306_v30 = vclz %v3482_v39  ;;  %v3724_v4 = vpop.eup %3723 }
 0x197   : > { %v1222_v5 = vsel %vm4543_vm5, %v4200_v33, %v1219_v37  ;;  %v711_v34 = vxor.u32 2147483648, %v3722_v11  ;;  %v714_v14 = vxor.u32 2147483648, %v3720_v45  ;;  %v3726_v44 = vpop.eup %3725  ;;  %v811_v48 = vadd.s32 3, %v807_v16 }
 0x198   : > { %vm4558_vm8 = vcmp.le.f32.partialorder %v6057_v8, 0.7853982  ;;  %v3483_v58 = vadd.s32 4294967294, %v1306_v30  ;;  %v4573_v56 = vsel %vm928_vm15, %v1012_v9, %v4141_v61  ;;  %v4578_v18 = vsel %vm1136_vm3, %v1220_v3, %v4353_v19 }
 0x199   : > { %v910_v13 = vsel %vm4558_vm8, %v4253_v24, %v907_v43  ;;  %v911_v7 = vsel %vm4558_vm8, 0, %v909_v55  ;;  %v3728_v32 = vpop.eup %3727  ;;  %vm709_vm9 = vcmp.lt.s32.totalorder %v708_v6, 2  ;;  %vm710_vm11 = vcmp.eq.s32.totalorder %v708_v6, 0 }
 0x19a   : > { %3739 = vcosq.f32 %v910_v13  ;;  %vm3484_vm10 = vcmp.lt.s32.totalorder %v3483_v58, 0  ;;  %vm713_vm12 = vcmp.eq.s32.totalorder %v708_v6, 2  ;;  %v3730_v52 = vpop.eup %3729  ;;  %v712_v17 = vsel %vm710_vm11, %v3720_v45, %v711_v34 }
 0x19b   : > { %3741 = vsinq.f32 %v910_v13  ;;  %v1309_v62 = vsel %vm3484_vm10, 0, %v3483_v58  ;;  %v715_v10 = vsel %vm713_vm12, %v714_v14, %v3722_v11  ;;  %v915_v54 = vadd.s32 3, %v911_v7  ;;  %v4580_v47 = vpop.eup %3731 }
 0x19c   : > { %3743 = vcosq.f32 %v1222_v5  ;;  %v1294_v61 = vadd.s32 %v4449_v28, %v4458_v41  ;;  %v1310_v9 = vsub.s32 32, %v1309_v62  ;;  %v1314_v15 = vsub.s32 4294967266, %v1309_v62  ;;  %v4584_v49 = vpop.eup %3733 }
 0x19d   : > { %v812_v19 = vand.u32 3, %v811_v48  ;;  %v604_v38 = vand.u32 3, %v4513_v0  ;;  %v607_v40 = vxor.u32 2147483648, %v3724_v4  ;;  %v815_v50 = vxor.u32 2147483648, %v3728_v32 }
 0x19e   : > { %v818_v42 = vxor.u32 2147483648, %v3726_v44  ;;  %v1311_v46 = vshll.u32 %v4531_v1, %v1309_v62  ;;  %v1312_v45 = vshrl.u32 %v1294_v61, %v1310_v9  ;;  %v1315_v11 = vadd.s32 127, %v1314_v15  ;;  %v4588_v37 = vpop.eup %3735 }
 0x19f   : > { %v610_v16 = vxor.u32 2147483648, %v3730_v52  ;;  %3745 = vsinq.f32 %v1222_v5  ;;  %vm706_vm13 = vweird.f32 %v3988_v29  ;;  %v716_v28 = vsel %vm709_vm9, %v712_v17, %v715_v10 }
 0x1a0   : > { %v916_v41 = vand.u32 3, %v915_v54  ;;  %v4592_v21 = vpop.eup %3737  ;;  %v1313_v39 = vor.u32 %v1312_v45, %v1311_v46  ;;  %v1316_v0 = vshll.u32 %v1315_v11, 23  ;;  %vm814_vm15 = vcmp.eq.s32.totalorder %v812_v19, 0 }
 0x1a1   : > { %vm817_vm14 = vcmp.eq.s32.totalorder %v812_v19, 2  ;;  %vm606_vm2 = vcmp.eq.s32.totalorder %v604_v38, 0  ;;  %vm609_vm4 = vcmp.eq.s32.totalorder %v604_v38, 2  ;;  %v816_v1 = vsel %vm814_vm15, %v3726_v44, %v815_v50 }
 0x1a2   : > { %v819_v3 = vsel %vm817_vm14, %v818_v42, %v3728_v32  ;;  %vm4596_vm3 = vcmp.le.f32.partialorder %v1238_v53, 0.7853982  ;;  %v1317_v6 = vor.u32 4788187, %v1316_v0  ;;  %vm605_vm7 = vcmp.lt.s32.totalorder %v604_v38, 2 }
 0x1a3   : > { %v608_v27 = vsel %vm606_vm2, %v3730_v52, %v607_v40  ;;  %v611_v43 = vsel %vm609_vm4, %v610_v16, %v3724_v4  ;;  %vm921_vm8 = vcmp.eq.s32.totalorder %v916_v41, 2  ;;  %vm813_vm9 = vcmp.lt.s32.totalorder %v812_v19, 2 }
 0x1a4   : > { %v3740_v55 = vpop.eup %3739  ;;  %v1116_v13 = vsub.s32 4, %v4203_v20  ;;  %v1318_v14 = vand.u32 2147483647, %v1317_v6  ;;  %v1320_v44 = vcvt.s32.f32 %v1313_v39  ;;  %v820_v58 = vsel %vm813_vm9, %v816_v1, %v819_v3 }
 0x1a5   : > { %v3742_v30 = vpop.eup %3741  ;;  %v922_v5 = vxor.u32 2147483648, %v3740_v55  ;;  %vm917_vm10 = vcmp.lt.s32.totalorder %v916_v41, 2  ;;  %vm918_vm11 = vcmp.eq.s32.totalorder %v916_v41, 0  ;;  %vm810_vm12 = vweird.f32 %v4172_v60 }
 0x1a6   : > { %v3744_v34 = vpop.eup %3743  ;;  %v919_v48 = vxor.u32 2147483648, %v3742_v30  ;;  %v1321_v7 = vmul.f32 %v1320_v44, %v1318_v14  ;;  %v612_v4 = vsel %vm605_vm7, %v608_v27, %v611_v43  ;;  %v1324_v52 = vsub.s32 4, %v4507_v2 }
 0x1a7   : > { %v923_v53 = vsel %vm921_vm8, %v922_v5, %v3742_v30  ;;  %vm914_vm15 = vweird.f32 %v4253_v24  ;;  %v821_v17 = vsel %vm810_vm12, nan, %v820_v58  ;;  %v1117_v10 = vsel %vm1032_vm1, %v1116_v13, %v4203_v20 }
 0x1a8   : > { %v920_v32 = vsel %vm918_vm11, %v3740_v55, %v919_v48  ;;  %v1322_v54 = vxor.u32 2147483648, %v1321_v7  ;;  %v717_v61 = vsel %vm706_vm13, nan, %v716_v28  ;;  %vm602_vm14 = vweird.f32 %v3984_v25 }
 0x1a9   : > { %v924_v62 = vsel %vm917_vm10, %v920_v32, %v923_v53  ;;  %v3746_v60 = vpop.eup %3745  ;;  %v1223_v15 = vsel %vm4543_vm5, 0, %v4578_v18  ;;  %vm1240_vm2 = vcmp.lt.s32.totalorder %v4329_v12, 0  ;;  %v613_v19 = vsel %vm602_vm14, nan, %v612_v4  ;;  %v1342_v4 = vld [vmem:[%s5998_s3] sm:$0xff] }
 0x1aa   : > { %v925_v9 = vsel %vm914_vm15, nan, %v924_v62  ;;  %v1323_v38 = vsel %vm1240_vm2, %v1322_v54, %v1321_v7  ;;  %v3564_v40 = vpack.c.bf16 %v821_v17, %v613_v19  ;;  %v1119_v20 = vsel %vm4517_vm6, 0, %v1117_v10 }
 0x1ab   : > { %v3562_v24 = vpack.c.bf16 %v925_v9, %v717_v61  ;;  %v1325_v29 = vsel %vm1240_vm2, %v1324_v52, %v4507_v2  ;;  %v1015_v25 = vsel %vm4475_vm0, 0, %v4573_v56  ;;  %v1326_v22 = vsel %vm4596_vm3, %v4329_v12, %v1323_v38  ;;  %v1353_v52 = vpop.permute.xlu0 %1352 }
 0x1ac   : > { %v1227_v18 = vadd.s32 3, %v1223_v15  ;;  %3747 = vcosq.f32 %v1326_v22  ;;  %v1123_v50 = vadd.s32 3, %v1119_v20  ;;  %v1327_v35 = vsel %vm4596_vm3, 0, %v1325_v29 }
 0x1ad   : > { %3563 = vmatprep.subr.bf16.mxu1 %v3562_v24  ;;  %3749 = vsinq.f32 %v1326_v22  ;;  %v1019_v42 = vadd.s32 3, %v1015_v25  ;;  %v1331_v46 = vadd.s32 3, %v1327_v35  ;;  %v1231_v11 = vxor.u32 2147483648, %v3746_v60 }
 0x1ae   : > { %3565 = vmatpush1.bf16.msra.mxu1 %v3564_v40  ;;  %v1228_v2 = vand.u32 3, %v1227_v18  ;;  %v1124_v45 = vand.u32 3, %v1123_v50  ;;  %v1234_v31 = vxor.u32 2147483648, %v3744_v34  ;;  %v1127_v56 = vxor.u32 2147483648, %v4592_v21 }
 0x1af   : > { %v1130_v16 = vxor.u32 2147483648, %v4588_v37  ;;  %v1020_v28 = vand.u32 3, %v1019_v42  ;;  %v1023_v41 = vxor.u32 2147483648, %v4584_v49  ;;  %v1026_v39 = vxor.u32 2147483648, %v4580_v47 }
 0x1b0   : > { %v1332_v0 = vand.u32 3, %v1331_v46  ;;  %vm1230_vm0 = vcmp.eq.s32.totalorder %v1228_v2, 0  ;;  %vm1233_vm1 = vcmp.eq.s32.totalorder %v1228_v2, 2  ;;  %vm1126_vm6 = vcmp.eq.s32.totalorder %v1124_v45, 0 }
 0x1b1   : > { %vm1129_vm5 = vcmp.eq.s32.totalorder %v1124_v45, 2  ;;  %v1232_v1 = vsel %vm1230_vm0, %v3744_v34, %v1231_v11  ;;  %v1235_v3 = vsel %vm1233_vm1, %v1234_v31, %v3746_v60  ;;  %v1128_v8 = vsel %vm1126_vm6, %v4588_v37, %v1127_v56  ;;  %v1358_v60 = vpop.permute.xlu1 %1357 }
 0x1b2   : > { %v1131_v6 = vsel %vm1129_vm5, %v1130_v16, %v4592_v21  ;;  %vm1022_vm13 = vcmp.eq.s32.totalorder %v1020_v28, 0  ;;  %vm1025_vm4 = vcmp.eq.s32.totalorder %v1020_v28, 2  ;;  %vm1229_vm3 = vcmp.lt.s32.totalorder %v1228_v2, 2 }
 0x1b3   : > { %v1024_v30 = vsel %vm1022_vm13, %v4580_v47, %v1023_v41  ;;  %v1027_v5 = vsel %vm1025_vm4, %v1026_v39, %v4584_v49  ;;  %vm1125_vm7 = vcmp.lt.s32.totalorder %v1124_v45, 2  ;;  %vm1337_vm8 = vcmp.eq.s32.totalorder %v1332_v0, 2 }
 0x1b4   : > { %v1236_v14 = vsel %vm1229_vm3, %v1232_v1, %v1235_v3  ;;  %v1132_v34 = vsel %vm1125_vm7, %v1128_v8, %v1131_v6  ;;  %vm1334_vm9 = vcmp.eq.s32.totalorder %v1332_v0, 0  ;;  %vm1021_vm10 = vcmp.lt.s32.totalorder %v1020_v28, 2 }
 0x1b5   : > { %vm1333_vm11 = vcmp.lt.s32.totalorder %v1332_v0, 2  ;;  %v1028_v21 = vsel %vm1021_vm10, %v1024_v30, %v1027_v5  ;;  %vm1226_vm12 = vweird.f32 %v4200_v33  ;;  %vm1122_vm15 = vweird.f32 %v4014_v57  ;;  %v1343_v33 = vld [vmem:[%s5998_s3 + $0x8] sm:$0xff] }
 0x1b6   : > { %v3748_v55 = vpop.eup %3747  ;;  %vm1330_vm14 = vweird.f32 %v4329_v12  ;;  %v1237_v49 = vsel %vm1226_vm12, nan, %v1236_v14  ;;  %v1133_v48 = vsel %vm1122_vm15, nan, %v1132_v34  ;;  %vm1018_vm2 = vweird.f32 %v3986_v26  ;;  %v1344_v26 = vld [vmem:[%s5998_s3 + $0x10] sm:$0xff]  ;;  %v1345_v12 = vld [vmem:[%s5998_s3 + $0x18] sm:$0xff] }
 0x1b7   : > { %v3750_v27 = vpop.eup %3749  ;;  %v1338_v43 = vxor.u32 2147483648, %v3748_v55  ;;  %v1029_v7 = vsel %vm1018_vm2, nan, %v1028_v21  ;;  %vm1370_vm0 = vcmask 261120   ;;  %v6062_v57 = vmov 0.0  }
 0x1b8   : > { %v1335_v13 = vxor.u32 2147483648, %v3750_v27  ;;  %v3568_v32 = vpack.c.bf16 %v1237_v49, %v1029_v7 }
 0x1b9   : > { %v1339_v44 = vsel %vm1337_vm8, %v1338_v43, %v3750_v27 }
 0x1ba   : > { %v1336_v37 = vsel %vm1334_vm9, %v3748_v55, %v1335_v13 }
 0x1bb   : > { %v1340_v47 = vsel %vm1333_vm11, %v1336_v37, %v1339_v44  ;;  %v6063_v44 = vmov 2131351028  }
 0x1bc   : > { %v1341_v58 = vsel %vm1330_vm14, nan, %v1340_v47 }
 0x1bd   : > { %v3566_v53 = vpack.c.bf16 %v1341_v58, %v1133_v48 }
 0x1bf   : > { %3567 = vmatprep.subr.bf16.mxu1 %v3566_v53 }
 0x1c0   : > { %3569 = vmatpush1.bf16.msra.mxu1 %v3568_v32 }
 0x1c3   : > { %3485 = vmatmul.mubr.msk.f32.vlgmr.msra.gmra.mrb[4].mxu1 %vm1370_vm0, %v1342_v4 }
 0x1c4   : > { %1453 = vmatprep.mubr.f32.mxu1 %v6062_v57 }
 0x1c7   : > { %3486 = vmatmul.mubr.msk.f32.gmra.mrb[6].mxu1 %vm1370_vm0, %v1343_v33 }
 0x1c8   : > { %1459 = vmatprep.mubr.f32.mxu1 %v6062_v57 }
 0x1cb   : > { %3487 = vmatmul.mubr.msk.f32.gmra.mrb[8].mxu1 %vm1370_vm0, %v1344_v26 }
 0x1cc   : > { %1465 = vmatprep.mubr.f32.mxu1 %v6062_v57 }
 0x1cf   : > { %3488 = vmatmul.mubr.msk.f32.gmra.mrb[10].mxu1 %vm1370_vm0, %v1345_v12 }
 0x1d0   : > { %3339 = vmatprep.mubr.f32.mxu1 %v6062_v57 }
 0x296   : > { %v1449_v62 = vpop.f32.mrb[4].mxu1 }
 0x297   : > { %v4658_v17 = vadd.f32 %v1449_v62, %v1353_v52  ;;  %v1451_v10 = vpop.f32.mrb[5].mxu1 }
 0x298   : > { %v4660_v54 = vadd.f32 %v1451_v10, %v1353_v52 }
 0x299   : > { %v1472_v61 = vand.u32 2147483647, %v4658_v17  ;;  %v1475_v9 = vand.u32 2139095040, %v4658_v17 }
 0x29a   : > { %v1576_v15 = vand.u32 2147483647, %v4660_v54  ;;  %v1579_v24 = vand.u32 2139095040, %v4660_v54  ;;  %v1455_v19 = vpop.f32.mrb[6].mxu1 }
 0x29b   : > { %v1476_v38 = vshrl.u32 %v1475_v9, 23  ;;  %v4666_v40 = vadd.f32 %v1455_v19, %v1358_v60  ;;  %v1457_v20 = vpop.f32.mrb[7].mxu1  ;;  %v1479_v29 = vand.u32 8388607, %v1472_v61 }
 0x29c   : > { %v1580_v25 = vshrl.u32 %v1579_v24, 23  ;;  %v1583_v22 = vand.u32 8388607, %v1576_v15  ;;  %v4679_v3 = vadd.f32 %v1457_v20, %v1358_v60 }
 0x29d   : > { %v3489_v18 = vadd.s32 4294967169, %v1476_v38  ;;  %v1683_v35 = vand.u32 2139095040, %v4666_v40  ;;  %v1480_v2 = vor.u32 8388608, %v1479_v29  ;;  %v6024_v43 = vand.u32 2147483647, %v4666_v40 }
 0x29e   : > { %v3493_v50 = vadd.s32 4294967169, %v1580_v25  ;;  %v4673_v42 = vpop.f32.mrb[8].mxu1  ;;  %v1584_v45 = vor.u32 8388608, %v1583_v22 }
 0x29f   : > { %v1482_v46 = vadd.s32 1, %v3489_v18  ;;  %v1684_v31 = vshrl.u32 %v1683_v35, 23  ;;  %v4675_v56 = vpop.f32.mrb[9].mxu1  ;;  %v4683_v8 = vshll.u32 %v1480_v2, 8 }
 0x2a0   : > { %v1586_v11 = vadd.s32 1, %v3493_v50  ;;  %v4687_v27 = vshll.u32 %v1584_v45, 8 }
 0x2a1   : > { %vm1483_vm1 = vcmp.gt.s32.totalorder %v1482_v46, 0  ;;  %v3497_v28 = vadd.s32 4294967169, %v1684_v31 }
 0x2a2   : > { %v1484_v16 = vsel %vm1483_vm1, %v1482_v46, 0  ;;  %vm1587_vm6 = vcmp.gt.s32.totalorder %v1586_v11, 0  ;;  %v4677_v41 = vpop.f32.mrb[10].mxu1 }
 0x2a3   : > { %v1485_v39 = vshrl.u32 %v1484_v16, 5  ;;  %v1486_v0 = vand.u32 31, %v1484_v16  ;;  %v1588_v1 = vsel %vm1587_vm6, %v1586_v11, 0  ;;  %v4681_v55 = vpop.f32.mrb[11].mxu1  ;;  %v4691_v14 = vadd.s32 1, %v3497_v28 }
 0x2a4   : > { %v4685_v6 = vshrl.u32 %v1588_v1, 5  ;;  %v1590_v13 = vand.u32 31, %v1588_v1 }
 0x2a5   : > { %v1487_v30 = vsub.s32 32, %v1486_v0  ;;  %v1489_v5 = vshll.u32 %v6027_v59, %v1486_v0  ;;  %v1492_v34 = vshll.u32 %v6025_v63, %v1486_v0  ;;  %v1495_v37 = vshll.u32 %v6063_v44, %v1486_v0 }
 0x2a6   : > { %v1498_v21 = vshll.u32 %v6037_v23, %v1486_v0  ;;  %v1501_v47 = vshll.u32 %v6038_v36, %v1486_v0  ;;  %vm1504_vm5 = vcmp.lt.s32.totalorder %v1485_v39, 1  ;;  %vm1505_vm13 = vcmp.lt.s32.totalorder %v1485_v39, 2 }
 0x2a7   : > { %v1490_v49 = vshrl.u32 %v6025_v63, %v1487_v30  ;;  %v1493_v48 = vshrl.u32 %v6063_v44, %v1487_v30  ;;  %v1496_v58 = vshrl.u32 %v6037_v23, %v1487_v30  ;;  %v1488_v53 = vshrl.u32 %v6027_v59, %v1487_v30 }
 0x2a8   : > { %v1499_v7 = vshrl.u32 %v6038_v36, %v1487_v30  ;;  %v1502_v32 = vshrl.u32 %v6042_v51, %v1487_v30  ;;  %v1591_v12 = vsub.s32 32, %v1590_v13  ;;  %vm1506_vm4 = vcmp.lt.s32.totalorder %v1485_v39, 3 }
 0x2a9   : > { %v1491_v4 = vor.u32 %v1490_v49, %v1489_v5  ;;  %v1494_v33 = vor.u32 %v1493_v48, %v1492_v34  ;;  %v1497_v26 = vor.u32 %v1496_v58, %v1495_v37  ;;  %vm1507_vm3 = vcmp.lt.s32.totalorder %v1485_v39, 4 }
 0x2aa   : > { %v1500_v52 = vor.u32 %v1499_v7, %v1498_v21  ;;  %v1503_v62 = vor.u32 %v1502_v32, %v1501_v47  ;;  %v1593_v29 = vshll.u32 %v6027_v59, %v1590_v13  ;;  %v1594_v18 = vshrl.u32 %v6025_v63, %v1591_v12 }
 0x2ab   : > { %v1508_v10 = vsel %vm1504_vm5, %v1488_v53, %v1491_v4  ;;  %v1509_v9 = vsel %vm1507_vm3, %v1497_v26, 2102212464  ;;  %v1512_v60 = vsel %vm1504_vm5, %v1491_v4, %v1494_v33  ;;  %v1516_v24 = vsel %vm1504_vm5, %v1494_v33, %v1497_v26 }
 0x2ac   : > { %v1510_v19 = vsel %vm1506_vm4, %v1494_v33, %v1509_v9  ;;  %v1513_v38 = vsel %vm1507_vm3, %v1500_v52, 920167782  ;;  %v1517_v20 = vsel %vm1507_vm3, %v1503_v62, 1326507024  ;;  %v1596_v50 = vshll.u32 %v6025_v63, %v1590_v13 }
 0x2ad   : > { %v1514_v25 = vsel %vm1506_vm4, %v1497_v26, %v1513_v38  ;;  %v1518_v22 = vsel %vm1506_vm4, %v1500_v52, %v1517_v20  ;;  %v1511_v35 = vsel %vm1505_vm13, %v1508_v10, %v1510_v19  ;;  %v1597_v45 = vshrl.u32 %v6063_v44, %v1591_v12 }
 0x2ae   : > { %v1515_v46 = vsel %vm1505_vm13, %v1512_v60, %v1514_v25  ;;  %v1519_v2 = vsel %vm1505_vm13, %v1516_v24, %v1518_v22  ;;  %v1595_v0 = vor.u32 %v1594_v18, %v1593_v29  ;;  %v1599_v30 = vshll.u32 %v6063_v44, %v1590_v13 }
 0x2af   : > { %v4714_v11 = vmul.u32.u64.low %v4683_v8, %v1519_v2  ;;  %v4715_v31 = vmul.u32.u64.high %v4683_v8, %v1519_v2, %v4714_v11  ;;  %v4718_v16 = vmul.u32.u64.low %v4683_v8, %v1515_v46  ;;  %v4719_v28 = vmul.u32.u64.high %v4683_v8, %v1515_v46, %v4718_v16 }
 0x2b0   : > { %v1598_v1 = vor.u32 %v1597_v45, %v1596_v50  ;;  %v1600_v5 = vshrl.u32 %v6037_v23, %v1591_v12  ;;  %v1592_v39 = vshrl.u32 %v6027_v59, %v1591_v12  ;;  %v1602_v34 = vshll.u32 %v6037_v23, %v1590_v13 }
 0x2b1   : > { %v1603_v37 = vshrl.u32 %v6038_v36, %v1591_v12  ;;  %v1606_v21 = vshrl.u32 %v6042_v51, %v1591_v12  ;;  %v1527_v47 = vmul.u32 %v4683_v8, %v1511_v35  ;;  %v1605_v48 = vshll.u32 %v6038_v36, %v1590_v13 }
 0x2b2   : > { %v1601_v49 = vor.u32 %v1600_v5, %v1599_v30  ;;  %vm1608_vm7 = vcmp.lt.s32.totalorder %v4685_v6, 1  ;;  %vm1529_vm8 = vc.u32 %v4715_v31, %v4718_v16  ;;  %v1530_v58 = vadd.s32 1, %v4719_v28 }
 0x2b3   : > { %v1604_v53 = vor.u32 %v1603_v37, %v1602_v34  ;;  %vm1609_vm9 = vcmp.lt.s32.totalorder %v4685_v6, 2  ;;  %v1607_v7 = vor.u32 %v1606_v21, %v1605_v48  ;;  %vm1610_vm10 = vcmp.lt.s32.totalorder %v4685_v6, 3 }
 0x2b4   : > { %vm1611_vm11 = vcmp.lt.s32.totalorder %v4685_v6, 4  ;;  %v1616_v32 = vsel %vm1608_vm7, %v1595_v0, %v1598_v1  ;;  %v1531_v8 = vsel %vm1529_vm8, %v1530_v58, %v4719_v28  ;;  %v1620_v33 = vsel %vm1608_vm7, %v1598_v1, %v1601_v49 }
 0x2b5   : > { %v1613_v4 = vsel %vm1611_vm11, %v1601_v49, 2102212464  ;;  %v1617_v13 = vsel %vm1611_vm11, %v1604_v53, 920167782  ;;  %v1532_v26 = vadd.s32 %v1531_v8, %v1527_v47  ;;  %v1612_v12 = vsel %vm1608_vm7, %v1592_v39, %v1595_v0 }
 0x2b6   : > { %v1618_v52 = vsel %vm1610_vm10, %v1601_v49, %v1617_v13  ;;  %v1621_v62 = vsel %vm1611_vm11, %v1607_v7, 1326507024  ;;  %v1614_v10 = vsel %vm1610_vm10, %v1598_v1, %v1613_v4  ;;  %vm1691_vm12 = vcmp.gt.s32.totalorder %v4691_v14, 0 }
 0x2b7   : > { %v1619_v9 = vsel %vm1609_vm9, %v1616_v32, %v1618_v52  ;;  %v1622_v60 = vsel %vm1610_vm10, %v1604_v53, %v1621_v62  ;;  %v1533_v24 = vadd.s32 536870912, %v1532_v26  ;;  %v1687_v22 = vand.u32 8388607, %v6024_v43 }
 0x2b8   : > { %v1623_v19 = vsel %vm1609_vm9, %v1620_v33, %v1622_v60  ;;  %v4744_v38 = vmul.u32.u64.low %v4687_v27, %v1619_v9  ;;  %v4745_v20 = vmul.u32.u64.high %v4687_v27, %v1619_v9, %v4744_v38  ;;  %v1692_v18 = vsel %vm1691_vm12, %v4691_v14, 0 }
 0x2b9   : > { %v4749_v29 = vmul.u32.u64.low %v4687_v27, %v1623_v19  ;;  %v4750_v25 = vmul.u32.u64.high %v4687_v27, %v1623_v19, %v4749_v29  ;;  %v4755_v50 = vshrl.u32 %v1533_v24, 30  ;;  %v1615_v35 = vsel %vm1609_vm9, %v1612_v12, %v1614_v10 }
 0x2ba   : > { %v1694_v46 = vand.u32 31, %v1692_v18  ;;  %v1787_v2 = vand.u32 2139095040, %v4679_v3  ;;  %v1634_v11 = vadd.s32 1, %v4745_v20  ;;  %v1631_v0 = vmul.u32 %v4687_v27, %v1615_v35 }
 0x2bb   : > { %v1535_v45 = vshll.u32 %v4755_v50, 30  ;;  %vm1633_vm15 = vc.u32 %v4750_v25, %v4744_v38  ;;  %v1688_v1 = vor.u32 8388608, %v1687_v22  ;;  %v1693_v47 = vshrl.u32 %v1692_v18, 5 }
 0x2bc   : > { %v1695_v28 = vsub.s32 32, %v1694_v46  ;;  %v1635_v30 = vsel %vm1633_vm15, %v1634_v11, %v4745_v20  ;;  %v1788_v6 = vshrl.u32 %v1787_v2, 23  ;;  %v1697_v39 = vshll.u32 %v6027_v59, %v1694_v46 }
 0x2bd   : > { %v4765_v14 = vsub.s32 %v1532_v26, %v1535_v45  ;;  %v1636_v5 = vadd.s32 %v1635_v30, %v1631_v0  ;;  %v1700_v27 = vshll.u32 %v6025_v63, %v1694_v46  ;;  %v1703_v53 = vshll.u32 %v6063_v44, %v1694_v46 }
 0x2be   : > { %v1698_v34 = vshrl.u32 %v6025_v63, %v1695_v28  ;;  %v1701_v37 = vshrl.u32 %v6063_v44, %v1695_v28  ;;  %v1704_v49 = vshrl.u32 %v6037_v23, %v1695_v28  ;;  %v1728_v7 = vshll.u32 %v1688_v1, 8 }
 0x2bf   : > { %v1538_v21 = vsub.s32 0, %v4765_v14  ;;  %v1637_v48 = vadd.s32 536870912, %v1636_v5  ;;  %v1706_v4 = vshll.u32 %v6037_v23, %v1694_v46  ;;  %v1707_v13 = vshrl.u32 %v6038_v36, %v1695_v28 }
 0x2c0   : > { %v1699_v58 = vor.u32 %v1698_v34, %v1697_v39  ;;  %v1702_v8 = vor.u32 %v1701_v37, %v1700_v27  ;;  %v1705_v26 = vor.u32 %v1704_v49, %v1703_v53  ;;  %v1709_v12 = vshll.u32 %v6038_v36, %v1694_v46 }
 0x2c1   : > { %v3490_v32 = vmin.u32 %v1538_v21, %v4765_v14  ;;  %v4778_v33 = vshrl.u32 %v1637_v48, 30  ;;  %v1710_v52 = vshrl.u32 %v6042_v51, %v1695_v28  ;;  %v1708_v10 = vor.u32 %v1707_v13, %v1706_v4 }
 0x2c2   : > { %vm1712_vm14 = vcmp.lt.s32.totalorder %v1693_v47, 1  ;;  %v3501_v9 = vadd.s32 4294967169, %v1788_v6  ;;  %vm1713_vm2 = vcmp.lt.s32.totalorder %v1693_v47, 2  ;;  %vm1715_vm1 = vcmp.lt.s32.totalorder %v1693_v47, 4 }
 0x2c3   : > { %v1540_v62 = vclz %v3490_v32  ;;  %v1639_v60 = vshll.u32 %v4778_v33, 30  ;;  %v1711_v24 = vor.u32 %v1710_v52, %v1709_v12  ;;  %vm1714_vm6 = vcmp.lt.s32.totalorder %v1693_v47, 3 }
 0x2c4   : > { %v1720_v20 = vsel %vm1712_vm14, %v1699_v58, %v1702_v8  ;;  %v1721_v29 = vsel %vm1715_vm1, %v1708_v10, 920167782  ;;  %v1717_v18 = vsel %vm1715_vm1, %v1705_v26, 2102212464  ;;  %v1724_v46 = vsel %vm1712_vm14, %v1702_v8, %v1705_v26 }
 0x2c5   : > { %v3491_v19 = vadd.s32 4294967294, %v1540_v62  ;;  %v4784_v22 = vsub.s32 %v1636_v5, %v1639_v60  ;;  %v1722_v35 = vsel %vm1714_vm6, %v1705_v26, %v1721_v29  ;;  %v1696_v2 = vshrl.u32 %v6027_v59, %v1695_v28  ;;  %v1363_v29 = vpop.permute.xlu0 %1362 }
 0x2c6   : > { %v1723_v45 = vsel %vm1713_vm2, %v1720_v20, %v1722_v35  ;;  %v1725_v11 = vsel %vm1715_vm1, %v1711_v24, 1326507024  ;;  %v1794_v6 = vadd.s32 1, %v3501_v9  ;;  %v1718_v34 = vsel %vm1714_vm6, %v1702_v8, %v1717_v18 }
 0x2c7   : > { %vm3492_vm5 = vcmp.lt.s32.totalorder %v3491_v19, 0  ;;  %v1642_v1 = vsub.s32 0, %v4784_v22  ;;  %v1726_v30 = vsel %vm1714_vm6, %v1708_v10, %v1725_v11  ;;  %v1716_v5 = vsel %vm1712_vm14, %v1696_v2, %v1699_v58 }
 0x2c8   : > { %v1543_v0 = vsel %vm3492_vm5, 0, %v3491_v19  ;;  %v1727_v37 = vsel %vm1713_vm2, %v1724_v46, %v1726_v30  ;;  %vm1795_vm13 = vcmp.gt.s32.totalorder %v1794_v6, 0  ;;  %v6023_v32 = vand.u32 2147483647, %v4679_v3 }
 0x2c9   : > { %v1548_v39 = vsub.s32 4294967266, %v1543_v0  ;;  %v3494_v21 = vmin.u32 %v1642_v1, %v4784_v22  ;;  %v4796_v27 = vmul.u32.u64.low %v1728_v7, %v1727_v37  ;;  %v4797_v28 = vmul.u32.u64.high %v1728_v7, %v1727_v37, %v4796_v27 }
 0x2ca   : > { %v4799_v49 = vmul.u32.u64.low %v1728_v7, %v1723_v45  ;;  %v4800_v48 = vmul.u32.u64.high %v1728_v7, %v1723_v45, %v4799_v49  ;;  %v1796_v4 = vsel %vm1795_vm13, %v1794_v6, 0  ;;  %v1544_v13 = vsub.s32 32, %v1543_v0 }
 0x2cb   : > { %v1644_v53 = vclz %v3494_v21  ;;  %v1549_v58 = vadd.s32 127, %v1548_v39  ;;  %v1719_v8 = vsel %vm1713_vm2, %v1716_v5, %v1718_v34  ;;  %v1798_v26 = vand.u32 31, %v1796_v4 }
 0x2cc   : > { %vm1737_vm4 = vc.u32 %v4797_v28, %v4799_v49  ;;  %v1528_v52 = vadd.s32 %v4718_v16, %v4715_v31  ;;  %v1738_v62 = vadd.s32 1, %v4800_v48  ;;  %v1735_v10 = vmul.u32 %v1728_v7, %v1719_v8 }
 0x2cd   : > { %v3495_v12 = vadd.s32 4294967294, %v1644_v53  ;;  %v1791_v9 = vand.u32 8388607, %v6023_v32  ;;  %v1550_v24 = vshll.u32 %v1549_v58, 23  ;;  %v1799_v19 = vsub.s32 32, %v1798_v26 }
 0x2ce   : > { %v1546_v60 = vshrl.u32 %v1528_v52, %v1544_v13  ;;  %v1739_v47 = vsel %vm1737_vm4, %v1738_v62, %v4800_v48  ;;  %v1545_v18 = vshll.u32 %v4765_v14, %v1543_v0  ;;  %v4815_v31 = vadd.f32 %v4673_v42, %v1363_v29 }
 0x2cf   : > { %vm3496_vm3 = vcmp.lt.s32.totalorder %v3495_v12, 0  ;;  %v1740_v20 = vadd.s32 %v1739_v47, %v1735_v10  ;;  %v1792_v2 = vor.u32 8388608, %v1791_v9  ;;  %v1551_v7 = vor.u32 4788187, %v1550_v24 }
 0x2d0   : > { %v1647_v35 = vsel %vm3496_vm3, 0, %v3495_v12  ;;  %v1547_v16 = vor.u32 %v1546_v60, %v1545_v18  ;;  %v1802_v45 = vshrl.u32 %v6025_v63, %v1799_v19  ;;  %v1805_v11 = vshrl.u32 %v6063_v44, %v1799_v19 }
 0x2d1   : > { %v1741_v46 = vadd.s32 536870912, %v1740_v20  ;;  %v1652_v1 = vsub.s32 4294967266, %v1647_v35  ;;  %v1808_v6 = vshrl.u32 %v6037_v23, %v1799_v19  ;;  %v1811_v39 = vshrl.u32 %v6038_v36, %v1799_v19 }
 0x2d2   : > { %v1801_v14 = vshll.u32 %v6027_v59, %v1798_v26  ;;  %v1804_v0 = vshll.u32 %v6025_v63, %v1798_v26  ;;  %v1810_v42 = vshll.u32 %v6037_v23, %v1798_v26  ;;  %v1814_v5 = vshrl.u32 %v6042_v51, %v1799_v19 }
 0x2d3   : > { %v4819_v30 = vshrl.u32 %v1741_v46, 30  ;;  %v1797_v37 = vshrl.u32 %v1796_v4, 5  ;;  %v1807_v21 = vshll.u32 %v6063_v44, %v1798_v26  ;;  %v4830_v27 = vadd.f32 %v4675_v56, %v1363_v29 }
 0x2d4   : > { %v1803_v48 = vor.u32 %v1802_v45, %v1801_v14  ;;  %v1806_v53 = vor.u32 %v1805_v11, %v1804_v0  ;;  %v1812_v13 = vor.u32 %v1811_v39, %v1810_v42  ;;  %v1813_v58 = vshll.u32 %v6038_v36, %v1798_v26 }
 0x2d5   : > { %v1743_v34 = vshll.u32 %v4819_v30, 30  ;;  %v1632_v8 = vadd.s32 %v4744_v38, %v4750_v25  ;;  %v1653_v12 = vadd.s32 127, %v1652_v1  ;;  %v1809_v62 = vor.u32 %v1808_v6, %v1807_v21 }
 0x2d6   : > { %v1552_v10 = vand.u32 2147483647, %v1551_v7  ;;  %v1554_v9 = vcvt.s32.f32 %v1547_v16  ;;  %v1815_v4 = vor.u32 %v1814_v5, %v1813_v58  ;;  %v1832_v60 = vshll.u32 %v1792_v2, 8 }
 0x2d7   : > { %v4835_v52 = vsub.s32 %v1740_v20, %v1743_v34  ;;  %v1648_v24 = vsub.s32 32, %v1647_v35  ;;  %vm1816_vm7 = vcmp.lt.s32.totalorder %v1797_v37, 1  ;;  %vm1819_vm8 = vcmp.lt.s32.totalorder %v1797_v37, 4 }
 0x2d8   : > { %v1800_v47 = vshrl.u32 %v6027_v59, %v1799_v19  ;;  %vm1818_vm9 = vcmp.lt.s32.totalorder %v1797_v37, 3  ;;  %v1824_v26 = vsel %vm1816_vm7, %v1803_v48, %v1806_v53  ;;  %v1825_v29 = vsel %vm1819_vm8, %v1812_v13, 920167782 }
 0x2d9   : > { %v1746_v56 = vsub.s32 0, %v4835_v52  ;;  %v1654_v38 = vshll.u32 %v1653_v12, 23  ;;  %vm1817_vm10 = vcmp.lt.s32.totalorder %v1797_v37, 2  ;;  %v1821_v25 = vsel %vm1819_vm8, %v1809_v62, 2102212464 }
 0x2da   : > { %v1826_v20 = vsel %vm1818_vm9, %v1809_v62, %v1825_v29  ;;  %v1828_v2 = vsel %vm1816_vm7, %v1806_v53, %v1809_v62  ;;  %v1829_v16 = vsel %vm1819_vm8, %v1815_v4, 1326507024  ;;  %v1649_v7 = vshll.u32 %v4784_v22, %v1647_v35 }
 0x2db   : > { %v3498_v18 = vmin.u32 %v1746_v56, %v4835_v52  ;;  %v1827_v46 = vsel %vm1817_vm10, %v1824_v26, %v1826_v20  ;;  %v1650_v45 = vshrl.u32 %v1632_v8, %v1648_v24  ;;  %v1820_v19 = vsel %vm1816_vm7, %v1800_v47, %v1803_v48 }
 0x2dc   : > { %v1830_v11 = vsel %vm1818_vm9, %v1812_v13, %v1829_v16  ;;  %v1822_v1 = vsel %vm1818_vm9, %v1806_v53, %v1821_v25  ;;  %v4846_v39 = vmul.u32.u64.low %v1832_v60, %v1827_v46  ;;  %v4847_v14 = vmul.u32.u64.high %v1832_v60, %v1827_v46, %v4846_v39 }
 0x2dd   : > { %v1831_v6 = vsel %vm1817_vm10, %v1828_v2, %v1830_v11  ;;  %v1555_v0 = vmul.f32 %v1554_v9, %v1552_v10  ;;  %v1655_v42 = vor.u32 4788187, %v1654_v38  ;;  %v1748_v21 = vclz %v3498_v18  ;;  %v4870_v18 = vpop.permute.xlu1 %1367 }
 0x2de   : > { %v4850_v5 = vmul.u32.u64.low %v1832_v60, %v1831_v6  ;;  %v4851_v34 = vmul.u32.u64.high %v1832_v60, %v1831_v6, %v4850_v5  ;;  %v1891_v58 = vand.u32 2139095040, %v4815_v31  ;;  %v1651_v22 = vor.u32 %v1650_v45, %v1649_v7 }
 0x2df   : > { %v1823_v35 = vsel %vm1817_vm10, %v1820_v19, %v1822_v1  ;;  %v1995_v48 = vand.u32 2139095040, %v4830_v27  ;;  %v1842_v53 = vadd.s32 1, %v4847_v14  ;;  %v1556_v8 = vxor.u32 2147483648, %v1555_v0 }
 0x2e0   : > { %v1892_v13 = vshrl.u32 %v1891_v58, 23  ;;  %v1558_v12 = vsub.s32 4, %v4755_v50  ;;  %v1656_v62 = vand.u32 2147483647, %v1655_v42  ;;  %v6021_v10 = vand.u32 2147483647, %v4815_v31 }
 0x2e1   : > { %v3499_v9 = vadd.s32 4294967294, %v1748_v21  ;;  %v1839_v4 = vmul.u32 %v1832_v60, %v1823_v35  ;;  %vm1841_vm11 = vc.u32 %v4851_v34, %v4846_v39  ;;  %v1658_v56 = vcvt.s32.f32 %v1651_v22 }
 0x2e2   : > { %v3505_v24 = vadd.s32 4294967169, %v1892_v13  ;;  %v1843_v37 = vsel %vm1841_vm11, %v1842_v53, %v4847_v14  ;;  %v1996_v47 = vshrl.u32 %v1995_v48, 23  ;;  %vm1474_vm12 = vcmp.lt.s32.totalorder %v4658_v17, 0 }
 0x2e3   : > { %v1844_v26 = vadd.s32 %v1843_v37, %v1839_v4  ;;  %v1557_v38 = vsel %vm1474_vm12, %v1556_v8, %v1555_v0  ;;  %v4864_v25 = vsel %vm1474_vm12, %v1558_v12, %v4755_v50  ;;  %v4866_v20 = vmul.f32 %v1658_v56, %v1656_v62 }
 0x2e4   : > { %v1898_v29 = vadd.s32 1, %v3505_v24  ;;  %v1895_v60 = vand.u32 8388607, %v6021_v10  ;;  %vm3500_vm15 = vcmp.lt.s32.totalorder %v3499_v9, 0  ;;  %v3509_v2 = vadd.s32 4294967169, %v1996_v47 }
 0x2e5   : > { %v1845_v46 = vadd.s32 536870912, %v1844_v26  ;;  %vm4874_vm2 = vcmp.le.f32.partialorder %v1472_v61, 0.7853982  ;;  %v4880_v50 = vadd.f32 %v4677_v41, %v4870_v18  ;;  %v4887_v19 = vadd.s32 %v4799_v49, %v4797_v28 }
 0x2e6   : > { %vm1899_vm14 = vcmp.gt.s32.totalorder %v1898_v29, 0  ;;  %v4894_v61 = vsel %vm4874_vm2, %v4658_v17, %v1557_v38  ;;  %v1660_v6 = vxor.u32 2147483648, %v4866_v20  ;;  %v4897_v41 = vsel %vm3500_vm15, 0, %v3499_v9 }
 0x2e7   : > { %v1900_v7 = vsel %vm1899_vm14, %v1898_v29, 0  ;;  %v4889_v11 = vshrl.u32 %v1845_v46, 30  ;;  %v1896_v42 = vor.u32 8388608, %v1895_v60  ;;  %v2002_v28 = vadd.s32 1, %v3509_v2 }
 0x2e8   : > { %v1902_v1 = vand.u32 31, %v1900_v7  ;;  %v1901_v49 = vshrl.u32 %v1900_v7, 5  ;;  %v6022_v37 = vand.u32 2147483647, %v4830_v27  ;;  %vm1578_vm1 = vcmp.lt.s32.totalorder %v4660_v54, 0 }
 0x2e9   : > { %v1847_v0 = vshll.u32 %v4889_v11, 30  ;;  %v1756_v47 = vsub.s32 4294967266, %v4897_v41  ;;  %v1936_v46 = vshll.u32 %v1896_v42, 8  ;;  %vm2003_vm5 = vcmp.gt.s32.totalorder %v2002_v28, 0 }
 0x2ea   : > { %v1903_v5 = vsub.s32 32, %v1902_v1  ;;  %v1905_v21 = vshll.u32 %v6027_v59, %v1902_v1  ;;  %v1908_v58 = vshll.u32 %v6025_v63, %v1902_v1  ;;  %v1911_v22 = vshll.u32 %v6063_v44, %v1902_v1 }
 0x2eb   : > { %v4904_v35 = vsub.s32 %v1844_v26, %v1847_v0  ;;  %v1914_v13 = vshll.u32 %v6037_v23, %v1902_v1  ;;  %v1917_v62 = vshll.u32 %v6038_v36, %v1902_v1  ;;  %vm1920_vm6 = vcmp.lt.s32.totalorder %v1901_v49, 1 }
 0x2ec   : > { %v1906_v48 = vshrl.u32 %v6025_v63, %v1903_v5  ;;  %v1909_v53 = vshrl.u32 %v6063_v44, %v1903_v5  ;;  %v1912_v8 = vshrl.u32 %v6037_v23, %v1903_v5  ;;  %v1915_v12 = vshrl.u32 %v6038_v36, %v1903_v5 }
 0x2ed   : > { %v1918_v9 = vshrl.u32 %v6042_v51, %v1903_v5  ;;  %v1850_v4 = vsub.s32 0, %v4904_v35  ;;  %v1904_v2 = vshrl.u32 %v6027_v59, %v1903_v5  ;;  %vm1921_vm13 = vcmp.lt.s32.totalorder %v1901_v49, 2 }
 0x2ee   : > { %v1907_v24 = vor.u32 %v1906_v48, %v1905_v21  ;;  %v1910_v56 = vor.u32 %v1909_v53, %v1908_v58  ;;  %v1913_v26 = vor.u32 %v1912_v8, %v1911_v22  ;;  %v1916_v29 = vor.u32 %v1915_v12, %v1914_v13 }
 0x2ef   : > { %v1919_v38 = vor.u32 %v1918_v9, %v1917_v62  ;;  %v3502_v60 = vmin.u32 %v1850_v4, %v4904_v35  ;;  %vm1923_vm4 = vcmp.lt.s32.totalorder %v1901_v49, 4  ;;  %vm1922_vm3 = vcmp.lt.s32.totalorder %v1901_v49, 3 }
 0x2f0   : > { %v1928_v7 = vsel %vm1920_vm6, %v1907_v24, %v1910_v56  ;;  %v1925_v0 = vsel %vm1923_vm4, %v1913_v26, 2102212464  ;;  %v1929_v21 = vsel %vm1923_vm4, %v1916_v29, 920167782  ;;  %v1924_v58 = vsel %vm1920_vm6, %v1904_v2, %v1907_v24 }
 0x2f1   : > { %v1852_v1 = vclz %v3502_v60  ;;  %v1930_v48 = vsel %vm1922_vm3, %v1913_v26, %v1929_v21  ;;  %v1932_v53 = vsel %vm1920_vm6, %v1910_v56, %v1913_v26  ;;  %v1933_v22 = vsel %vm1923_vm4, %v1919_v38, 1326507024 }
 0x2f2   : > { %v1926_v8 = vsel %vm1922_vm3, %v1910_v56, %v1925_v0  ;;  %v1931_v12 = vsel %vm1921_vm13, %v1928_v7, %v1930_v48  ;;  %v1934_v62 = vsel %vm1922_vm3, %v1916_v29, %v1933_v22  ;;  %v1757_v42 = vadd.s32 127, %v1756_v47 }
 0x2f3   : > { %v3503_v13 = vadd.s32 4294967294, %v1852_v1  ;;  %v1935_v9 = vsel %vm1921_vm13, %v1932_v53, %v1934_v62  ;;  %v4921_v5 = vmul.u32.u64.low %v1936_v46, %v1931_v12  ;;  %v4922_v4 = vmul.u32.u64.high %v1936_v46, %v1931_v12, %v4921_v5 }
 0x2f4   : > { %v4925_v60 = vmul.u32.u64.low %v1936_v46, %v1935_v9  ;;  %v4926_v10 = vmul.u32.u64.high %v1936_v46, %v1935_v9, %v4925_v60  ;;  %v2004_v24 = vsel %vm2003_vm5, %v2002_v28, 0  ;;  %v1927_v56 = vsel %vm1921_vm13, %v1924_v58, %v1926_v8 }
 0x2f5   : > { %vm3504_vm7 = vcmp.lt.s32.totalorder %v3503_v13, 0  ;;  %v1999_v29 = vand.u32 8388607, %v6022_v37  ;;  %v2006_v47 = vand.u32 31, %v2004_v24  ;;  %v4937_v38 = vsel %vm1578_vm1, %v1660_v6, %v4866_v20 }
 0x2f6   : > { %v4929_v26 = vsel %vm3504_vm7, 0, %v3503_v13  ;;  %v1752_v2 = vsub.s32 32, %v4897_v41  ;;  %v2099_v1 = vand.u32 2139095040, %v4880_v50  ;;  %v1946_v0 = vadd.s32 1, %v4922_v4 }
 0x2f7   : > { %v1860_v49 = vsub.s32 4294967266, %v4929_v26  ;;  %v2007_v21 = vsub.s32 32, %v2006_v47  ;;  %v1758_v58 = vshll.u32 %v1757_v42, 23  ;;  %v1840_v48 = vadd.s32 %v4846_v39, %v4851_v34 }
 0x2f8   : > { %v1943_v20 = vmul.u32 %v1936_v46, %v1927_v56  ;;  %vm1945_vm8 = vc.u32 %v4926_v10, %v4921_v5  ;;  %v2000_v53 = vor.u32 8388608, %v1999_v29  ;;  %v1856_v8 = vsub.s32 32, %v4929_v26 }
 0x2f9   : > { %v1947_v6 = vsel %vm1945_vm8, %v1946_v0, %v4922_v4  ;;  %v2010_v22 = vshrl.u32 %v6025_v63, %v2007_v21  ;;  %v2013_v13 = vshrl.u32 %v6063_v44, %v2007_v21  ;;  %v2005_v62 = vshrl.u32 %v2004_v24, 5 }
 0x2fa   : > { %v1948_v12 = vadd.s32 %v1947_v6, %v1943_v20  ;;  %v2100_v9 = vshrl.u32 %v2099_v1, 23  ;;  %v1861_v42 = vadd.s32 127, %v1860_v49  ;;  %v2009_v60 = vshll.u32 %v6027_v59, %v2006_v47 }
 0x2fb   : > { %v2012_v39 = vshll.u32 %v6025_v63, %v2006_v47  ;;  %v2016_v34 = vshrl.u32 %v6037_v23, %v2007_v21  ;;  %v2015_v4 = vshll.u32 %v6063_v44, %v2006_v47  ;;  %v2018_v56 = vshll.u32 %v6037_v23, %v2006_v47 }
 0x2fc   : > { %v1949_v46 = vadd.s32 536870912, %v1948_v12  ;;  %v2019_v29 = vshrl.u32 %v6038_v36, %v2007_v21  ;;  %vm4962_vm9 = vcmp.le.f32.partialorder %v1576_v15, 0.7853982  ;;  %v2011_v24 = vor.u32 %v2010_v22, %v2009_v60 }
 0x2fd   : > { %v2014_v1 = vor.u32 %v2013_v13, %v2012_v39  ;;  %v2021_v49 = vshll.u32 %v6038_v36, %v2006_v47  ;;  %v2022_v20 = vshrl.u32 %v6042_v51, %v2007_v21  ;;  %v1754_v6 = vshrl.u32 %v4887_v19, %v1752_v2 }
 0x2fe   : > { %v4969_v37 = vshrl.u32 %v1949_v46, 30  ;;  %v2017_v45 = vor.u32 %v2016_v34, %v2015_v4  ;;  %v2020_v32 = vor.u32 %v2019_v29, %v2018_v56  ;;  %v1759_v43 = vor.u32 4788187, %v1758_v58 }
 0x2ff   : > { %v2023_v63 = vor.u32 %v2022_v20, %v2021_v49  ;;  %v2040_v14 = vshll.u32 %v2000_v53, 8  ;;  %v3513_v7 = vadd.s32 4294967169, %v2100_v9  ;;  %v1862_v15 = vshll.u32 %v1861_v42, 23 }
 0x300   : > { %v1951_v28 = vshll.u32 %v4969_v37, 30  ;;  %vm2024_vm10 = vcmp.lt.s32.totalorder %v2005_v62, 1  ;;  %vm2027_vm11 = vcmp.lt.s32.totalorder %v2005_v62, 4  ;;  %vm1682_vm12 = vcmp.lt.s32.totalorder %v4666_v40, 0 }
 0x301   : > { %v1857_v47 = vshll.u32 %v4904_v35, %v4929_v26  ;;  %v1858_v22 = vshrl.u32 %v1840_v48, %v1856_v8  ;;  %v2032_v19 = vsel %vm2024_vm10, %v2011_v24, %v2014_v1  ;;  %v2033_v2 = vsel %vm2027_vm11, %v2020_v32, 920167782 }
 0x302   : > { %v4976_v13 = vsub.s32 %v1948_v12, %v1951_v28  ;;  %v2008_v58 = vshrl.u32 %v6027_v59, %v2007_v21  ;;  %vm2026_vm15 = vcmp.lt.s32.totalorder %v2005_v62, 3  ;;  %v2029_v53 = vsel %vm2027_vm11, %v2017_v45, 2102212464 }
 0x303   : > { %vm2025_vm14 = vcmp.lt.s32.totalorder %v2005_v62, 2  ;;  %v2034_v9 = vsel %vm2026_vm15, %v2017_v45, %v2033_v2  ;;  %v2036_v42 = vsel %vm2024_vm10, %v2014_v1, %v2017_v45  ;;  %v2037_v60 = vsel %vm2027_vm11, %v2023_v63, 1326507024 }
 0x304   : > { %v1863_v39 = vor.u32 4788187, %v1862_v15  ;;  %v1954_v34 = vsub.s32 0, %v4976_v13  ;;  %v2028_v35 = vsel %vm2024_vm10, %v2008_v58, %v2011_v24  ;;  %v2035_v26 = vsel %vm2025_vm14, %v2032_v19, %v2034_v9 }
 0x305   : > { %v2030_v48 = vsel %vm2026_vm15, %v2014_v1, %v2029_v53  ;;  %v2038_v8 = vsel %vm2026_vm15, %v2020_v32, %v2037_v60  ;;  %v4983_v28 = vmul.u32.u64.low %v2040_v14, %v2035_v26  ;;  %v4984_v12 = vmul.u32.u64.high %v2040_v14, %v2035_v26, %v4983_v28 }
 0x306   : > { %v1664_v21 = vsel %vm4962_vm9, %v4660_v54, %v4937_v38  ;;  %v3506_v63 = vmin.u32 %v1954_v34, %v4976_v13  ;;  %v2039_v45 = vsel %vm2025_vm14, %v2036_v42, %v2038_v8  ;;  %v2106_v46 = vadd.s32 1, %v3513_v7 }
 0x307   : > { %v6068_v4 = vshll.u32 %v4835_v52, %v4897_v41  ;;  %v1859_v29 = vor.u32 %v1858_v22, %v1857_v47  ;;  %v4996_v32 = vmul.u32.u64.low %v2040_v14, %v2039_v45  ;;  %v4997_v24 = vmul.u32.u64.high %v2040_v14, %v2039_v45, %v4996_v32 }
 0x308   : > { %v1760_v1 = vand.u32 2147483647, %v1759_v43  ;;  %v1956_v49 = vclz %v3506_v63  ;;  %v2031_v20 = vsel %vm2025_vm14, %v2028_v35, %v2030_v48  ;;  %vm2107_vm6 = vcmp.gt.s32.totalorder %v2106_v46, 0 }
 0x309   : > { %v1755_v56 = vor.u32 %v1754_v6, %v6068_v4  ;;  %v1864_v15 = vand.u32 2147483647, %v1863_v39  ;;  %v2050_v38 = vadd.s32 1, %v4984_v12  ;;  %v6069_v19 = vand.u32 2147483647, %v4880_v50 }
 0x30a   : > { %v2108_v7 = vsel %vm2107_vm6, %v2106_v46, 0  ;;  %3751 = vcosq.f32 %v1664_v21  ;;  %v6070_v52 = vsub.s32 4, %v4819_v30  ;;  %v3507_v43 = vadd.s32 4294967294, %v1956_v49 }
 0x30b   : > { %v2103_v2 = vand.u32 8388607, %v6069_v19  ;;  %v2110_v6 = vand.u32 31, %v2108_v7  ;;  %v1762_v62 = vcvt.s32.f32 %v1755_v56  ;;  %v1866_v47 = vcvt.s32.f32 %v1859_v29 }
 0x30c   : > { %v5008_v41 = vsel %vm1682_vm12, %v6070_v52, %v4819_v30  ;;  %v2047_v22 = vmul.u32 %v2040_v14, %v2031_v20  ;;  %vm2049_vm5 = vc.u32 %v4997_v24, %v4983_v28  ;;  %3753 = vsinq.f32 %v1664_v21 }
 0x30d   : > { %vm3508_vm13 = vcmp.lt.s32.totalorder %v3507_v43, 0  ;;  %v2051_v58 = vsel %vm2049_vm5, %v2050_v38, %v4984_v12  ;;  %v2111_v53 = vsub.s32 32, %v2110_v6  ;;  %v1763_v9 = vmul.f32 %v1762_v62, %v1760_v1 }
 0x30e   : > { %v5013_v42 = vmul.f32 %v1866_v47, %v1864_v15  ;;  %v2052_v60 = vadd.s32 %v2051_v58, %v2047_v22  ;;  %v2104_v39 = vor.u32 8388608, %v2103_v2  ;;  %v5015_v30 = vsel %vm3508_vm13, 0, %v3507_v43 }
 0x30f   : > { %v5017_v34 = vshrl.u32 %v2108_v7, 5  ;;  %v2119_v35 = vshll.u32 %v6063_v44, %v2110_v6  ;;  %v5022_v14 = vadd.f32 %v4681_v55, %v4870_v18  ;;  %v6071_v48 = vmov 2475754826  }
 0x310   : > { %v2053_v26 = vadd.s32 536870912, %v2052_v60  ;;  %v2114_v8 = vshrl.u32 %v6071_v48, %v2111_v53  ;;  %v2117_v12 = vshrl.u32 %v6063_v44, %v2111_v53  ;;  %v2120_v21 = vshrl.u32 %v6037_v23, %v2111_v53 }
 0x311   : > { %v2113_v63 = vshll.u32 %v6027_v59, %v2110_v6  ;;  %v2116_v45 = vshll.u32 %v6071_v48, %v2110_v6  ;;  %v2122_v46 = vshll.u32 %v6037_v23, %v2110_v6  ;;  %v2123_v4 = vshrl.u32 %v6038_v36, %v2111_v53 }
 0x312   : > { %v1764_v56 = vxor.u32 2147483648, %v1763_v9  ;;  %v1868_v29 = vxor.u32 2147483648, %v5013_v42  ;;  %v5032_v55 = vshrl.u32 %v2053_v26, 30  ;;  %v2121_v18 = vor.u32 %v2120_v21, %v2119_v35 }
 0x313   : > { %v1964_v32 = vsub.s32 4294967266, %v5015_v30  ;;  %v2115_v1 = vor.u32 %v2114_v8, %v2113_v63  ;;  %v2118_v49 = vor.u32 %v2117_v12, %v2116_v45  ;;  %v2124_v20 = vor.u32 %v2123_v4, %v2122_v46 }
 0x314   : > { %v6072_v15 = vand.u32 2147483647, %v4666_v40  ;;  %v2055_v19 = vshll.u32 %v5032_v55, 30  ;;  %v2125_v2 = vshll.u32 %v6038_v36, %v2110_v6  ;;  %v2126_v7 = vshrl.u32 %v6042_v51, %v2111_v53  ;;  %v5044_v43 = vpop.eup %3751 }
 0x315   : > { %v2144_v52 = vshll.u32 %v2104_v39, 8  ;;  %vm1786_vm3 = vcmp.lt.s32.totalorder %v4679_v3, 0  ;;  %v1960_v62 = vsub.s32 32, %v5015_v30  ;;  %v2112_v47 = vshrl.u32 %v6027_v59, %v2111_v53 }
 0x316   : > { %vm5037_vm4 = vcmp.le.f32.partialorder %v6072_v15, 0.7853982  ;;  %vm2131_vm7 = vcmp.lt.s32.totalorder %v5017_v34, 4  ;;  %v2203_v22 = vand.u32 2139095040, %v5022_v14  ;;  %v5051_v58 = vsub.s32 %v2052_v60, %v2055_v19  ;;  %v5056_v39 = vpop.eup %3753 }
 0x317   : > { %v2127_v35 = vor.u32 %v2126_v7, %v2125_v2  ;;  %vm2128_vm8 = vcmp.lt.s32.totalorder %v5017_v34, 1  ;;  %v2133_v6 = vsel %vm2131_vm7, %v2121_v18, 2102212464  ;;  %v1965_v26 = vadd.s32 127, %v1964_v32 }
 0x318   : > { %vm2130_vm10 = vcmp.lt.s32.totalorder %v5017_v34, 3  ;;  %v2136_v8 = vsel %vm2128_vm8, %v2115_v1, %v2118_v49  ;;  %v2137_v53 = vsel %vm2131_vm7, %v2124_v20, 920167782  ;;  %v6075_v12 = vand.u32 2147483647, %v4679_v3 }
 0x319   : > { %v2058_v21 = vsub.s32 0, %v5051_v58  ;;  %vm2129_vm15 = vcmp.lt.s32.totalorder %v5017_v34, 2  ;;  %v2138_v63 = vsel %vm2130_vm10, %v2121_v18, %v2137_v53  ;;  %v2140_v45 = vsel %vm2128_vm8, %v2118_v49, %v2121_v18 }
 0x31a   : > { %vm5063_vm11 = vcmp.le.f32.partialorder %v6075_v12, 0.7853982  ;;  %v2132_v46 = vsel %vm2128_vm8, %v2112_v47, %v2115_v1  ;;  %v2134_v4 = vsel %vm2130_vm10, %v2118_v49, %v2133_v6  ;;  %v2139_v32 = vsel %vm2129_vm15, %v2136_v8, %v2138_v63 }
 0x31b   : > { %v2141_v15 = vsel %vm2131_vm7, %v2127_v35, 1326507024  ;;  %v3510_v19 = vmin.u32 %v2058_v21, %v5051_v58  ;;  %v5074_v7 = vmul.u32.u64.low %v2144_v52, %v2139_v32  ;;  %v5075_v12 = vmul.u32.u64.high %v2144_v52, %v2139_v32, %v5074_v7 }
 0x31c   : > { %v2142_v2 = vsel %vm2130_vm10, %v2124_v20, %v2141_v15  ;;  %v6078_v59 = vsel %vm4874_vm2, 0, %v4864_v25  ;;  %v1765_v18 = vsel %vm1682_vm12, %v1764_v56, %v1763_v9  ;;  %v2204_v49 = vshrl.u32 %v2203_v22, 23 }
 0x31d   : > { %v5081_v53 = vadd.s32 3, %v6078_v59  ;;  %v2143_v1 = vsel %vm2129_vm15, %v2140_v45, %v2142_v2  ;;  %v1944_v47 = vadd.s32 %v4921_v5, %v4926_v10  ;;  %v2060_v20 = vclz %v3510_v19 }
 0x31e   : > { %v5089_v35 = vmul.u32.u64.low %v2144_v52, %v2143_v1  ;;  %v5090_v6 = vmul.u32.u64.high %v2144_v52, %v2143_v1, %v5089_v35  ;;  %3755 = vcosq.f32 %v4894_v61  ;;  %v1769_v59 = vsel %vm5037_vm4, 0, %v5008_v41 }
 0x31f   : > { %v2135_v25 = vsel %vm2129_vm15, %v2132_v46, %v2134_v4  ;;  %v3517_v16 = vadd.s32 4294967169, %v2204_v49  ;;  %v1869_v9 = vsel %vm1786_vm3, %v1868_v29, %v5013_v42  ;;  %v1962_v56 = vshrl.u32 %v1944_v47, %v1960_v62 }
 0x320   : > { %v1966_v10 = vshll.u32 %v1965_v26, 23  ;;  %v2154_v5 = vadd.s32 1, %v5075_v12  ;;  %v1768_v22 = vsel %vm5037_vm4, %v4666_v40, %v1765_v18  ;;  %v6029_v8 = vand.u32 2147483647, %v5022_v14 }
 0x321   : > { %v2210_v21 = vadd.s32 1, %v3517_v16  ;;  %v1662_v41 = vsub.s32 4, %v4778_v33  ;;  %v1961_v34 = vshll.u32 %v4976_v13, %v5015_v30  ;;  %v3511_v63 = vadd.s32 4294967294, %v2060_v20 }
 0x322   : > { %v2151_v45 = vmul.u32 %v2144_v52, %v2135_v25  ;;  %vm2153_vm2 = vc.u32 %v5090_v6, %v5074_v7  ;;  %3757 = vsinq.f32 %v4894_v61  ;;  %v1872_v42 = vsel %vm5063_vm11, %v4679_v3, %v1869_v9 }
 0x323   : > { %v2155_v29 = vsel %vm2153_vm2, %v2154_v5, %v5075_v12  ;;  %vm2211_vm12 = vcmp.gt.s32.totalorder %v2210_v21, 0  ;;  %3759 = vcosq.f32 %v1768_v22  ;;  %v5115_v38 = vor.u32 %v1962_v56, %v1961_v34 }
 0x324   : > { %v5117_v62 = vor.u32 4788187, %v1966_v10  ;;  %v2156_v26 = vadd.s32 %v2155_v29, %v2151_v45  ;;  %3761 = vsinq.f32 %v1768_v22  ;;  %v5119_v13 = vadd.s32 3, %v1769_v59 }
 0x325   : > { %v2207_v30 = vand.u32 8388607, %v6029_v8  ;;  %v2212_v61 = vsel %vm2211_vm12, %v2210_v21, 0  ;;  %3763 = vcosq.f32 %v1872_v42  ;;  %vm3512_vm14 = vcmp.lt.s32.totalorder %v3511_v63, 0 }
 0x326   : > { %v2157_v52 = vadd.s32 536870912, %v2156_v26  ;;  %v1663_v46 = vsel %vm1578_vm1, %v1662_v41, %v4778_v33  ;;  %3765 = vsinq.f32 %v1872_v42  ;;  %v5128_v4 = vadd.s32 %v4983_v28, %v4997_v24 }
 0x327   : > { %v2214_v32 = vand.u32 31, %v2212_v61  ;;  %v5138_v49 = vsel %vm3512_vm14, 0, %v3511_v63  ;;  %v2208_v33 = vor.u32 8388608, %v2207_v30  ;;  %v1665_v28 = vsel %vm4962_vm9, 0, %v1663_v46 }
 0x328   : > { %v5133_v12 = vshrl.u32 %v2157_v52, 30  ;;  %v5136_v1 = vpop.eup %3755  ;;  %v5143_v24 = vadd.s32 %v5074_v7, %v5090_v6  ;;  %v6079_v35 = vmov 683565275   ;;  %v1870_v25 = vsub.s32 4, %v4889_v11 }
 0x329   : > { %v2215_v47 = vsub.s32 32, %v2214_v32  ;;  %v2217_v59 = vshll.u32 %v6079_v35, %v2214_v32  ;;  %v2220_v9 = vshll.u32 %v6071_v48, %v2214_v32  ;;  %v2068_v0 = vsub.s32 4294967266, %v5138_v49 }
 0x32a   : > { %v2159_v20 = vshll.u32 %v5133_v12, 30  ;;  %v2213_v7 = vshrl.u32 %v2212_v61, 5  ;;  %v2223_v6 = vshll.u32 %v6063_v44, %v2214_v32  ;;  %v2064_v21 = vsub.s32 32, %v5138_v49 }
 0x32b   : > { %v2218_v16 = vshrl.u32 %v6071_v48, %v2215_v47  ;;  %v2221_v56 = vshrl.u32 %v6063_v44, %v2215_v47  ;;  %v2224_v10 = vshrl.u32 %v6037_v23, %v2215_v47  ;;  %v5159_v63 = vshll.u32 %v2208_v33, 8 }
 0x32c   : > { %v5153_v5 = vsub.s32 %v2156_v26, %v2159_v20  ;;  %v5156_v22 = vpop.eup %3757  ;;  %v2226_v30 = vshll.u32 %v6037_v23, %v2214_v32  ;;  %v2227_v26 = vshrl.u32 %v6038_v36, %v2215_v47  ;;  %v2229_v52 = vshll.u32 %v6038_v36, %v2214_v32 }
 0x32d   : > { %v2219_v41 = vor.u32 %v2218_v16, %v2217_v59  ;;  %v2222_v34 = vor.u32 %v2221_v56, %v2220_v9  ;;  %v5161_v45 = vpop.eup %3759  ;;  %v2225_v29 = vor.u32 %v2224_v10, %v2223_v6  ;;  %v2230_v46 = vshrl.u32 %v6042_v51, %v2215_v47 }
 0x32e   : > { %v2162_v42 = vsub.s32 0, %v5153_v5  ;;  %v5166_v61 = vpop.eup %3761  ;;  %v1669_v20 = vadd.s32 3, %v1665_v28  ;;  %v1871_v33 = vsel %vm1786_vm3, %v1870_v25, %v4889_v11  ;;  %v2069_v16 = vadd.s32 127, %v2068_v0 }
 0x32f   : > { %v5173_v59 = vpop.eup %3763  ;;  %v2228_v56 = vor.u32 %v2227_v26, %v2226_v30  ;;  %vm2232_vm1 = vcmp.lt.s32.totalorder %v2213_v7, 1  ;;  %v2216_v6 = vshrl.u32 %v6079_v35, %v2215_v47  ;;  %v2231_v8 = vor.u32 %v2230_v46, %v2229_v52 }
 0x330   : > { %v3514_v9 = vmin.u32 %v2162_v42, %v5153_v5  ;;  %v3766_v10 = vpop.eup %3765  ;;  %vm2235_vm9 = vcmp.lt.s32.totalorder %v2213_v7, 4  ;;  %v2240_v32 = vsel %vm2232_vm1, %v2219_v41, %v2222_v34  ;;  %vm2234_vm6 = vcmp.lt.s32.totalorder %v2213_v7, 3 }
 0x331   : > { %v2237_v28 = vsel %vm2235_vm9, %v2225_v29, 2102212464  ;;  %v2241_v19 = vsel %vm2235_vm9, %v2228_v56, 920167782  ;;  %vm2233_vm5 = vcmp.lt.s32.totalorder %v2213_v7, 2  ;;  %v2244_v11 = vsel %vm2232_vm1, %v2222_v34, %v2225_v29 }
 0x332   : > { %v2164_v2 = vclz %v3514_v9  ;;  %v2242_v18 = vsel %vm2234_vm6, %v2225_v29, %v2241_v19  ;;  %v1670_v25 = vand.u32 3, %v1669_v20  ;;  %v2236_v0 = vsel %vm2232_vm1, %v2216_v6, %v2219_v41 }
 0x333   : > { %v2243_v42 = vsel %vm2233_vm5, %v2240_v32, %v2242_v18  ;;  %v2245_v30 = vsel %vm2235_vm9, %v2231_v8, 1326507024  ;;  %v2238_v26 = vsel %vm2234_vm6, %v2222_v34, %v2237_v28  ;;  %v2065_v46 = vshll.u32 %v5051_v58, %v5138_v49 }
 0x334   : > { %v3515_v15 = vadd.s32 4294967294, %v2164_v2  ;;  %v2246_v51 = vsel %vm2234_vm6, %v2228_v56, %v2245_v30  ;;  %v5179_v47 = vmul.u32.u64.low %v5159_v63, %v2243_v42  ;;  %v5180_v52 = vmul.u32.u64.high %v5159_v63, %v2243_v42, %v5179_v47 }
 0x335   : > { %v2247_v19 = vsel %vm2233_vm5, %v2244_v11, %v2246_v51  ;;  %v1873_v2 = vsel %vm5063_vm11, 0, %v1871_v33  ;;  %v2066_v41 = vshrl.u32 %v5128_v4, %v2064_v21  ;;  %vm1668_vm4 = vweird.f32 %v4660_v54 }
 0x336   : > { %vm3516_vm13 = vcmp.lt.s32.totalorder %v3515_v15, 0  ;;  %v5190_v8 = vmul.u32.u64.low %v5159_v63, %v2247_v19  ;;  %v5191_v34 = vmul.u32.u64.high %v5159_v63, %v2247_v19, %v5190_v8  ;;  %vm1876_vm3 = vweird.f32 %v4679_v3 }
 0x337   : > { %v2167_v18 = vsel %vm3516_vm13, 0, %v3515_v15  ;;  %v2070_v29 = vshll.u32 %v2069_v16, 23  ;;  %v2239_v58 = vsel %vm2233_vm5, %v2236_v0, %v2238_v26  ;;  %v1881_v49 = vxor.u32 2147483648, %v3766_v10 }
 0x338   : > { %v2172_v20 = vsub.s32 4294967266, %v2167_v18  ;;  %v2258_v51 = vadd.s32 1, %v5180_v52  ;;  %vm1672_vm7 = vcmp.eq.s32.totalorder %v1670_v25, 0  ;;  %vm1675_vm8 = vcmp.eq.s32.totalorder %v1670_v25, 2 }
 0x339   : > { %v1877_v60 = vadd.s32 3, %v1873_v2  ;;  %v6080_v15 = vxor.u32 2147483648, %v5056_v39  ;;  %v6081_v33 = vxor.u32 2147483648, %v5044_v43  ;;  %v1884_v16 = vxor.u32 2147483648, %v5173_v59 }
 0x33a   : > { %v2173_v4 = vadd.s32 127, %v2172_v20  ;;  %v2067_v56 = vor.u32 %v2066_v41, %v2065_v46  ;;  %v2255_v7 = vmul.u32 %v5159_v63, %v2239_v58  ;;  %vm2257_vm10 = vc.u32 %v5191_v34, %v5179_v47 }
 0x33b   : > { %v1674_v21 = vsel %vm1672_vm7, %v5044_v43, %v6080_v15  ;;  %v1677_v9 = vsel %vm1675_vm8, %v6081_v33, %v5056_v39  ;;  %v1878_v6 = vand.u32 3, %v1877_v60  ;;  %v2071_v32 = vor.u32 4788187, %v2070_v29 }
 0x33c   : > { %v2168_v28 = vsub.s32 32, %v2167_v18  ;;  %v2259_v11 = vsel %vm2257_vm10, %v2258_v51, %v5180_v52  ;;  %vm1671_vm11 = vcmp.lt.s32.totalorder %v1670_v25, 2  ;;  %v2174_v43 = vshll.u32 %v2173_v4, 23 }
 0x33d   : > { %v2260_v0 = vadd.s32 %v2259_v11, %v2255_v7  ;;  %v1678_v42 = vsel %vm1671_vm11, %v1674_v21, %v1677_v9  ;;  %vm1880_vm15 = vcmp.eq.s32.totalorder %v1878_v6, 0  ;;  %vm1883_vm2 = vcmp.eq.s32.totalorder %v1878_v6, 2 }
 0x33e   : > { %vm1879_vm12 = vcmp.lt.s32.totalorder %v1878_v6, 2  ;;  %v1882_v39 = vsel %vm1880_vm15, %v5173_v59, %v1881_v49  ;;  %v1885_v30 = vsel %vm1883_vm2, %v1884_v16, %v3766_v10  ;;  %v1566_v46 = vand.u32 3, %v5081_v53 }
 0x33f   : > { %v2261_v26 = vadd.s32 536870912, %v2260_v0  ;;  %v1886_v63 = vsel %vm1879_vm12, %v1882_v39, %v1885_v30  ;;  %v1569_v19 = vxor.u32 2147483648, %v5156_v22  ;;  %v2170_v2 = vshrl.u32 %v5143_v24, %v2168_v28 }
 0x340   : > { %v1679_v25 = vsel %vm1668_vm4, nan, %v1678_v42  ;;  %v1887_v52 = vsel %vm1876_vm3, nan, %v1886_v63  ;;  %v1572_v41 = vxor.u32 2147483648, %v5136_v1  ;;  %v2169_v8 = vshll.u32 %v5153_v5, %v2167_v18 }
 0x341   : > { %v5218_v59 = vshrl.u32 %v2261_v26, 30  ;;  %v3570_v10 = vpack.c.bf16 %v1887_v52, %v1679_v25  ;;  %vm1568_vm14 = vcmp.eq.s32.totalorder %v1566_v46, 0  ;;  %v2175_v29 = vor.u32 4788187, %v2174_v43 }
 0x342   : > { %v1570_v53 = vsel %vm1568_vm14, %v5136_v1, %v1569_v19  ;;  %vm1571_vm1 = vcmp.eq.s32.totalorder %v1566_v46, 2  ;;  %v1774_v24 = vand.u32 3, %v5119_v13  ;;  %v1777_v20 = vxor.u32 2147483648, %v5166_v61 }
 0x343   : > { %v2263_v54 = vshll.u32 %v5218_v59, 30  ;;  %3571 = vmatprep.subr.bf16.mxu0 %v3570_v10  ;;  %v1573_v3 = vsel %vm1571_vm1, %v1572_v41, %v5156_v22  ;;  %v1780_v58 = vxor.u32 2147483648, %v5161_v45  ;;  %v2072_v5 = vand.u32 2147483647, %v2071_v32 }
 0x344   : > { %v2171_v18 = vor.u32 %v2170_v2, %v2169_v8  ;;  %vm1567_vm9 = vcmp.lt.s32.totalorder %v1566_v46, 2  ;;  %vm1776_vm6 = vcmp.eq.s32.totalorder %v1774_v24, 0  ;;  %vm1779_vm5 = vcmp.eq.s32.totalorder %v1774_v24, 2 }
 0x345   : > { %v2264_v49 = vsub.s32 %v2260_v0, %v2263_v54  ;;  %v1574_v51 = vsel %vm1567_vm9, %v1570_v53, %v1573_v3  ;;  %v1778_v1 = vsel %vm1776_vm6, %v5161_v45, %v1777_v20  ;;  %v2074_v60 = vcvt.s32.f32 %v2067_v56 }
 0x346   : > { %v2176_v13 = vand.u32 2147483647, %v2175_v29  ;;  %vm1775_vm13 = vcmp.lt.s32.totalorder %v1774_v24, 2  ;;  %v1781_v4 = vsel %vm1779_vm5, %v1780_v58, %v5166_v61  ;;  %vm1564_vm4 = vweird.f32 %v4658_v17 }
 0x347   : > { %v2266_v15 = vsub.s32 0, %v2264_v49  ;;  %vm1772_vm3 = vweird.f32 %v4666_v40  ;;  %v1782_v22 = vsel %vm1775_vm13, %v1778_v1, %v1781_v4  ;;  %v6082_v21 = vand.u32 2147483647, %v5117_v62 }
 0x348   : > { %v6083_v33 = vcvt.s32.f32 %v5115_v38  ;;  %v2178_v16 = vcvt.s32.f32 %v2171_v18  ;;  %v1575_v7 = vsel %vm1564_vm4, nan, %v1574_v51  ;;  %v1783_v45 = vsel %vm1772_vm3, nan, %v1782_v22 }
 0x349   : > { %v2075_v6 = vmul.f32 %v2074_v60, %v2072_v5  ;;  %v3518_v56 = vmin.u32 %v2266_v15, %v2264_v49  ;;  %v3572_v32 = vpack.c.bf16 %v1783_v45, %v1575_v7  ;;  %vm1890_vm7 = vcmp.lt.s32.totalorder %v4815_v31, 0 }
 0x34a   : > { %v1971_v9 = vmul.f32 %v6083_v33, %v6082_v21  ;;  %v2179_v28 = vmul.f32 %v2178_v16, %v2176_v13  ;;  %vm1994_vm10 = vcmp.lt.s32.totalorder %v4830_v27, 0  ;;  %vm2098_vm11 = vcmp.lt.s32.totalorder %v4880_v50, 0 }
 0x34b   : > { %v2268_v11 = vclz %v3518_v56  ;;  %3573 = vmatpush1.bf16.msra.mxu0 %v3572_v32  ;;  %v2076_v0 = vxor.u32 2147483648, %v2075_v6  ;;  %v2256_v43 = vadd.s32 %v5179_v47, %v5191_v34  ;;  %v6084_v26 = vand.u32 2147483647, %v4815_v31 }
 0x34c   : > { %v1972_v61 = vxor.u32 2147483648, %v1971_v9  ;;  %v2180_v42 = vxor.u32 2147483648, %v2179_v28  ;;  %v6087_v46 = vand.u32 2147483647, %v4830_v27  ;;  %v6090_v8 = vand.u32 2147483647, %v4880_v50 }
 0x34d   : > { %v3519_v17 = vadd.s32 4294967294, %v2268_v11  ;;  %v2077_v62 = vsel %vm1994_vm10, %v2076_v0, %v2075_v6  ;;  %vm5245_vm15 = vcmp.le.f32.partialorder %v6084_v26, 0.7853982  ;;  %v2182_v54 = vsub.s32 4, %v5133_v12 }
 0x34e   : > { %v1973_v40 = vsel %vm1890_vm7, %v1972_v61, %v1971_v9  ;;  %vm5251_vm2 = vcmp.le.f32.partialorder %v6087_v46, 0.7853982  ;;  %v2181_v2 = vsel %vm2098_vm11, %v2180_v42, %v2179_v28  ;;  %vm5265_vm12 = vcmp.le.f32.partialorder %v6090_v8, 0.7853982 }
 0x34f   : > { %vm3520_vm8 = vcmp.lt.s32.totalorder %v3519_v17, 0  ;;  %v1976_v47 = vsel %vm5245_vm15, %v4815_v31, %v1973_v40  ;;  %v2080_v41 = vsel %vm5251_vm2, %v4830_v27, %v2077_v62  ;;  %v2184_v29 = vsel %vm5265_vm12, %v4880_v50, %v2181_v2 }
 0x350   : > { %v2271_v38 = vsel %vm3520_vm8, 0, %v3519_v17  ;;  %3767 = vcosq.f32 %v1976_v47  ;;  %v2078_v20 = vsub.s32 4, %v5032_v55  ;;  %v1974_v58 = vsub.s32 4, %v4969_v37 }
 0x351   : > { %v2272_v39 = vsub.s32 32, %v2271_v38  ;;  %v2276_v30 = vsub.s32 4294967266, %v2271_v38  ;;  %v2273_v34 = vshll.u32 %v2264_v49, %v2271_v38  ;;  %3769 = vcosq.f32 %v2080_v41 }
 0x352   : > { %3771 = vcosq.f32 %v2184_v29  ;;  %v2183_v49 = vsel %vm2098_vm11, %v2182_v54, %v5133_v12  ;;  %v2286_v1 = vsub.s32 4, %v5218_v59  ;;  %v2079_v60 = vsel %vm1994_vm10, %v2078_v20, %v5032_v55 }
 0x353   : > { %v2274_v25 = vshrl.u32 %v2256_v43, %v2272_v39  ;;  %v2277_v52 = vadd.s32 127, %v2276_v30  ;;  %3773 = vsinq.f32 %v2184_v29  ;;  %v1975_v13 = vsel %vm1890_vm7, %v1974_v58, %v4969_v37 }
 0x354   : > { %3775 = vsinq.f32 %v2080_v41  ;;  %v2185_v15 = vsel %vm5265_vm12, 0, %v2183_v49  ;;  %vm2202_vm14 = vcmp.lt.s32.totalorder %v5022_v14, 0  ;;  %v6093_v22 = vand.u32 2147483647, %v5022_v14 }
 0x355   : > { %v2275_v53 = vor.u32 %v2274_v25, %v2273_v34  ;;  %v2278_v24 = vshll.u32 %v2277_v52, 23  ;;  %3777 = vsinq.f32 %v1976_v47  ;;  %v2081_v55 = vsel %vm5251_vm2, 0, %v2079_v60  ;;  %v2304_v60 = vld [vmem:[%s6000_s5] sm:$0xff] }
 0x356   : > { %vm5290_vm1 = vcmp.le.f32.partialorder %v6093_v22, 0.7853982  ;;  %v2287_v33 = vsel %vm2202_vm14, %v2286_v1, %v5218_v59  ;;  %v1977_v37 = vsel %vm5245_vm15, 0, %v1975_v13  ;;  %v2189_v45 = vadd.s32 3, %v2185_v15 }
 0x357   : > { %v2279_v3 = vor.u32 4788187, %v2278_v24  ;;  %v2282_v18 = vcvt.s32.f32 %v2275_v53  ;;  %v2085_v56 = vadd.s32 3, %v2081_v55  ;;  %v2289_v32 = vsel %vm5290_vm1, 0, %v2287_v33  ;;  %v2320_v55 = vpop.permute.xlu1 %2319 }
 0x358   : > { %v1981_v11 = vadd.s32 3, %v1977_v37  ;;  %v2293_v0 = vadd.s32 3, %v2289_v32  ;;  %v2190_v17 = vand.u32 3, %v2189_v45  ;;  %vm2188_vm12 = vweird.f32 %v4880_v50  ;;  %v2307_v50 = vld [vmem:[%s6000_s5 + $0x18] sm:$0xff] }
 0x359   : > { %v2280_v5 = vand.u32 2147483647, %v2279_v3  ;;  %v2086_v42 = vand.u32 3, %v2085_v56 }
 0x35a   : > { %v3768_v9 = vpop.eup %3767  ;;  %v1982_v39 = vand.u32 3, %v1981_v11  ;;  %v2294_v63 = vand.u32 3, %v2293_v0  ;;  %vm2192_vm9 = vcmp.eq.s32.totalorder %v2190_v17, 0  ;;  %vm2195_vm6 = vcmp.eq.s32.totalorder %v2190_v17, 2 }
 0x35b   : > { %v2283_v51 = vmul.f32 %v2282_v18, %v2280_v5  ;;  %v3770_v7 = vpop.eup %3769  ;;  %v1988_v26 = vxor.u32 2147483648, %v3768_v9  ;;  %vm2088_vm5 = vcmp.eq.s32.totalorder %v2086_v42, 0  ;;  %vm2091_vm13 = vcmp.eq.s32.totalorder %v2086_v42, 2 }
 0x35c   : > { %v3772_v6 = vpop.eup %3771  ;;  %v2092_v43 = vxor.u32 2147483648, %v3770_v7  ;;  %vm1984_vm4 = vcmp.eq.s32.totalorder %v1982_v39, 0  ;;  %vm1987_vm3 = vcmp.eq.s32.totalorder %v1982_v39, 2  ;;  %vm2191_vm7 = vcmp.lt.s32.totalorder %v2190_v17, 2 }
 0x35d   : > { %v2284_v4 = vxor.u32 2147483648, %v2283_v51  ;;  %v3774_v28 = vpop.eup %3773  ;;  %v2196_v38 = vxor.u32 2147483648, %v3772_v6  ;;  %vm2087_vm8 = vcmp.lt.s32.totalorder %v2086_v42, 2  ;;  %vm2299_vm10 = vcmp.eq.s32.totalorder %v2294_v63, 2 }
 0x35e   : > { %v3776_v59 = vpop.eup %3775  ;;  %v2193_v40 = vxor.u32 2147483648, %v3774_v28  ;;  %vm2296_vm11 = vcmp.eq.s32.totalorder %v2294_v63, 0  ;;  %vm1983_vm15 = vcmp.lt.s32.totalorder %v1982_v39, 2  ;;  %vm2295_vm2 = vcmp.lt.s32.totalorder %v2294_v63, 2 }
 0x35f   : > { %v2285_v21 = vsel %vm2202_vm14, %v2284_v4, %v2283_v51  ;;  %v3778_v61 = vpop.eup %3777  ;;  %v2089_v62 = vxor.u32 2147483648, %v3776_v59  ;;  %v2197_v19 = vsel %vm2195_vm6, %v2196_v38, %v3774_v28  ;;  %v2093_v34 = vsel %vm2091_vm13, %v2092_v43, %v3776_v59 }
 0x360   : > { %v2288_v16 = vsel %vm5290_vm1, %v5022_v14, %v2285_v21  ;;  %v1985_v30 = vxor.u32 2147483648, %v3778_v61  ;;  %v2194_v46 = vsel %vm2192_vm9, %v3772_v6, %v2193_v40  ;;  %v1989_v8 = vsel %vm1987_vm3, %v1988_v26, %v3778_v61 }
 0x361   : > { %3779 = vcosq.f32 %v2288_v16  ;;  %v2090_v47 = vsel %vm2088_vm5, %v3770_v7, %v2089_v62  ;;  %v2198_v29 = vsel %vm2191_vm7, %v2194_v46, %v2197_v19  ;;  %vm2084_vm14 = vweird.f32 %v4830_v27  ;;  %v2305_v27 = vld [vmem:[%s6000_s5 + $0x8] sm:$0xff] }
 0x362   : > { %3781 = vsinq.f32 %v2288_v16  ;;  %v1986_v41 = vsel %vm1984_vm4, %v3768_v9, %v1985_v30  ;;  %v2094_v53 = vsel %vm2087_vm8, %v2090_v47, %v2093_v34  ;;  %vm2292_vm1 = vweird.f32 %v5022_v14  ;;  %v2315_v14 = vpop.permute.xlu0 %2314 }
 0x363   : > { %v1990_v3 = vsel %vm1983_vm15, %v1986_v41, %v1989_v8  ;;  %v2199_v58 = vsel %vm2188_vm12, nan, %v2198_v29  ;;  %v2095_v5 = vsel %vm2084_vm14, nan, %v2094_v53  ;;  %vm1980_vm9 = vweird.f32 %v4815_v31  ;;  %v2306_v31 = vld [vmem:[%s6000_s5 + $0x10] sm:$0xff] }
 0x364   : > { %v1991_v51 = vsel %vm1980_vm9, nan, %v1990_v3 }
 0x365   : > { %v3576_v1 = vpack.c.bf16 %v2199_v58, %v1991_v51 }
 0x36b   : > { %v3780_v2 = vpop.eup %3779 }
 0x36c   : > { %v3782_v25 = vpop.eup %3781  ;;  %v2300_v52 = vxor.u32 2147483648, %v3780_v2 }
 0x36d   : > { %v2297_v10 = vxor.u32 2147483648, %v3782_v25 }
 0x36e   : > { %v2301_v24 = vsel %vm2299_vm10, %v2300_v52, %v3782_v25 }
 0x36f   : > { %v2298_v54 = vsel %vm2296_vm11, %v3780_v2, %v2297_v10 }
 0x370   : > { %v2302_v20 = vsel %vm2295_vm2, %v2298_v54, %v2301_v24 }
 0x371   : > { %v2303_v18 = vsel %vm2292_vm1, nan, %v2302_v20 }
 0x372   : > { %v3574_v49 = vpack.c.bf16 %v2303_v18, %v2095_v5 }
 0x374   : > { %3575 = vmatprep.subr.bf16.mxu0 %v3574_v49  ;;  %v6096_v49 = vmov 1326507024  }
 0x375   : > { %3577 = vmatpush1.bf16.msra.mxu0 %v3576_v1 }
 0x378   : > { %3521 = vmatmul.mubr.msk.f32.vlgmr.msra.gmra.mrb[4].mxu0 %vm1370_vm0, %v2304_v60 }
 0x379   : > { %2414 = vmatprep.mubr.f32.mxu0 %v6062_v57 }
 0x37c   : > { %3522 = vmatmul.mubr.msk.f32.gmra.mrb[6].mxu0 %vm1370_vm0, %v2305_v27 }
 0x37d   : > { %2420 = vmatprep.mubr.f32.mxu0 %v6062_v57 }
 0x380   : > { %3523 = vmatmul.mubr.msk.f32.gmra.mrb[8].mxu0 %vm1370_vm0, %v2306_v31 }
 0x381   : > { %2426 = vmatprep.mubr.f32.mxu0 %v6062_v57 }
 0x384   : > { %3524 = vmatmul.mubr.msk.f32.gmra.mrb[10].mxu0 %vm1370_vm0, %v2307_v50 }
 0x44b   : > { %v2410_v13 = vpop.f32.mrb[4].mxu0 }
 0x44c   : > { %v5327_v4 = vadd.f32 %v2410_v13, %v2315_v14  ;;  %v2412_v15 = vpop.f32.mrb[5].mxu0 }
 0x44d   : > { %v5329_v22 = vadd.f32 %v2412_v15, %v2315_v14 }
 0x44e   : > { %v2433_v12 = vand.u32 2147483647, %v5327_v4  ;;  %v2436_v21 = vand.u32 2139095040, %v5327_v4 }
 0x44f   : > { %v2537_v57 = vand.u32 2147483647, %v5329_v22  ;;  %v2540_v33 = vand.u32 2139095040, %v5329_v22  ;;  %v2416_v9 = vpop.f32.mrb[6].mxu0 }
 0x450   : > { %v2437_v37 = vshrl.u32 %v2436_v21, 23  ;;  %v5335_v16 = vadd.f32 %v2416_v9, %v2320_v55  ;;  %v2418_v7 = vpop.f32.mrb[7].mxu0  ;;  %v2440_v45 = vand.u32 8388607, %v2433_v12 }
 0x451   : > { %v2541_v6 = vshrl.u32 %v2540_v33, 23  ;;  %v2544_v56 = vand.u32 8388607, %v2537_v57  ;;  %v5348_v46 = vadd.f32 %v2418_v7, %v2320_v55 }
 0x452   : > { %v3525_v32 = vadd.s32 4294967169, %v2437_v37  ;;  %v2644_v11 = vand.u32 2139095040, %v5335_v16  ;;  %v2441_v0 = vor.u32 8388608, %v2440_v45  ;;  %v6034_v25 = vand.u32 2147483647, %v5335_v16 }
 0x453   : > { %v3529_v28 = vadd.s32 4294967169, %v2541_v6  ;;  %v5342_v59 = vpop.f32.mrb[8].mxu0  ;;  %v2545_v17 = vor.u32 8388608, %v2544_v56 }
 0x454   : > { %v2443_v61 = vadd.s32 1, %v3525_v32  ;;  %v2645_v40 = vshrl.u32 %v2644_v11, 23  ;;  %v5344_v38 = vpop.f32.mrb[9].mxu0  ;;  %v5352_v2 = vshll.u32 %v2441_v0, 8 }
 0x455   : > { %v2547_v42 = vadd.s32 1, %v3529_v28  ;;  %v5356_v34 = vshll.u32 %v2545_v17, 8 }
 0x456   : > { %vm2444_vm6 = vcmp.gt.s32.totalorder %v2443_v61, 0  ;;  %v3533_v43 = vadd.s32 4294967169, %v2645_v40 }
 0x457   : > { %v2445_v62 = vsel %vm2444_vm6, %v2443_v61, 0  ;;  %vm2548_vm5 = vcmp.gt.s32.totalorder %v2547_v42, 0  ;;  %v5346_v39 = vpop.f32.mrb[10].mxu0 }
 0x458   : > { %v2446_v30 = vshrl.u32 %v2445_v62, 5  ;;  %v2447_v26 = vand.u32 31, %v2445_v62  ;;  %v2549_v63 = vsel %vm2548_vm5, %v2547_v42, 0  ;;  %v5350_v19 = vpop.f32.mrb[11].mxu0  ;;  %v5360_v10 = vadd.s32 1, %v3533_v43 }
 0x459   : > { %v5354_v47 = vshrl.u32 %v2549_v63, 5  ;;  %v2551_v8 = vand.u32 31, %v2549_v63 }
 0x45a   : > { %v2448_v52 = vsub.s32 32, %v2447_v26  ;;  %v2450_v41 = vshll.u32 %v6079_v35, %v2447_v26  ;;  %v2453_v29 = vshll.u32 %v6071_v48, %v2447_v26  ;;  %v2456_v53 = vshll.u32 %v6063_v44, %v2447_v26 }
 0x45b   : > { %v2459_v24 = vshll.u32 %v6037_v23, %v2447_v26  ;;  %v2462_v54 = vshll.u32 %v6038_v36, %v2447_v26  ;;  %vm2465_vm13 = vcmp.lt.s32.totalorder %v2446_v30, 1  ;;  %vm2466_vm4 = vcmp.lt.s32.totalorder %v2446_v30, 2 }
 0x45c   : > { %v2451_v3 = vshrl.u32 %v6071_v48, %v2448_v52  ;;  %v2454_v20 = vshrl.u32 %v6063_v44, %v2448_v52  ;;  %v2457_v58 = vshrl.u32 %v6037_v23, %v2448_v52  ;;  %v2449_v5 = vshrl.u32 %v6079_v35, %v2448_v52 }
 0x45d   : > { %v2460_v18 = vshrl.u32 %v6038_v36, %v2448_v52  ;;  %v2463_v51 = vshrl.u32 %v6096_v49, %v2448_v52  ;;  %v2552_v31 = vsub.s32 32, %v2551_v8  ;;  %vm2467_vm3 = vcmp.lt.s32.totalorder %v2446_v30, 3 }
 0x45e   : > { %v2452_v1 = vor.u32 %v2451_v3, %v2450_v41  ;;  %v2455_v60 = vor.u32 %v2454_v20, %v2453_v29  ;;  %v2458_v27 = vor.u32 %v2457_v58, %v2456_v53  ;;  %vm2468_vm7 = vcmp.lt.s32.totalorder %v2446_v30, 4 }
 0x45f   : > { %v2461_v50 = vor.u32 %v2460_v18, %v2459_v24  ;;  %v2464_v14 = vor.u32 %v2463_v51, %v2462_v54  ;;  %v2554_v7 = vshll.u32 %v6079_v35, %v2551_v8  ;;  %v2555_v56 = vshrl.u32 %v6071_v48, %v2552_v31 }
 0x460   : > { %v2469_v13 = vsel %vm2465_vm13, %v2449_v5, %v2452_v1  ;;  %v2470_v15 = vsel %vm2468_vm7, %v2458_v27, 2102212464  ;;  %v2473_v21 = vsel %vm2465_vm13, %v2452_v1, %v2455_v60  ;;  %v2477_v55 = vsel %vm2465_vm13, %v2455_v60, %v2458_v27 }
 0x461   : > { %v2471_v33 = vsel %vm2467_vm3, %v2455_v60, %v2470_v15  ;;  %v2474_v9 = vsel %vm2468_vm7, %v2461_v50, 920167782  ;;  %v2478_v37 = vsel %vm2468_vm7, %v2464_v14, 1326507024  ;;  %v2557_v32 = vshll.u32 %v6071_v48, %v2551_v8 }
 0x462   : > { %v2475_v45 = vsel %vm2467_vm3, %v2458_v27, %v2474_v9  ;;  %v2479_v6 = vsel %vm2467_vm3, %v2461_v50, %v2478_v37  ;;  %v2472_v28 = vsel %vm2466_vm4, %v2469_v13, %v2471_v33  ;;  %v2558_v0 = vshrl.u32 %v6063_v44, %v2552_v31 }
 0x463   : > { %v2476_v11 = vsel %vm2466_vm4, %v2473_v21, %v2475_v45  ;;  %v2480_v61 = vsel %vm2466_vm4, %v2477_v55, %v2479_v6  ;;  %v2556_v43 = vor.u32 %v2555_v56, %v2554_v7  ;;  %v2560_v63 = vshll.u32 %v6063_v44, %v2551_v8 }
 0x464   : > { %v5383_v17 = vmul.u32.u64.low %v5352_v2, %v2480_v61  ;;  %v5384_v42 = vmul.u32.u64.high %v5352_v2, %v2480_v61, %v5383_v17  ;;  %v5387_v40 = vmul.u32.u64.low %v5352_v2, %v2476_v11  ;;  %v5388_v62 = vmul.u32.u64.high %v5352_v2, %v2476_v11, %v5387_v40 }
 0x465   : > { %v2559_v26 = vor.u32 %v2558_v0, %v2557_v32  ;;  %v2561_v52 = vshrl.u32 %v6037_v23, %v2552_v31  ;;  %v2553_v30 = vshrl.u32 %v6079_v35, %v2552_v31  ;;  %v2563_v41 = vshll.u32 %v6037_v23, %v2551_v8 }
 0x466   : > { %v2564_v29 = vshrl.u32 %v6038_v36, %v2552_v31  ;;  %v2567_v53 = vshrl.u32 %v6096_v49, %v2552_v31  ;;  %v2488_v24 = vmul.u32 %v5352_v2, %v2472_v28  ;;  %v2566_v3 = vshll.u32 %v6038_v36, %v2551_v8 }
 0x467   : > { %v2562_v54 = vor.u32 %v2561_v52, %v2560_v63  ;;  %vm2569_vm8 = vcmp.lt.s32.totalorder %v5354_v47, 1  ;;  %vm2490_vm10 = vc.u32 %v5384_v42, %v5387_v40  ;;  %v2491_v20 = vadd.s32 1, %v5388_v62 }
 0x468   : > { %v2565_v58 = vor.u32 %v2564_v29, %v2563_v41  ;;  %vm2570_vm11 = vcmp.lt.s32.totalorder %v5354_v47, 2  ;;  %v2568_v5 = vor.u32 %v2567_v53, %v2566_v3  ;;  %vm2571_vm15 = vcmp.lt.s32.totalorder %v5354_v47, 3 }
 0x469   : > { %vm2572_vm2 = vcmp.lt.s32.totalorder %v5354_v47, 4  ;;  %v2577_v18 = vsel %vm2569_vm8, %v2556_v43, %v2559_v26  ;;  %v2492_v2 = vsel %vm2490_vm10, %v2491_v20, %v5388_v62  ;;  %v2581_v1 = vsel %vm2569_vm8, %v2559_v26, %v2562_v54 }
 0x46a   : > { %v2574_v51 = vsel %vm2572_vm2, %v2562_v54, 2102212464  ;;  %v2578_v8 = vsel %vm2572_vm2, %v2565_v58, 920167782  ;;  %v2493_v60 = vadd.s32 %v2492_v2, %v2488_v24  ;;  %v2573_v27 = vsel %vm2569_vm8, %v2553_v30, %v2556_v43 }
 0x46b   : > { %v2579_v31 = vsel %vm2571_vm15, %v2562_v54, %v2578_v8  ;;  %v2582_v50 = vsel %vm2572_vm2, %v2568_v5, 1326507024  ;;  %v2575_v14 = vsel %vm2571_vm15, %v2559_v26, %v2574_v51  ;;  %vm2652_vm12 = vcmp.gt.s32.totalorder %v5360_v10, 0 }
 0x46c   : > { %v2580_v13 = vsel %vm2570_vm11, %v2577_v18, %v2579_v31  ;;  %v2583_v15 = vsel %vm2571_vm15, %v2565_v58, %v2582_v50  ;;  %v2494_v21 = vadd.s32 536870912, %v2493_v60  ;;  %v2648_v45 = vand.u32 8388607, %v6034_v25 }
 0x46d   : > { %v2584_v55 = vsel %vm2570_vm11, %v2581_v1, %v2583_v15  ;;  %v5413_v33 = vmul.u32.u64.low %v5356_v34, %v2580_v13  ;;  %v5414_v9 = vmul.u32.u64.high %v5356_v34, %v2580_v13, %v5413_v33  ;;  %v2653_v6 = vsel %vm2652_vm12, %v5360_v10, 0 }
 0x46e   : > { %v5418_v37 = vmul.u32.u64.low %v5356_v34, %v2584_v55  ;;  %v5419_v7 = vmul.u32.u64.high %v5356_v34, %v2584_v55, %v5418_v37  ;;  %v5424_v56 = vshrl.u32 %v2494_v21, 30  ;;  %v2576_v32 = vsel %vm2570_vm11, %v2573_v27, %v2575_v14 }
 0x46f   : > { %v2655_v28 = vand.u32 31, %v2653_v6  ;;  %v2748_v11 = vand.u32 2139095040, %v5348_v46  ;;  %v2595_v0 = vadd.s32 1, %v5414_v9  ;;  %v2592_v62 = vmul.u32 %v5356_v34, %v2576_v32 }
 0x470   : > { %v2496_v61 = vshll.u32 %v5424_v56, 30  ;;  %vm2594_vm14 = vc.u32 %v5419_v7, %v5413_v33  ;;  %v2649_v43 = vor.u32 8388608, %v2648_v45  ;;  %v2654_v53 = vshrl.u32 %v2653_v6, 5 }
 0x471   : > { %v2656_v17 = vsub.s32 32, %v2655_v28  ;;  %v2596_v26 = vsel %vm2594_vm14, %v2595_v0, %v5414_v9  ;;  %v2749_v47 = vshrl.u32 %v2748_v11, 23  ;;  %v2658_v52 = vshll.u32 %v6079_v35, %v2655_v28 }
 0x472   : > { %v5434_v10 = vsub.s32 %v2493_v60, %v2496_v61  ;;  %v2597_v63 = vadd.s32 %v2596_v26, %v2592_v62  ;;  %v2661_v34 = vshll.u32 %v6071_v48, %v2655_v28  ;;  %v2664_v20 = vshll.u32 %v6063_v44, %v2655_v28 }
 0x473   : > { %v2659_v30 = vshrl.u32 %v6071_v48, %v2656_v17  ;;  %v2662_v41 = vshrl.u32 %v6063_v44, %v2656_v17  ;;  %v2665_v24 = vshrl.u32 %v6037_v23, %v2656_v17  ;;  %v2689_v58 = vshll.u32 %v2649_v43, 8 }
 0x474   : > { %v2499_v29 = vsub.s32 0, %v5434_v10  ;;  %v2598_v54 = vadd.s32 536870912, %v2597_v63  ;;  %v2667_v2 = vshll.u32 %v6037_v23, %v2655_v28  ;;  %v2668_v51 = vshrl.u32 %v6038_v36, %v2656_v17 }
 0x475   : > { %v2660_v3 = vor.u32 %v2659_v30, %v2658_v52  ;;  %v2663_v18 = vor.u32 %v2662_v41, %v2661_v34  ;;  %v2666_v1 = vor.u32 %v2665_v24, %v2664_v20  ;;  %v2670_v60 = vshll.u32 %v6038_v36, %v2655_v28 }
 0x476   : > { %v3526_v5 = vmin.u32 %v2499_v29, %v5434_v10  ;;  %v5447_v8 = vshrl.u32 %v2598_v54, 30  ;;  %v2671_v27 = vshrl.u32 %v6096_v49, %v2656_v17  ;;  %v2669_v50 = vor.u32 %v2668_v51, %v2667_v2 }
 0x477   : > { %vm2673_vm1 = vcmp.lt.s32.totalorder %v2654_v53, 1  ;;  %v3537_v14 = vadd.s32 4294967169, %v2749_v47  ;;  %vm2674_vm9 = vcmp.lt.s32.totalorder %v2654_v53, 2  ;;  %vm2676_vm6 = vcmp.lt.s32.totalorder %v2654_v53, 4 }
 0x478   : > { %v2501_v31 = vclz %v3526_v5  ;;  %v2600_v13 = vshll.u32 %v5447_v8, 30  ;;  %v2672_v15 = vor.u32 %v2671_v27, %v2670_v60  ;;  %vm2675_vm5 = vcmp.lt.s32.totalorder %v2654_v53, 3 }
 0x479   : > { %v2681_v55 = vsel %vm2673_vm1, %v2660_v3, %v2663_v18  ;;  %v2682_v9 = vsel %vm2676_vm6, %v2669_v50, 920167782  ;;  %v2678_v45 = vsel %vm2676_vm6, %v2666_v1, 2102212464  ;;  %v2685_v32 = vsel %vm2673_vm1, %v2663_v18, %v2666_v1 }
 0x47a   : > { %v3527_v21 = vadd.s32 4294967294, %v2501_v31  ;;  %v5453_v37 = vsub.s32 %v2597_v63, %v2600_v13  ;;  %v2683_v6 = vsel %vm2675_vm5, %v2666_v1, %v2682_v9  ;;  %v2657_v28 = vshrl.u32 %v6079_v35, %v2656_v17 }
 0x47b   : > { %v2684_v11 = vsel %vm2674_vm9, %v2681_v55, %v2683_v6  ;;  %v2686_v61 = vsel %vm2676_vm6, %v2672_v15, 1326507024  ;;  %v2755_v26 = vadd.s32 1, %v3537_v14  ;;  %v2679_v52 = vsel %vm2675_vm5, %v2663_v18, %v2678_v45  ;;  %v2325_v55 = vpop.permute.xlu0 %2324 }
 0x47c   : > { %vm3528_vm13 = vcmp.lt.s32.totalorder %v3527_v21, 0  ;;  %v2603_v62 = vsub.s32 0, %v5453_v37  ;;  %v2687_v43 = vsel %vm2675_vm5, %v2669_v50, %v2686_v61  ;;  %v2677_v63 = vsel %vm2673_vm1, %v2657_v28, %v2660_v3 }
 0x47d   : > { %v2504_v0 = vsel %vm3528_vm13, 0, %v3527_v21  ;;  %v2688_v30 = vsel %vm2674_vm9, %v2685_v32, %v2687_v43  ;;  %vm2756_vm4 = vcmp.gt.s32.totalorder %v2755_v26, 0  ;;  %v6033_v20 = vand.u32 2147483647, %v5348_v46 }
 0x47e   : > { %v2509_v47 = vsub.s32 4294967266, %v2504_v0  ;;  %v3530_v41 = vmin.u32 %v2603_v62, %v5453_v37  ;;  %v5465_v29 = vmul.u32.u64.low %v2689_v58, %v2688_v30  ;;  %v5466_v17 = vmul.u32.u64.high %v2689_v58, %v2688_v30, %v5465_v29 }
 0x47f   : > { %v5468_v34 = vmul.u32.u64.low %v2689_v58, %v2684_v11  ;;  %v5469_v24 = vmul.u32.u64.high %v2689_v58, %v2684_v11, %v5468_v34  ;;  %v2757_v5 = vsel %vm2756_vm4, %v2755_v26, 0  ;;  %v2505_v2 = vsub.s32 32, %v2504_v0 }
 0x480   : > { %v2605_v54 = vclz %v3530_v41  ;;  %v2510_v3 = vadd.s32 127, %v2509_v47  ;;  %v2680_v18 = vsel %vm2674_vm9, %v2677_v63, %v2679_v52  ;;  %v2759_v51 = vand.u32 31, %v2757_v5 }
 0x481   : > { %vm2698_vm3 = vc.u32 %v5466_v17, %v5468_v34  ;;  %v2489_v60 = vadd.s32 %v5387_v40, %v5384_v42  ;;  %v2699_v27 = vadd.s32 1, %v5469_v24  ;;  %v2696_v31 = vmul.u32 %v2689_v58, %v2680_v18 }
 0x482   : > { %v3531_v1 = vadd.s32 4294967294, %v2605_v54  ;;  %v2752_v50 = vand.u32 8388607, %v6033_v20  ;;  %v2511_v13 = vshll.u32 %v2510_v3, 23  ;;  %v2760_v15 = vsub.s32 32, %v2759_v51 }
 0x483   : > { %v2507_v14 = vshrl.u32 %v2489_v60, %v2505_v2  ;;  %v2700_v53 = vsel %vm2698_vm3, %v2699_v27, %v5469_v24  ;;  %v2506_v9 = vshll.u32 %v5434_v10, %v2504_v0  ;;  %v5484_v42 = vadd.f32 %v5342_v59, %v2325_v55 }
 0x484   : > { %vm3532_vm7 = vcmp.lt.s32.totalorder %v3531_v1, 0  ;;  %v2701_v21 = vadd.s32 %v2700_v53, %v2696_v31  ;;  %v2753_v32 = vor.u32 8388608, %v2752_v50  ;;  %v2512_v58 = vor.u32 4788187, %v2511_v13 }
 0x485   : > { %v2608_v45 = vsel %vm3532_vm7, 0, %v3531_v1  ;;  %v2508_v40 = vor.u32 %v2507_v14, %v2506_v9  ;;  %v2763_v28 = vshrl.u32 %v6071_v48, %v2760_v15  ;;  %v2766_v11 = vshrl.u32 %v6063_v44, %v2760_v15 }
 0x486   : > { %v2702_v6 = vadd.s32 536870912, %v2701_v21  ;;  %v2613_v61 = vsub.s32 4294967266, %v2608_v45  ;;  %v2769_v43 = vshrl.u32 %v6037_v23, %v2760_v15  ;;  %v2772_v26 = vshrl.u32 %v6038_v36, %v2760_v15 }
 0x487   : > { %v2762_v10 = vshll.u32 %v6079_v35, %v2759_v51  ;;  %v2765_v0 = vshll.u32 %v6071_v48, %v2759_v51  ;;  %v2771_v59 = vshll.u32 %v6037_v23, %v2759_v51  ;;  %v2775_v47 = vshrl.u32 %v6096_v49, %v2760_v15 }
 0x488   : > { %v5488_v62 = vshrl.u32 %v2702_v6, 30  ;;  %v2758_v52 = vshrl.u32 %v2757_v5, 5  ;;  %v2768_v30 = vshll.u32 %v6063_v44, %v2759_v51  ;;  %v5499_v41 = vadd.f32 %v5344_v38, %v2325_v55 }
 0x489   : > { %v2764_v29 = vor.u32 %v2763_v28, %v2762_v10  ;;  %v2767_v24 = vor.u32 %v2766_v11, %v2765_v0  ;;  %v2773_v54 = vor.u32 %v2772_v26, %v2771_v59  ;;  %v2774_v2 = vshll.u32 %v6038_v36, %v2759_v51 }
 0x48a   : > { %v2704_v63 = vshll.u32 %v5488_v62, 30  ;;  %v2593_v3 = vadd.s32 %v5413_v33, %v5419_v7  ;;  %v2614_v18 = vadd.s32 127, %v2613_v61  ;;  %v2770_v60 = vor.u32 %v2769_v43, %v2768_v30 }
 0x48b   : > { %v2513_v27 = vand.u32 2147483647, %v2512_v58  ;;  %v2515_v31 = vcvt.s32.f32 %v2508_v40  ;;  %v2776_v5 = vor.u32 %v2775_v47, %v2774_v2  ;;  %v2793_v50 = vshll.u32 %v2753_v32, 8 }
 0x48c   : > { %v5504_v1 = vsub.s32 %v2701_v21, %v2704_v63  ;;  %v2609_v14 = vsub.s32 32, %v2608_v45  ;;  %vm2777_vm8 = vcmp.lt.s32.totalorder %v2758_v52, 1  ;;  %vm2780_vm10 = vcmp.lt.s32.totalorder %v2758_v52, 4 }
 0x48d   : > { %v2761_v13 = vshrl.u32 %v6079_v35, %v2760_v15  ;;  %vm2779_vm11 = vcmp.lt.s32.totalorder %v2758_v52, 3  ;;  %v2785_v51 = vsel %vm2777_vm8, %v2764_v29, %v2767_v24  ;;  %v2786_v53 = vsel %vm2780_vm10, %v2773_v54, 920167782 }
 0x48e   : > { %v2707_v38 = vsub.s32 0, %v5504_v1  ;;  %v2615_v33 = vshll.u32 %v2614_v18, 23  ;;  %vm2778_vm15 = vcmp.lt.s32.totalorder %v2758_v52, 2  ;;  %v2782_v7 = vsel %vm2780_vm10, %v2770_v60, 2102212464 }
 0x48f   : > { %v2787_v21 = vsel %vm2779_vm11, %v2770_v60, %v2786_v53  ;;  %v2789_v6 = vsel %vm2777_vm8, %v2767_v24, %v2770_v60  ;;  %v2790_v32 = vsel %vm2780_vm10, %v2776_v5, 1326507024  ;;  %v2610_v40 = vshll.u32 %v5453_v37, %v2608_v45 }
 0x490   : > { %v3534_v55 = vmin.u32 %v2707_v38, %v5504_v1  ;;  %v2788_v9 = vsel %vm2778_vm15, %v2785_v51, %v2787_v21  ;;  %v2611_v58 = vshrl.u32 %v2593_v3, %v2609_v14  ;;  %v2781_v15 = vsel %vm2777_vm8, %v2761_v13, %v2764_v29  ;;  %v5539_v21 = vpop.permute.xlu1 %2329 }
 0x491   : > { %v2791_v28 = vsel %vm2779_vm11, %v2773_v54, %v2790_v32  ;;  %v2783_v11 = vsel %vm2779_vm11, %v2767_v24, %v2782_v7  ;;  %v5515_v43 = vmul.u32.u64.low %v2793_v50, %v2788_v9  ;;  %v5516_v26 = vmul.u32.u64.high %v2793_v50, %v2788_v9, %v5515_v43 }
 0x492   : > { %v2792_v61 = vsel %vm2778_vm15, %v2789_v6, %v2791_v28  ;;  %v2516_v10 = vmul.f32 %v2515_v31, %v2513_v27  ;;  %v2616_v0 = vor.u32 4788187, %v2615_v33  ;;  %v2709_v63 = vclz %v3534_v55 }
 0x493   : > { %v5519_v59 = vmul.u32.u64.low %v2793_v50, %v2792_v61  ;;  %v5520_v47 = vmul.u32.u64.high %v2793_v50, %v2792_v61, %v5519_v59  ;;  %v2852_v30 = vand.u32 2139095040, %v5484_v42  ;;  %v2612_v37 = vor.u32 %v2611_v58, %v2610_v40 }
 0x494   : > { %v2784_v45 = vsel %vm2778_vm15, %v2781_v15, %v2783_v11  ;;  %v2956_v29 = vand.u32 2139095040, %v5499_v41  ;;  %v2803_v24 = vadd.s32 1, %v5516_v26  ;;  %v2517_v2 = vxor.u32 2147483648, %v2516_v10 }
 0x495   : > { %v2853_v54 = vshrl.u32 %v2852_v30, 23  ;;  %v2519_v3 = vsub.s32 4, %v5424_v56  ;;  %v2617_v18 = vand.u32 2147483647, %v2616_v0  ;;  %v6032_v60 = vand.u32 2147483647, %v5484_v42 }
 0x496   : > { %v3535_v27 = vadd.s32 4294967294, %v2709_v63  ;;  %v2800_v31 = vmul.u32 %v2793_v50, %v2784_v45  ;;  %vm2802_vm2 = vc.u32 %v5520_v47, %v5515_v43  ;;  %v2619_v14 = vcvt.s32.f32 %v2612_v37 }
 0x497   : > { %v3541_v5 = vadd.s32 4294967169, %v2853_v54  ;;  %v2804_v52 = vsel %vm2802_vm2, %v2803_v24, %v5516_v26  ;;  %v2957_v38 = vshrl.u32 %v2956_v29, 23  ;;  %vm2435_vm12 = vcmp.lt.s32.totalorder %v5327_v4, 0 }
 0x498   : > { %v2805_v13 = vadd.s32 %v2804_v52, %v2800_v31  ;;  %v2518_v53 = vsel %vm2435_vm12, %v2517_v2, %v2516_v10  ;;  %v5533_v33 = vsel %vm2435_vm12, %v2519_v3, %v5424_v56  ;;  %v5535_v7 = vmul.f32 %v2619_v14, %v2617_v18 }
 0x499   : > { %v2859_v51 = vadd.s32 1, %v3541_v5  ;;  %v2856_v50 = vand.u32 8388607, %v6032_v60  ;;  %vm3536_vm14 = vcmp.lt.s32.totalorder %v3535_v27, 0  ;;  %v3545_v9 = vadd.s32 4294967169, %v2957_v38 }
 0x49a   : > { %v2806_v55 = vadd.s32 536870912, %v2805_v13  ;;  %vm5543_vm9 = vcmp.le.f32.partialorder %v2433_v12, 0.7853982  ;;  %v5549_v56 = vadd.f32 %v5346_v39, %v5539_v21  ;;  %v5556_v58 = vadd.s32 %v5468_v34, %v5466_v17 }
 0x49b   : > { %vm2860_vm1 = vcmp.gt.s32.totalorder %v2859_v51, 0  ;;  %v5563_v12 = vsel %vm5543_vm9, %v5327_v4, %v2518_v53  ;;  %v2621_v11 = vxor.u32 2147483648, %v5535_v7  ;;  %v5566_v39 = vsel %vm3536_vm14, 0, %v3535_v27 }
 0x49c   : > { %v2861_v32 = vsel %vm2860_vm1, %v2859_v51, 0  ;;  %v5558_v15 = vshrl.u32 %v2806_v55, 30  ;;  %v2857_v10 = vor.u32 8388608, %v2856_v50  ;;  %v2963_v17 = vadd.s32 1, %v3545_v9 }
 0x49d   : > { %v2863_v28 = vand.u32 31, %v2861_v32  ;;  %v2862_v34 = vshrl.u32 %v2861_v32, 5  ;;  %v6031_v14 = vand.u32 2147483647, %v5499_v41  ;;  %vm2539_vm6 = vcmp.lt.s32.totalorder %v5329_v22, 0 }
 0x49e   : > { %v2808_v26 = vshll.u32 %v5558_v15, 30  ;;  %v2717_v52 = vsub.s32 4294967266, %v5566_v39  ;;  %v2897_v50 = vshll.u32 %v2857_v10, 8  ;;  %vm2964_vm13 = vcmp.gt.s32.totalorder %v2963_v17, 0 }
 0x49f   : > { %v2864_v0 = vsub.s32 32, %v2863_v28  ;;  %v2866_v59 = vshll.u32 %v6079_v35, %v2863_v28  ;;  %v2869_v63 = vshll.u32 %v6071_v48, %v2863_v28  ;;  %v2872_v30 = vshll.u32 %v6063_v44, %v2863_v28 }
 0x4a0   : > { %v5573_v37 = vsub.s32 %v2805_v13, %v2808_v26  ;;  %v2875_v24 = vshll.u32 %v6037_v23, %v2863_v28  ;;  %v2878_v3 = vshll.u32 %v6038_v36, %v2863_v28  ;;  %vm2881_vm5 = vcmp.lt.s32.totalorder %v2862_v34, 1 }
 0x4a1   : > { %v2867_v45 = vshrl.u32 %v6071_v48, %v2864_v0  ;;  %v2870_v29 = vshrl.u32 %v6063_v44, %v2864_v0  ;;  %v2873_v54 = vshrl.u32 %v6037_v23, %v2864_v0  ;;  %v2876_v2 = vshrl.u32 %v6038_v36, %v2864_v0 }
 0x4a2   : > { %v2879_v18 = vshrl.u32 %v6096_v49, %v2864_v0  ;;  %v2811_v27 = vsub.s32 0, %v5573_v37  ;;  %v2865_v55 = vshrl.u32 %v6079_v35, %v2864_v0  ;;  %vm2882_vm4 = vcmp.lt.s32.totalorder %v2862_v34, 2 }
 0x4a3   : > { %v2868_v31 = vor.u32 %v2867_v45, %v2866_v59  ;;  %v2871_v5 = vor.u32 %v2870_v29, %v2869_v63  ;;  %v2874_v38 = vor.u32 %v2873_v54, %v2872_v30  ;;  %v2877_v13 = vor.u32 %v2876_v2, %v2875_v24 }
 0x4a4   : > { %v2880_v51 = vor.u32 %v2879_v18, %v2878_v3  ;;  %v3538_v53 = vmin.u32 %v2811_v27, %v5573_v37  ;;  %vm2884_vm3 = vcmp.lt.s32.totalorder %v2862_v34, 4  ;;  %vm2883_vm7 = vcmp.lt.s32.totalorder %v2862_v34, 3 }
 0x4a5   : > { %v2889_v9 = vsel %vm2881_vm5, %v2868_v31, %v2871_v5  ;;  %v2886_v28 = vsel %vm2884_vm3, %v2874_v38, 2102212464  ;;  %v2890_v26 = vsel %vm2884_vm3, %v2877_v13, 920167782  ;;  %v2885_v59 = vsel %vm2881_vm5, %v2865_v55, %v2868_v31 }
 0x4a6   : > { %v2813_v32 = vclz %v3538_v53  ;;  %v2891_v63 = vsel %vm2883_vm7, %v2874_v38, %v2890_v26  ;;  %v2893_v45 = vsel %vm2881_vm5, %v2871_v5, %v2874_v38  ;;  %v2894_v30 = vsel %vm2884_vm3, %v2880_v51, 1326507024 }
 0x4a7   : > { %v2887_v24 = vsel %vm2883_vm7, %v2871_v5, %v2886_v28  ;;  %v2892_v54 = vsel %vm2882_vm4, %v2889_v9, %v2891_v63  ;;  %v2895_v2 = vsel %vm2883_vm7, %v2877_v13, %v2894_v30  ;;  %v2718_v10 = vadd.s32 127, %v2717_v52 }
 0x4a8   : > { %v3539_v29 = vadd.s32 4294967294, %v2813_v32  ;;  %v2896_v3 = vsel %vm2882_vm4, %v2893_v45, %v2895_v2  ;;  %v5590_v0 = vmul.u32.u64.low %v2897_v50, %v2892_v54  ;;  %v5591_v18 = vmul.u32.u64.high %v2897_v50, %v2892_v54, %v5590_v0 }
 0x4a9   : > { %v5594_v27 = vmul.u32.u64.low %v2897_v50, %v2896_v3  ;;  %v5595_v53 = vmul.u32.u64.high %v2897_v50, %v2896_v3, %v5594_v27  ;;  %v2965_v31 = vsel %vm2964_vm13, %v2963_v17, 0  ;;  %v2888_v5 = vsel %vm2882_vm4, %v2885_v59, %v2887_v24 }
 0x4aa   : > { %vm3540_vm8 = vcmp.lt.s32.totalorder %v3539_v29, 0  ;;  %v2960_v13 = vand.u32 8388607, %v6031_v14  ;;  %v2967_v52 = vand.u32 31, %v2965_v31  ;;  %v5606_v51 = vsel %vm2539_vm6, %v2621_v11, %v5535_v7 }
 0x4ab   : > { %v5598_v38 = vsel %vm3540_vm8, 0, %v3539_v29  ;;  %v2713_v55 = vsub.s32 32, %v5566_v39  ;;  %v3060_v32 = vand.u32 2139095040, %v5549_v56  ;;  %v2907_v28 = vadd.s32 1, %v5591_v18 }
 0x4ac   : > { %v2821_v34 = vsub.s32 4294967266, %v5598_v38  ;;  %v2968_v26 = vsub.s32 32, %v2967_v52  ;;  %v2719_v59 = vshll.u32 %v2718_v10, 23  ;;  %v2801_v63 = vadd.s32 %v5515_v43, %v5520_v47 }
 0x4ad   : > { %v2904_v7 = vmul.u32 %v2897_v50, %v2888_v5  ;;  %vm2906_vm10 = vc.u32 %v5595_v53, %v5590_v0  ;;  %v2961_v45 = vor.u32 8388608, %v2960_v13  ;;  %v2817_v24 = vsub.s32 32, %v5598_v38 }
 0x4ae   : > { %v2908_v11 = vsel %vm2906_vm10, %v2907_v28, %v5591_v18  ;;  %v2971_v30 = vshrl.u32 %v6071_v48, %v2968_v26  ;;  %v2974_v29 = vshrl.u32 %v6063_v44, %v2968_v26  ;;  %v2966_v2 = vshrl.u32 %v2965_v31, 5 }
 0x4af   : > { %v2909_v54 = vadd.s32 %v2908_v11, %v2904_v7  ;;  %v3061_v3 = vshrl.u32 %v3060_v32, 23  ;;  %v2822_v10 = vadd.s32 127, %v2821_v34  ;;  %v2970_v27 = vshll.u32 %v6079_v35, %v2967_v52 }
 0x4b0   : > { %v2973_v43 = vshll.u32 %v6071_v48, %v2967_v52  ;;  %v2977_v47 = vshrl.u32 %v6037_v23, %v2968_v26  ;;  %v2976_v18 = vshll.u32 %v6063_v44, %v2967_v52  ;;  %v2979_v5 = vshll.u32 %v6037_v23, %v2967_v52 }
 0x4b1   : > { %v2910_v50 = vadd.s32 536870912, %v2909_v54  ;;  %v2980_v13 = vshrl.u32 %v6038_v36, %v2968_v26  ;;  %vm5631_vm11 = vcmp.le.f32.partialorder %v2537_v57, 0.7853982  ;;  %v2972_v31 = vor.u32 %v2971_v30, %v2970_v27 }
 0x4b2   : > { %v2975_v32 = vor.u32 %v2974_v29, %v2973_v43  ;;  %v2982_v34 = vshll.u32 %v6038_v36, %v2967_v52  ;;  %v2983_v7 = vshrl.u32 %v6096_v49, %v2968_v26  ;;  %v2715_v11 = vshrl.u32 %v5556_v58, %v2713_v55 }
 0x4b3   : > { %v5638_v14 = vshrl.u32 %v2910_v50, 30  ;;  %v2978_v60 = vor.u32 %v2977_v47, %v2976_v18  ;;  %v2981_v40 = vor.u32 %v2980_v13, %v2979_v5  ;;  %v2720_v20 = vor.u32 4788187, %v2719_v59 }
 0x4b4   : > { %v2984_v25 = vor.u32 %v2983_v7, %v2982_v34  ;;  %v3001_v61 = vshll.u32 %v2961_v45, 8  ;;  %v3549_v9 = vadd.s32 4294967169, %v3061_v3  ;;  %v2823_v57 = vshll.u32 %v2822_v10, 23 }
 0x4b5   : > { %v2912_v17 = vshll.u32 %v5638_v14, 30  ;;  %vm2985_vm15 = vcmp.lt.s32.totalorder %v2966_v2, 1  ;;  %vm2988_vm2 = vcmp.lt.s32.totalorder %v2966_v2, 4  ;;  %vm2643_vm12 = vcmp.lt.s32.totalorder %v5335_v16, 0 }
 0x4b6   : > { %v2818_v52 = vshll.u32 %v5573_v37, %v5598_v38  ;;  %v2819_v30 = vshrl.u32 %v2801_v63, %v2817_v24  ;;  %v2993_v58 = vsel %vm2985_vm15, %v2972_v31, %v2975_v32  ;;  %v2994_v55 = vsel %vm2988_vm2, %v2981_v40, 920167782 }
 0x4b7   : > { %v5645_v29 = vsub.s32 %v2909_v54, %v2912_v17  ;;  %v2969_v59 = vshrl.u32 %v6079_v35, %v2968_v26  ;;  %vm2987_vm14 = vcmp.lt.s32.totalorder %v2966_v2, 3  ;;  %v2990_v45 = vsel %vm2988_vm2, %v2978_v60, 2102212464 }
 0x4b8   : > { %vm2986_vm1 = vcmp.lt.s32.totalorder %v2966_v2, 2  ;;  %v2995_v3 = vsel %vm2987_vm14, %v2978_v60, %v2994_v55  ;;  %v2997_v10 = vsel %vm2985_vm15, %v2975_v32, %v2978_v60  ;;  %v2998_v27 = vsel %vm2988_vm2, %v2984_v25, 1326507024 }
 0x4b9   : > { %v2824_v43 = vor.u32 4788187, %v2823_v57  ;;  %v2915_v47 = vsub.s32 0, %v5645_v29  ;;  %v2989_v37 = vsel %vm2985_vm15, %v2969_v59, %v2972_v31  ;;  %v2996_v38 = vsel %vm2986_vm1, %v2993_v58, %v2995_v3 }
 0x4ba   : > { %v2991_v63 = vsel %vm2987_vm14, %v2975_v32, %v2990_v45  ;;  %v2999_v24 = vsel %vm2987_vm14, %v2981_v40, %v2998_v27  ;;  %v5652_v17 = vmul.u32.u64.low %v3001_v61, %v2996_v38  ;;  %v5653_v54 = vmul.u32.u64.high %v3001_v61, %v2996_v38, %v5652_v17 }
 0x4bb   : > { %v2625_v26 = vsel %vm5631_vm11, %v5329_v22, %v5606_v51  ;;  %v3542_v25 = vmin.u32 %v2915_v47, %v5645_v29  ;;  %v3000_v60 = vsel %vm2986_vm1, %v2997_v10, %v2999_v24  ;;  %v3067_v50 = vadd.s32 1, %v3549_v9 }
 0x4bc   : > { %v6101_v18 = vshll.u32 %v5504_v1, %v5566_v39  ;;  %v2820_v13 = vor.u32 %v2819_v30, %v2818_v52  ;;  %v5665_v40 = vmul.u32.u64.low %v3001_v61, %v3000_v60  ;;  %v5666_v31 = vmul.u32.u64.high %v3001_v61, %v3000_v60, %v5665_v40 }
 0x4bd   : > { %v2721_v32 = vand.u32 2147483647, %v2720_v20  ;;  %v2917_v34 = vclz %v3542_v25  ;;  %v2992_v7 = vsel %vm2986_vm1, %v2989_v37, %v2991_v63  ;;  %vm3068_vm5 = vcmp.gt.s32.totalorder %v3067_v50, 0 }
 0x4be   : > { %v2716_v5 = vor.u32 %v2715_v11, %v6101_v18  ;;  %v2825_v57 = vand.u32 2147483647, %v2824_v43  ;;  %v3011_v51 = vadd.s32 1, %v5653_v54  ;;  %v6102_v58 = vand.u32 2147483647, %v5549_v56 }
 0x4bf   : > { %v3069_v9 = vsel %vm3068_vm5, %v3067_v50, 0  ;;  %3783 = vcosq.f32 %v2625_v26  ;;  %v6103_v1 = vsub.s32 4, %v5488_v62  ;;  %v3543_v20 = vadd.s32 4294967294, %v2917_v34 }
 0x4c0   : > { %v3064_v55 = vand.u32 8388607, %v6102_v58  ;;  %v3071_v11 = vand.u32 31, %v3069_v9  ;;  %v2723_v2 = vcvt.s32.f32 %v2716_v5  ;;  %v2827_v52 = vcvt.s32.f32 %v2820_v13 }
 0x4c1   : > { %v5677_v39 = vsel %vm2643_vm12, %v6103_v1, %v5488_v62  ;;  %v3008_v30 = vmul.u32 %v3001_v61, %v2992_v7  ;;  %vm3010_vm13 = vc.u32 %v5666_v31, %v5652_v17  ;;  %3785 = vsinq.f32 %v2625_v26 }
 0x4c2   : > { %vm3544_vm4 = vcmp.lt.s32.totalorder %v3543_v20, 0  ;;  %v3012_v59 = vsel %vm3010_vm13, %v3011_v51, %v5653_v54  ;;  %v3072_v45 = vsub.s32 32, %v3071_v11  ;;  %v2724_v3 = vmul.f32 %v2723_v2, %v2721_v32 }
 0x4c3   : > { %v5682_v10 = vmul.f32 %v2827_v52, %v2825_v57  ;;  %v3013_v27 = vadd.s32 %v3012_v59, %v3008_v30  ;;  %v3065_v43 = vor.u32 8388608, %v3064_v55  ;;  %v5684_v62 = vsel %vm3544_vm4, 0, %v3543_v20 }
 0x4c4   : > { %v5686_v47 = vshrl.u32 %v3069_v9, 5  ;;  %v3080_v37 = vshll.u32 %v6063_v44, %v3071_v11  ;;  %v5691_v61 = vadd.f32 %v5350_v19, %v5539_v21  ;;  %v3075_v63 = vshrl.u32 %v6071_v48, %v3072_v45 }
 0x4c5   : > { %v3014_v38 = vadd.s32 536870912, %v3013_v27  ;;  %v3078_v24 = vshrl.u32 %v6063_v44, %v3072_v45  ;;  %v3081_v54 = vshrl.u32 %v6037_v23, %v3072_v45  ;;  %v3074_v26 = vshll.u32 %v6079_v35, %v3071_v11 }
 0x4c6   : > { %v3077_v25 = vshll.u32 %v6071_v48, %v3071_v11  ;;  %v3083_v60 = vshll.u32 %v6037_v23, %v3071_v11  ;;  %v3084_v50 = vshrl.u32 %v6038_v36, %v3072_v45  ;;  %v2725_v18 = vxor.u32 2147483648, %v2724_v3 }
 0x4c7   : > { %v2829_v5 = vxor.u32 2147483648, %v5682_v10  ;;  %v5701_v19 = vshrl.u32 %v3014_v38, 30  ;;  %v3082_v21 = vor.u32 %v3081_v54, %v3080_v37  ;;  %v2925_v13 = vsub.s32 4294967266, %v5684_v62 }
 0x4c8   : > { %v3076_v40 = vor.u32 %v3075_v63, %v3074_v26  ;;  %v3079_v32 = vor.u32 %v3078_v24, %v3077_v25  ;;  %v3085_v34 = vor.u32 %v3084_v50, %v3083_v60  ;;  %v6104_v7 = vand.u32 2147483647, %v5335_v16 }
 0x4c9   : > { %v3016_v51 = vshll.u32 %v5701_v19, 30  ;;  %v3086_v58 = vshll.u32 %v6038_v36, %v3071_v11  ;;  %v3087_v55 = vshrl.u32 %v6096_v49, %v3072_v45  ;;  %v3105_v9 = vshll.u32 %v3065_v43, 8  ;;  %v5713_v1 = vpop.eup %3783 }
 0x4ca   : > { %vm5706_vm3 = vcmp.le.f32.partialorder %v6104_v7, 0.7853982  ;;  %vm2747_vm7 = vcmp.lt.s32.totalorder %v5348_v46, 0  ;;  %v2921_v20 = vsub.s32 32, %v5684_v62  ;;  %v3073_v2 = vshrl.u32 %v6079_v35, %v3072_v45 }
 0x4cb   : > { %vm3092_vm8 = vcmp.lt.s32.totalorder %v5686_v47, 4  ;;  %v3164_v52 = vand.u32 2139095040, %v5691_v61  ;;  %v5720_v30 = vsub.s32 %v3013_v27, %v3016_v51  ;;  %v3088_v59 = vor.u32 %v3087_v55, %v3086_v58  ;;  %v5725_v43 = vpop.eup %3785 }
 0x4cc   : > { %vm3089_vm10 = vcmp.lt.s32.totalorder %v5686_v47, 1  ;;  %v3094_v11 = vsel %vm3092_vm8, %v3082_v21, 2102212464  ;;  %v2926_v37 = vadd.s32 127, %v2925_v13  ;;  %vm3091_vm15 = vcmp.lt.s32.totalorder %v5686_v47, 3 }
 0x4cd   : > { %v3097_v38 = vsel %vm3089_vm10, %v3076_v40, %v3079_v32  ;;  %v3098_v45 = vsel %vm3092_vm8, %v3085_v34, 920167782  ;;  %v6107_v63 = vand.u32 2147483647, %v5348_v46  ;;  %v3019_v24 = vsub.s32 0, %v5720_v30 }
 0x4ce   : > { %vm3090_vm14 = vcmp.lt.s32.totalorder %v5686_v47, 2  ;;  %v3099_v54 = vsel %vm3091_vm15, %v3082_v21, %v3098_v45  ;;  %v3101_v26 = vsel %vm3089_vm10, %v3079_v32, %v3082_v21  ;;  %v3093_v25 = vsel %vm3089_vm10, %v3073_v2, %v3076_v40 }
 0x4cf   : > { %vm5732_vm2 = vcmp.le.f32.partialorder %v6107_v63, 0.7853982  ;;  %v3095_v60 = vsel %vm3091_vm15, %v3079_v32, %v3094_v11  ;;  %v3100_v50 = vsel %vm3090_vm14, %v3097_v38, %v3099_v54  ;;  %v3102_v13 = vsel %vm3092_vm8, %v3088_v59, 1326507024 }
 0x4d0   : > { %v3546_v7 = vmin.u32 %v3019_v24, %v5720_v30  ;;  %v3103_v51 = vsel %vm3091_vm15, %v3085_v34, %v3102_v13  ;;  %v5743_v58 = vmul.u32.u64.low %v3105_v9, %v3100_v50  ;;  %v5744_v55 = vmul.u32.u64.high %v3105_v9, %v3100_v50, %v5743_v58 }
 0x4d1   : > { %v6110_v63 = vsel %vm5543_vm9, 0, %v5533_v33  ;;  %v2726_v21 = vsel %vm2643_vm12, %v2725_v18, %v2724_v3  ;;  %v3104_v40 = vsel %vm3090_vm14, %v3101_v26, %v3103_v51  ;;  %v3165_v32 = vshrl.u32 %v3164_v52, 23 }
 0x4d2   : > { %v5750_v45 = vadd.s32 3, %v6110_v63  ;;  %v2905_v2 = vadd.s32 %v5590_v0, %v5595_v53  ;;  %v3021_v34 = vclz %v3546_v7  ;;  %3787 = vcosq.f32 %v5563_v12 }
 0x4d3   : > { %v5758_v59 = vmul.u32.u64.low %v3105_v9, %v3104_v40  ;;  %v5759_v11 = vmul.u32.u64.high %v3105_v9, %v3104_v40, %v5758_v59  ;;  %v2730_v33 = vsel %vm5706_vm3, 0, %v5677_v39  ;;  %v3096_v6 = vsel %vm3090_vm14, %v3093_v25, %v3095_v60 }
 0x4d4   : > { %v3553_v3 = vadd.s32 4294967169, %v3165_v32  ;;  %v2830_v18 = vsel %vm2747_vm7, %v2829_v5, %v5682_v10  ;;  %v2923_v52 = vshrl.u32 %v2905_v2, %v2921_v20  ;;  %v2927_v0 = vshll.u32 %v2926_v37, 23 }
 0x4d5   : > { %v3115_v53 = vadd.s32 1, %v5744_v55  ;;  %v2729_v38 = vsel %vm5706_vm3, %v5335_v16, %v2726_v21  ;;  %v3161_v24 = vand.u32 2147483647, %v5691_v61  ;;  %v2623_v39 = vsub.s32 4, %v5447_v8 }
 0x4d6   : > { %v3171_v54 = vadd.s32 1, %v3553_v3  ;;  %v2922_v47 = vshll.u32 %v5645_v29, %v5684_v62  ;;  %v3547_v26 = vadd.s32 4294967294, %v3021_v34  ;;  %v3112_v25 = vmul.u32 %v3105_v9, %v3096_v6 }
 0x4d7   : > { %vm3114_vm9 = vc.u32 %v5759_v11, %v5743_v58  ;;  %3789 = vsinq.f32 %v5563_v12  ;;  %v2833_v10 = vsel %vm5732_vm2, %v5348_v46, %v2830_v18  ;;  %v5786_v20 = vor.u32 4788187, %v2927_v0 }
 0x4d8   : > { %v3116_v5 = vsel %vm3114_vm9, %v3115_v53, %v5744_v55  ;;  %vm3172_vm12 = vcmp.gt.s32.totalorder %v3171_v54, 0  ;;  %3791 = vcosq.f32 %v2729_v38  ;;  %v5784_v57 = vor.u32 %v2923_v52, %v2922_v47 }
 0x4d9   : > { %v3117_v37 = vadd.s32 %v3116_v5, %v3112_v25  ;;  %3793 = vsinq.f32 %v2729_v38  ;;  %v5788_v29 = vadd.s32 3, %v2730_v33  ;;  %v3168_v62 = vand.u32 8388607, %v3161_v24 }
 0x4da   : > { %v3173_v12 = vsel %vm3172_vm12, %v3171_v54, 0  ;;  %3795 = vcosq.f32 %v2833_v10  ;;  %vm3548_vm1 = vcmp.lt.s32.totalorder %v3547_v26, 0  ;;  %v2624_v60 = vsel %vm2539_vm6, %v2623_v39, %v5447_v8 }
 0x4db   : > { %v3118_v9 = vadd.s32 536870912, %v3117_v37  ;;  %3797 = vsinq.f32 %v2833_v10  ;;  %v5797_v50 = vadd.s32 %v5652_v17, %v5666_v31  ;;  %v3175_v13 = vand.u32 31, %v3173_v12 }
 0x4dc   : > { %v2634_v7 = vxor.u32 2147483648, %v5725_v43  ;;  %v2929_v51 = vand.u32 2147483647, %v5786_v20  ;;  %v2931_v55 = vcvt.s32.f32 %v5784_v57  ;;  %v2637_v21 = vxor.u32 2147483648, %v5713_v1  ;;  %v5805_v40 = vpop.eup %3787 }
 0x4dd   : > { %v5802_v63 = vshrl.u32 %v3118_v9, 30  ;;  %v5807_v32 = vsel %vm3548_vm1, 0, %v3547_v26  ;;  %v3169_v8 = vor.u32 8388608, %v3168_v62  ;;  %v3176_v2 = vsub.s32 32, %v3175_v13 }
 0x4de   : > { %v2626_v17 = vsel %vm5631_vm11, 0, %v2624_v60  ;;  %v5812_v31 = vadd.s32 %v5743_v58, %v5759_v11  ;;  %v3178_v59 = vshll.u32 %v6079_v35, %v3175_v13  ;;  %v2831_v33 = vsub.s32 4, %v5558_v15 }
 0x4df   : > { %v3120_v34 = vshll.u32 %v5802_v63, 30  ;;  %v3179_v6 = vshrl.u32 %v6071_v48, %v3176_v2  ;;  %v3181_v3 = vshll.u32 %v6071_v48, %v3175_v13  ;;  %v3182_v18 = vshrl.u32 %v6063_v44, %v3176_v2 }
 0x4e0   : > { %v3185_v52 = vshrl.u32 %v6037_v23, %v3176_v2  ;;  %v3029_v28 = vsub.s32 4294967266, %v5807_v32  ;;  %v3174_v58 = vshrl.u32 %v3173_v12, 5  ;;  %v3184_v11 = vshll.u32 %v6063_v44, %v3175_v13 }
 0x4e1   : > { %v5822_v0 = vsub.s32 %v3117_v37, %v3120_v34  ;;  %v5825_v53 = vpop.eup %3789  ;;  %v3025_v38 = vsub.s32 32, %v5807_v32  ;;  %v3180_v54 = vor.u32 %v3179_v6, %v3178_v59  ;;  %v3183_v39 = vor.u32 %v3182_v18, %v3181_v3 }
 0x4e2   : > { %v5828_v47 = vshll.u32 %v3169_v8, 8  ;;  %v5830_v48 = vpop.eup %3791  ;;  %v3186_v25 = vor.u32 %v3185_v52, %v3184_v11  ;;  %v3187_v10 = vshll.u32 %v6037_v23, %v3175_v13  ;;  %v3188_v5 = vshrl.u32 %v6038_v36, %v3176_v2 }
 0x4e3   : > { %v3123_v26 = vsub.s32 0, %v5822_v0  ;;  %v5835_v37 = vpop.eup %3793  ;;  %v3190_v44 = vshll.u32 %v6038_v36, %v3175_v13  ;;  %v3191_v62 = vshrl.u32 %v6096_v49, %v3176_v2  ;;  %v2630_v12 = vadd.s32 3, %v2626_v17 }
 0x4e4   : > { %v2832_v9 = vsel %vm2747_vm7, %v2831_v33, %v5558_v15  ;;  %v5842_v60 = vpop.eup %3795  ;;  %v3030_v8 = vadd.s32 127, %v3029_v28  ;;  %v3189_v59 = vor.u32 %v3188_v5, %v3187_v10  ;;  %vm3193_vm6 = vcmp.lt.s32.totalorder %v3174_v58, 1 }
 0x4e5   : > { %v3550_v34 = vmin.u32 %v3123_v26, %v5822_v0  ;;  %v3798_v23 = vpop.eup %3797  ;;  %v3177_v6 = vshrl.u32 %v6079_v35, %v3176_v2  ;;  %v3192_v3 = vor.u32 %v3191_v62, %v3190_v44  ;;  %vm3196_vm11 = vcmp.lt.s32.totalorder %v3174_v58, 4 }
 0x4e6   : > { %v3201_v36 = vsel %vm3193_vm6, %v3180_v54, %v3183_v39  ;;  %vm3195_vm5 = vcmp.lt.s32.totalorder %v3174_v58, 3  ;;  %v3198_v49 = vsel %vm3196_vm11, %v3186_v25, 2102212464  ;;  %v3202_v17 = vsel %vm3196_vm11, %v3189_v59, 920167782 }
 0x4e7   : > { %v3125_v13 = vclz %v3550_v34  ;;  %vm3194_vm13 = vcmp.lt.s32.totalorder %v3174_v58, 2  ;;  %v3203_v18 = vsel %vm3195_vm5, %v3186_v25, %v3202_v17  ;;  %v3205_v15 = vsel %vm3193_vm6, %v3183_v39, %v3186_v25 }
 0x4e8   : > { %v2631_v33 = vand.u32 3, %v2630_v12  ;;  %v3197_v28 = vsel %vm3193_vm6, %v3177_v6, %v3180_v54  ;;  %v3204_v11 = vsel %vm3194_vm13, %v3201_v36, %v3203_v18  ;;  %v3206_v26 = vsel %vm3196_vm11, %v3192_v3, 1326507024 }
 0x4e9   : > { %v3551_v52 = vadd.s32 4294967294, %v3125_v13  ;;  %v3199_v10 = vsel %vm3195_vm5, %v3183_v39, %v3198_v49  ;;  %v3207_v5 = vsel %vm3195_vm5, %v3189_v59, %v3206_v26  ;;  %v3026_v44 = vshll.u32 %v5720_v30, %v5807_v32 }
 0x4ea   : > { %v5848_v35 = vmul.u32.u64.low %v5828_v47, %v3204_v11  ;;  %v5849_v2 = vmul.u32.u64.high %v5828_v47, %v3204_v11, %v5848_v35  ;;  %v3208_v62 = vsel %vm3194_vm13, %v3205_v15, %v3207_v5  ;;  %v2834_v25 = vsel %vm5732_vm2, 0, %v2832_v9 }
 0x4eb   : > { %vm3552_vm4 = vcmp.lt.s32.totalorder %v3551_v52, 0  ;;  %v3027_v54 = vshrl.u32 %v5797_v50, %v3025_v38  ;;  %v5859_v39 = vmul.u32.u64.low %v5828_v47, %v3208_v62  ;;  %v5860_v34 = vmul.u32.u64.high %v5828_v47, %v3208_v62, %v5859_v39 }
 0x4ec   : > { %v3128_v12 = vsel %vm3552_vm4, 0, %v3551_v52  ;;  %vm2629_vm3 = vweird.f32 %v5329_v22  ;;  %vm2837_vm7 = vweird.f32 %v5348_v46  ;;  %v3031_v59 = vshll.u32 %v3030_v8, 23 }
 0x4ed   : > { %v3133_v6 = vsub.s32 4294967266, %v3128_v12  ;;  %v3200_v30 = vsel %vm3194_vm13, %v3197_v28, %v3199_v10  ;;  %v2842_v32 = vxor.u32 2147483648, %v3798_v23  ;;  %v3219_v3 = vadd.s32 1, %v5849_v2 }
 0x4ee   : > { %vm2633_vm8 = vcmp.eq.s32.totalorder %v2631_v33, 0  ;;  %vm2636_vm10 = vcmp.eq.s32.totalorder %v2631_v33, 2  ;;  %v2838_v27 = vadd.s32 3, %v2834_v25  ;;  %v2845_v8 = vxor.u32 2147483648, %v5842_v60 }
 0x4ef   : > { %v3134_v50 = vadd.s32 127, %v3133_v6  ;;  %v2635_v38 = vsel %vm2633_vm8, %v5713_v1, %v2634_v7  ;;  %v2638_v9 = vsel %vm2636_vm10, %v2637_v21, %v5725_v43  ;;  %v3028_v36 = vor.u32 %v3027_v54, %v3026_v44 }
 0x4f0   : > { %v3216_v58 = vmul.u32 %v5828_v47, %v3200_v30  ;;  %vm3218_vm15 = vc.u32 %v5860_v34, %v5848_v35  ;;  %v2839_v13 = vand.u32 3, %v2838_v27  ;;  %v3032_v49 = vor.u32 4788187, %v3031_v59 }
 0x4f1   : > { %v3129_v17 = vsub.s32 32, %v3128_v12  ;;  %v3220_v18 = vsel %vm3218_vm15, %v3219_v3, %v5849_v2  ;;  %vm2632_vm2 = vcmp.lt.s32.totalorder %v2631_v33, 2  ;;  %v3135_v1 = vshll.u32 %v3134_v50, 23 }
 0x4f2   : > { %v3221_v15 = vadd.s32 %v3220_v18, %v3216_v58  ;;  %v2639_v7 = vsel %vm2632_vm2, %v2635_v38, %v2638_v9  ;;  %vm2841_vm14 = vcmp.eq.s32.totalorder %v2839_v13, 0  ;;  %vm2844_vm9 = vcmp.eq.s32.totalorder %v2839_v13, 2 }
 0x4f3   : > { %vm2840_vm12 = vcmp.lt.s32.totalorder %v2839_v13, 2  ;;  %v2843_v43 = vsel %vm2841_vm14, %v5842_v60, %v2842_v32  ;;  %v2846_v21 = vsel %vm2844_vm9, %v2845_v8, %v3798_v23  ;;  %v2527_v28 = vand.u32 3, %v5750_v45 }
 0x4f4   : > { %v3222_v52 = vadd.s32 536870912, %v3221_v15  ;;  %v2847_v47 = vsel %vm2840_vm12, %v2843_v43, %v2846_v21  ;;  %v2530_v11 = vxor.u32 2147483648, %v5825_v53  ;;  %v3131_v26 = vshrl.u32 %v5812_v31, %v3129_v17 }
 0x4f5   : > { %v2640_v33 = vsel %vm2629_vm3, nan, %v2639_v7  ;;  %v2848_v10 = vsel %vm2837_vm7, nan, %v2847_v47  ;;  %v2533_v5 = vxor.u32 2147483648, %v5805_v40  ;;  %v3130_v2 = vshll.u32 %v5822_v0, %v3128_v12 }
 0x4f6   : > { %v5887_v60 = vshrl.u32 %v3222_v52, 30  ;;  %v3578_v23 = vpack.c.bf16 %v2848_v10, %v2640_v33  ;;  %vm2529_vm1 = vcmp.eq.s32.totalorder %v2527_v28, 0  ;;  %v3136_v44 = vor.u32 4788187, %v3135_v1 }
 0x4f7   : > { %v2531_v45 = vsel %vm2529_vm1, %v5805_v40, %v2530_v11  ;;  %vm2532_vm6 = vcmp.eq.s32.totalorder %v2527_v28, 2  ;;  %v2735_v31 = vand.u32 3, %v5788_v29  ;;  %v2738_v62 = vxor.u32 2147483648, %v5835_v37 }
 0x4f8   : > { %v3224_v22 = vshll.u32 %v5887_v60, 30  ;;  %3579 = vmatprep.subr.bf16.mxu1 %v3578_v23  ;;  %v2534_v46 = vsel %vm2532_vm6, %v2533_v5, %v5825_v53  ;;  %v2741_v25 = vxor.u32 2147483648, %v5830_v48  ;;  %v3033_v0 = vand.u32 2147483647, %v3032_v49 }
 0x4f9   : > { %v3132_v54 = vor.u32 %v3131_v26, %v3130_v2  ;;  %vm2528_vm11 = vcmp.lt.s32.totalorder %v2527_v28, 2  ;;  %vm2737_vm5 = vcmp.eq.s32.totalorder %v2735_v31, 0  ;;  %vm2740_vm13 = vcmp.eq.s32.totalorder %v2735_v31, 2 }
 0x4fa   : > { %v3225_v12 = vsub.s32 %v3221_v15, %v3224_v22  ;;  %v2535_v39 = vsel %vm2528_vm11, %v2531_v45, %v2534_v46  ;;  %v2739_v40 = vsel %vm2737_vm5, %v5830_v48, %v2738_v62  ;;  %v3035_v59 = vcvt.s32.f32 %v3028_v36 }
 0x4fb   : > { %v3137_v29 = vand.u32 2147483647, %v3136_v44  ;;  %vm2736_vm4 = vcmp.lt.s32.totalorder %v2735_v31, 2  ;;  %v2742_v6 = vsel %vm2740_vm13, %v2741_v25, %v5835_v37  ;;  %vm2525_vm3 = vweird.f32 %v5327_v4 }
 0x4fc   : > { %v3227_v30 = vsub.s32 0, %v3225_v12  ;;  %vm2733_vm7 = vweird.f32 %v5335_v16  ;;  %v2743_v53 = vsel %vm2736_vm4, %v2739_v40, %v2742_v6  ;;  %v2932_v32 = vmul.f32 %v2931_v55, %v2929_v51 }
 0x4fd   : > { %v3139_v3 = vcvt.s32.f32 %v3132_v54  ;;  %v2536_v27 = vsel %vm2525_vm3, nan, %v2535_v39  ;;  %v2744_v48 = vsel %vm2733_vm7, nan, %v2743_v53  ;;  %v3036_v50 = vmul.f32 %v3035_v59, %v3033_v0 }
 0x4fe   : > { %v3554_v38 = vmin.u32 %v3227_v30, %v3225_v12  ;;  %v3580_v9 = vpack.c.bf16 %v2744_v48, %v2536_v27  ;;  %v2933_v37 = vxor.u32 2147483648, %v2932_v32  ;;  %vm2851_vm8 = vcmp.lt.s32.totalorder %v5484_v42, 0 }
 0x4ff   : > { %v3140_v8 = vmul.f32 %v3139_v3, %v3137_v29  ;;  %v3037_v58 = vxor.u32 2147483648, %v3036_v50  ;;  %vm2955_vm15 = vcmp.lt.s32.totalorder %v5499_v41, 0  ;;  %vm3059_vm2 = vcmp.lt.s32.totalorder %v5549_v56, 0 }
 0x500   : > { %v3229_v36 = vclz %v3554_v38  ;;  %3581 = vmatpush1.bf16.msra.mxu1 %v3580_v9  ;;  %v2934_v16 = vsel %vm2851_vm8, %v2933_v37, %v2932_v32  ;;  %v3217_v51 = vadd.s32 %v5848_v35, %v5860_v34  ;;  %v6111_v17 = vand.u32 2147483647, %v5484_v42 }
 0x501   : > { %v3141_v13 = vxor.u32 2147483648, %v3140_v8  ;;  %v3038_v20 = vsel %vm2955_vm15, %v3037_v58, %v3036_v50  ;;  %v6114_v15 = vand.u32 2147483647, %v5499_v41  ;;  %v6117_v47 = vand.u32 2147483647, %v5549_v56 }
 0x502   : > { %v3555_v4 = vadd.s32 4294967294, %v3229_v36  ;;  %vm5914_vm14 = vcmp.le.f32.partialorder %v6111_v17, 0.7853982  ;;  %v3143_v10 = vsub.s32 4, %v5802_v63  ;;  %v3039_v2 = vsub.s32 4, %v5701_v19 }
 0x503   : > { %vm5920_vm9 = vcmp.le.f32.partialorder %v6114_v15, 0.7853982  ;;  %v3142_v1 = vsel %vm3059_vm2, %v3141_v13, %v3140_v8  ;;  %v2937_v35 = vsel %vm5914_vm14, %v5484_v42, %v2934_v16  ;;  %vm5934_vm12 = vcmp.le.f32.partialorder %v6117_v47, 0.7853982 }
 0x504   : > { %vm3556_vm10 = vcmp.lt.s32.totalorder %v3555_v4, 0  ;;  %v3041_v52 = vsel %vm5920_vm9, %v5499_v41, %v3038_v20  ;;  %v3145_v11 = vsel %vm5934_vm12, %v5549_v56, %v3142_v1  ;;  %3799 = vcosq.f32 %v2937_v35 }
 0x505   : > { %v3232_v57 = vsel %vm3556_vm10, 0, %v3555_v4  ;;  %3801 = vcosq.f32 %v3041_v52  ;;  %v2935_v23 = vsub.s32 4, %v5638_v14  ;;  %v3144_v31 = vsel %vm3059_vm2, %v3143_v10, %v5802_v63 }
 0x506   : > { %v3233_v55 = vsub.s32 32, %v3232_v57  ;;  %v3237_v49 = vsub.s32 4294967266, %v3232_v57  ;;  %v3234_v34 = vshll.u32 %v3225_v12, %v3232_v57  ;;  %3803 = vcosq.f32 %v3145_v11 }
 0x507   : > { %3805 = vsinq.f32 %v3145_v11  ;;  %v3247_v46 = vsub.s32 4, %v5887_v60  ;;  %v3040_v62 = vsel %vm2955_vm15, %v3039_v2, %v5701_v19  ;;  %v2936_v25 = vsel %vm2851_vm8, %v2935_v23, %v5638_v14 }
 0x508   : > { %v3235_v43 = vshrl.u32 %v3217_v51, %v3233_v55  ;;  %v3238_v21 = vadd.s32 127, %v3237_v49  ;;  %3807 = vsinq.f32 %v3041_v52  ;;  %v3146_v54 = vsel %vm5934_vm12, 0, %v3144_v31 }
 0x509   : > { %3809 = vsinq.f32 %v2937_v35  ;;  %vm3163_vm1 = vcmp.lt.s32.totalorder %v5691_v61, 0  ;;  %vm5959_vm6 = vcmp.le.f32.partialorder %v3161_v24, 0.7853982  ;;  %v3042_v19 = vsel %vm5920_vm9, 0, %v3040_v62 }
 0x50a   : > { %v3236_v26 = vor.u32 %v3235_v43, %v3234_v34  ;;  %v3239_v33 = vshll.u32 %v3238_v21, 23  ;;  %v3248_v39 = vsel %vm3163_vm1, %v3247_v46, %v5887_v60  ;;  %v2938_v14 = vsel %vm5914_vm14, 0, %v2936_v25 }
 0x50b   : > { %v3150_v6 = vadd.s32 3, %v3146_v54  ;;  %v3046_v30 = vadd.s32 3, %v3042_v19  ;;  %v3250_v53 = vsel %vm5959_vm6, 0, %v3248_v39  ;;  %v2942_v3 = vadd.s32 3, %v2938_v14 }
 0x50c   : > { %v3240_v5 = vor.u32 4788187, %v3239_v33  ;;  %v3243_v45 = vcvt.s32.f32 %v3236_v26  ;;  %v3254_v48 = vadd.s32 3, %v3250_v53  ;;  %vm3149_vm12 = vweird.f32 %v5549_v56  ;;  %v3265_v56 = vld [vmem:[%s6002_s7] sm:$0x7] }
 0x50d   : > { %v3151_v50 = vand.u32 3, %v3150_v6  ;;  %v3047_v38 = vand.u32 3, %v3046_v30  ;;  %v2943_v58 = vand.u32 3, %v2942_v3 }
 0x50e   : > { %v3241_v44 = vand.u32 2147483647, %v3240_v5  ;;  %v3800_v40 = vpop.eup %3799  ;;  %v3255_v16 = vand.u32 3, %v3254_v48 }
 0x50f   : > { %v3802_v29 = vpop.eup %3801  ;;  %v2949_v13 = vxor.u32 2147483648, %v3800_v40  ;;  %vm3153_vm11 = vcmp.eq.s32.totalorder %v3151_v50, 0  ;;  %vm3156_vm5 = vcmp.eq.s32.totalorder %v3151_v50, 2  ;;  %vm3049_vm13 = vcmp.eq.s32.totalorder %v3047_v38, 0 }
 0x510   : > { %v3244_v22 = vmul.f32 %v3243_v45, %v3241_v44  ;;  %v3804_v24 = vpop.eup %3803  ;;  %v3053_v37 = vxor.u32 2147483648, %v3802_v29  ;;  %vm3052_vm4 = vcmp.eq.s32.totalorder %v3047_v38, 2  ;;  %vm2945_vm3 = vcmp.eq.s32.totalorder %v2943_v58, 0 }
 0x511   : > { %v3806_v32 = vpop.eup %3805  ;;  %v3157_v8 = vxor.u32 2147483648, %v3804_v24  ;;  %vm2948_vm7 = vcmp.eq.s32.totalorder %v2943_v58, 2  ;;  %vm3152_vm8 = vcmp.lt.s32.totalorder %v3151_v50, 2  ;;  %vm3048_vm10 = vcmp.lt.s32.totalorder %v3047_v38, 2 }
 0x512   : > { %v3245_v0 = vxor.u32 2147483648, %v3244_v22  ;;  %v3808_v60 = vpop.eup %3807  ;;  %v3154_v9 = vxor.u32 2147483648, %v3806_v32  ;;  %vm3260_vm15 = vcmp.eq.s32.totalorder %v3255_v16, 2  ;;  %vm3257_vm2 = vcmp.eq.s32.totalorder %v3255_v16, 0 }
 0x513   : > { %v3810_v27 = vpop.eup %3809  ;;  %v3050_v36 = vxor.u32 2147483648, %v3808_v60  ;;  %v3158_v20 = vsel %vm3156_vm5, %v3157_v8, %v3806_v32  ;;  %v3054_v49 = vsel %vm3052_vm4, %v3053_v37, %v3808_v60  ;;  %vm2944_vm14 = vcmp.lt.s32.totalorder %v2943_v58, 2 }
 0x514   : > { %v3246_v12 = vsel %vm3163_vm1, %v3245_v0, %v3244_v22  ;;  %v2946_v4 = vxor.u32 2147483648, %v3810_v27  ;;  %v3155_v57 = vsel %vm3153_vm11, %v3804_v24, %v3154_v9  ;;  %v2950_v7 = vsel %vm2948_vm7, %v2949_v13, %v3810_v27 }
 0x515   : > { %v3249_v59 = vsel %vm5959_vm6, %v5691_v61, %v3246_v12  ;;  %v3051_v55 = vsel %vm3049_vm13, %v3802_v29, %v3050_v36  ;;  %v3159_v35 = vsel %vm3152_vm8, %v3155_v57, %v3158_v20  ;;  %vm3256_vm9 = vcmp.lt.s32.totalorder %v3255_v16, 2 }
 0x516   : > { %3811 = vcosq.f32 %v3249_v59  ;;  %v2947_v15 = vsel %vm2945_vm3, %v3800_v40, %v2946_v4  ;;  %v3055_v34 = vsel %vm3048_vm10, %v3051_v55, %v3054_v49  ;;  %vm3045_vm1 = vweird.f32 %v5499_v41  ;;  %v3270_v41 = vpop.permute.xlu0 %3269 }
 0x517   : > { %3813 = vsinq.f32 %v3249_v59  ;;  %v2951_v52 = vsel %vm2944_vm14, %v2947_v15, %v2950_v7  ;;  %vm3253_vm6 = vweird.f32 %v5691_v61  ;;  %v3160_v28 = vsel %vm3149_vm12, nan, %v3159_v35 }
 0x518   : > { %v3056_v11 = vsel %vm3045_vm1, nan, %v3055_v34  ;;  %vm2941_vm11 = vweird.f32 %v5484_v42 }
 0x519   : > { %v2952_v10 = vsel %vm2941_vm11, nan, %v2951_v52 }
 0x51a   : > { %v3584_v5 = vpack.c.bf16 %v3160_v28, %v2952_v10 }
 0x520   : > { %v3812_v51 = vpop.eup %3811 }
 0x521   : > { %v3814_v17 = vpop.eup %3813  ;;  %v3261_v18 = vxor.u32 2147483648, %v3812_v51 }
 0x522   : > { %v3258_v1 = vxor.u32 2147483648, %v3814_v17 }
 0x523   : > { %v3262_v43 = vsel %vm3260_vm15, %v3261_v18, %v3814_v17 }
 0x524   : > { %v3259_v21 = vsel %vm3257_vm2, %v3812_v51, %v3258_v1 }
 0x525   : > { %v3263_v47 = vsel %vm3256_vm9, %v3259_v21, %v3262_v43 }
 0x526   : > { %v3264_v26 = vsel %vm3253_vm6, nan, %v3263_v47 }
 0x527   : > { %v3582_v33 = vpack.c.bf16 %v3264_v26, %v3056_v11 }
 0x529   : > { %3583 = vmatprep.subr.bf16.mxu1 %v3582_v33 }
 0x52a   : > { %3585 = vmatpush1.bf16.msra.mxu1 %v3584_v5 }
 0x52d   : > { %3557 = vmatmul.mubr.msk.f32.vlgmr.msra.gmra.mrb[12].mxu1 %vm1370_vm0, %v3265_v56 }
 0x600   : > { %v3341_v61 = vpop.f32.mrb[12].mxu1 }
 0x601   : > { %v3342_v2 = vadd.f32 %v3341_v61, %v3270_v41  ;;  %v3343_v23 = vpop.f32.mrb[13].mxu1 }
 0x602   : > { %v3344_v44 = vadd.f32 %v3343_v23, %v3270_v41 }
 0x604   : > { %v3348_v42 = vcombine.low %v3342_v2, %v3344_v44 }
 0x606   : > { %3350 = vst [vmem:[%s370_s23] sm:$0x77] %v3348_v42 }
 0x607 PF: > { %s19_s11 = sadd.s32 1, %s3837_s11   ;;  %s6122_s30 = smov %s3833_s10 }
 0x608   : > { %p16_p5 = scmp.ge.s32.totalorder %s19_s11, 4   ;;  %s6123_s10 = smov %s6125_s12 }
 0x60a   :  { %18 = sbr.rel (!%p16_p5) target bundleno = 2 (0x2), region = 86 }

</bundles_post_ra>
